<compile_context>
chip_gen: v7x
topology: tpu7x:2x2x1
jax: 0.10.0
libtpu: 0.0.40
codegen_flags: <defaults>
</compile_context>

<pallas_src>
import functools
import math

import numpy as np

import jax
import jax.numpy as jnp
from jax import lax
from jax.experimental import pallas as pl
from jax.experimental.pallas import tpu as pltpu

EPS = 1e-5  # layer_norm_eps


# ----------------------------------------------------------------------------
# Fused kernel.  One grid step per batch BLOCK of TB examples.
# ----------------------------------------------------------------------------
def _encoder_layer_kernel(x_ref, consts_ref, wqkv_ref, bqkv_ref, wp_ref,
                          w1_ref, b1_ref, w2_ref, o_ref, z_ref,
                          *, H, F, L, TB):
    bf16 = jnp.bfloat16
    HF = H * F
    Fd = F // L
    G = H * Fd
    R = TB * L

    g1 = consts_ref[0:1, :]
    be1 = consts_ref[1:2, :]
    bp = consts_ref[2:3, :]
    g2 = consts_ref[3:4, :]
    be2 = consts_ref[4:5, :]
    b2 = consts_ref[5:6, :]

    xb = x_ref[...].reshape(R, F)                                  # (R, F), leading merge (free)

    # ---- LayerNorm 1 (feature axis on lanes) ----
    mu = jnp.mean(xb, axis=-1, keepdims=True)
    var = jnp.mean((xb - mu) ** 2, axis=-1, keepdims=True)
    t = (xb - mu) * lax.rsqrt(var + EPS) * g1 + be1                # (R, F)

    # ---- fused Q|K|V projection: one MXU matmul, M = 3*H*F, N = R ----
    # Q rows are pre-permuted and pre-scaled by 1/sqrt(L) host-side (see prepare_params).
    qkv_t = lax.dot_general(wqkv_ref[...], t.astype(bf16),
                            (((1,), (1,)), ((), ())),
                            preferred_element_type=jnp.float32) + bqkv_ref[...]   # (3*H*F, R)

    # ---- attention (feature-axis attention, contraction over L), heads batched per example;
    #      the scrambled attention output is assembled into the (R, H*F) VMEM scratch z_ref.
    for b in range(TB):                                            # static unroll, TB small
        qkv_b = qkv_t[:, b * L:(b + 1) * L].reshape(3, H, F, L)    # leading split (free)
        q = qkv_b[0].astype(bf16)                                  # (H, F, L), rows = (df, l')
        k = qkv_b[1].astype(bf16)                                  # (H, F, L)
        v = qkv_b[2].astype(bf16)                                  # (H, F, L)

        s = lax.dot_general(q, k, (((2,), (2,)), ((0,), (0,))),
                            preferred_element_type=jnp.float32)    # (H, F, F), scale pre-folded

        # one fused softmax pass over the whole (H*F, F) tile
        s2 = s.reshape(HF, F)
        m = jnp.max(s2, axis=-1, keepdims=True)
        e = jnp.exp(s2 - m)
        p = e * pl.reciprocal(jnp.sum(e, axis=-1, keepdims=True), approx=True)
        p = p.reshape(H, F, F).astype(bf16)

        y = lax.dot_general(p, v, (((2,), (1,)), ((0,), (0,))),
                            preferred_element_type=jnp.float32)    # (H, F, L)

        # (H, F, L) -> (G, L', L): pure leading-dim regroup (free).  Tile g = h*Fd + df holds
        # y[h, l'*Fd + df, l]; writing it at columns [g*L, (g+1)*L) of row block b implements
        # the torch transpose(1,2).view(B, L, F*H) scramble with plain VMEM stores.
        yg = y.reshape(G, L, L)
        for g in range(G):
            z_ref[b * L:(b + 1) * L, g * L:(g + 1) * L] = yg[g]

    # ---- scrambled output projection: ONE deep matmul, M = R, K = H*F, N = F ----
    proj = jnp.dot(z_ref[...].astype(bf16), wp_ref[...],
                   preferred_element_type=jnp.float32)             # (R, F)
    y1 = xb + proj + bp                                            # residual 1

    # ---- LayerNorm 2 ----
    mu2 = jnp.mean(y1, axis=-1, keepdims=True)
    var2 = jnp.mean((y1 - mu2) ** 2, axis=-1, keepdims=True)
    t2 = (y1 - mu2) * lax.rsqrt(var2 + EPS) * g2 + be2

    # ---- MLP: Linear(F, 4F) -> GELU(tanh approx, EUP) -> Linear(4F, F) + residual ----
    h1 = jnp.dot(t2.astype(bf16), w1_ref[...],
                 preferred_element_type=jnp.float32) + b1_ref[...]                 # (R, 4F)
    c = math.sqrt(2.0 / math.pi)
    gact = 0.5 * h1 * (1.0 + jnp.tanh(c * (h1 + 0.044715 * (h1 * h1 * h1))))
    y2 = y1 + jnp.dot(gact.astype(bf16), w2_ref[...],
                      preferred_element_type=jnp.float32) + b2

    o_ref[...] = y2.reshape(TB, L, F)                              # leading split (free)


# ----------------------------------------------------------------------------
# One-time parameter preparation (row permutations, Wp gather, transposes, casts).
# Call ONCE per parameter set; the forward wrapper only does the pallas_call.
# ----------------------------------------------------------------------------
def prepare_params(params, L):
    H = params["n_heads"]
    F = params["Wq"].shape[1]
    assert F % L == 0, "fused scramble-projection requires seq_len to divide d_token"
    Fd = F // L
    f32, bf16 = jnp.float32, jnp.bfloat16

    hh = jnp.arange(H)
    lv = jnp.arange(L)
    df = jnp.arange(Fd)

    # Q: kernel row r = h*F + df*L + l'  <-  torch out-feature (l'*Fd + df)*H + h
    f_of = lv[None, None, :] * Fd + df[None, :, None]                    # (1, Fd, L)
    q_rows = (f_of * H + hh[:, None, None]).reshape(H * F)
    # K / V: kernel row r = h*F + f'     <-  torch out-feature f'*H + h
    kv_rows = (jnp.arange(F)[None, :] * H + hh[:, None]).reshape(H * F)

    qscale = 1.0 / math.sqrt(L)  # fold 1/sqrt(k.size(-1)) == 1/sqrt(L) into Q weight + bias
    Wqkv = jnp.concatenate([params["Wq"][q_rows, :] * qscale,
                            params["Wk"][kv_rows, :],
                            params["Wv"][kv_rows, :]], axis=0).astype(bf16)      # (3*H*F, F)
    bqkv = jnp.concatenate([params["bq"][q_rows] * qscale,
                            params["bk"][kv_rows],
                            params["bv"][kv_rows]]).reshape(3 * H * F, 1).astype(f32)

    # Projection weight gathered so row (h, df, l) (h-major) holds Wp[:, df*H*L + h*L + l];
    # this matches the scrambled column order of the in-kernel z scratch.
    m_idx = (df[None, :, None] * (H * L)
             + hh[:, None, None] * L
             + lv[None, None, :])                                        # (H, Fd, L)
    WpG = jnp.transpose(params["Wp"][:, m_idx.reshape(-1)], (1, 0)).astype(bf16)  # (H*F, F)

    consts = jnp.stack([params["g1"], params["be1"], params["bp"],
                        params["g2"], params["be2"], params["b2"]], axis=0).astype(f32)  # (6, F)

    W1 = params["W1"].T.astype(bf16)                                     # (F, 4F)
    b1 = params["b1"].reshape(1, 4 * F).astype(f32)
    W2 = params["W2"].T.astype(bf16)                                     # (4F, F)

    return dict(n_heads=H, d_token=F, seq_len=L,
                Wqkv=Wqkv, bqkv=bqkv, WpG=WpG, consts=consts, W1=W1, b1=b1, W2=W2)


def _pick_block_b(B, L, target_rows=256):
    tb = 1
    for cand in range(1, B + 1):
        if B % cand == 0 and cand * L <= max(target_rows, L):
            tb = cand
    return tb


# ----------------------------------------------------------------------------
# Forward wrapper: single pallas_call over batch blocks.
# ----------------------------------------------------------------------------
def transformer_encoder_layer(x, prepped, block_b=None):
    B, L, F = x.shape
    H = prepped["n_heads"]
    assert prepped["d_token"] == F and prepped["seq_len"] == L
    TB = _pick_block_b(B, L) if block_b is None else block_b
    assert B % TB == 0, "block_b must divide the batch size"
    HF = H * F
    f32 = jnp.float32

    kernel = functools.partial(_encoder_layer_kernel, H=H, F=F, L=L, TB=TB)

    return pl.pallas_call(
        kernel,
        out_shape=jax.ShapeDtypeStruct((B, L, F), f32),
        grid_spec=pltpu.PrefetchScalarGridSpec(
            num_scalar_prefetch=0,
            grid=(B // TB,),
            in_specs=[
                pl.BlockSpec((TB, L, F), lambda i: (i, 0, 0)),      # x (residual + LN1 input)
                pl.BlockSpec((6, F), lambda i: (0, 0)),             # packed g1/be1/bp/g2/be2/b2
                pl.BlockSpec((3 * HF, F), lambda i: (0, 0)),        # fused QKV weight (bf16)
                pl.BlockSpec((3 * HF, 1), lambda i: (0, 0)),        # fused QKV bias
                pl.BlockSpec((HF, F), lambda i: (0, 0)),            # proj weight, scramble-gathered (bf16)
                pl.BlockSpec((F, 4 * F), lambda i: (0, 0)),         # mlp W1 (bf16)
                pl.BlockSpec((1, 4 * F), lambda i: (0, 0)),         # mlp b1
                pl.BlockSpec((4 * F, F), lambda i: (0, 0)),         # mlp W2 (bf16)
            ],
            out_specs=pl.BlockSpec((TB, L, F), lambda i: (i, 0, 0)),
            scratch_shapes=[pltpu.VMEM((TB * L, HF), jnp.float32)],  # scrambled attn output
        ),
        compiler_params=pltpu.CompilerParams(
            dimension_semantics=("parallel",),
            vmem_limit_bytes=64 * 1024 * 1024,
        ),
    )(x, prepped["consts"], prepped["Wqkv"], prepped["bqkv"], prepped["WpG"],
      prepped["W1"], prepped["b1"], prepped["W2"])


# ----------------------------------------------------------------------------
# Deterministic synthetic parameters (torch Linear convention: weight (out, in))
# ----------------------------------------------------------------------------
def init_params(key, F, H):
    keys = jax.random.split(key, 10)
    s = 0.1

    def lin(k, out_dim, in_dim):
        kw, kb = jax.random.split(k)
        return (s * jax.random.normal(kw, (out_dim, in_dim), jnp.float32),
                s * jax.random.normal(kb, (out_dim,), jnp.float32))

    Wk, bk = lin(keys[0], F * H, F)
    Wq, bq = lin(keys[1], F * H, F)
    Wv, bv = lin(keys[2], F * H, F)
    Wp, bp = lin(keys[3], F, F * H)
    W1, b1 = lin(keys[4], 4 * F, F)
    W2, b2 = lin(keys[5], F, 4 * F)
    g1 = 1.0 + 0.1 * jax.random.normal(keys[6], (F,), jnp.float32)
    be1 = 0.1 * jax.random.normal(keys[7], (F,), jnp.float32)
    g2 = 1.0 + 0.1 * jax.random.normal(keys[8], (F,), jnp.float32)
    be2 = 0.1 * jax.random.normal(keys[9], (F,), jnp.float32)
    return dict(n_heads=H, Wk=Wk, bk=bk, Wq=Wq, bq=bq, Wv=Wv, bv=bv,
                Wp=Wp, bp=bp, W1=W1, b1=b1, W2=W2, b2=b2,
                g1=g1, be1=be1, g2=g2, be2=be2)


# ----------------------------------------------------------------------------
# Pure-JAX reference (direct port of the PyTorch forward) for validation
# ----------------------------------------------------------------------------
def ref_forward(x, p):
    B, L, F = x.shape
    H = p["n_heads"]

    def ln(z, g, be):
        mu = z.mean(-1, keepdims=True)
        var = ((z - mu) ** 2).mean(-1, keepdims=True)
        return (z - mu) / jnp.sqrt(var + EPS) * g + be

    def linear(z, W, b):
        return jnp.einsum("...i,oi->...o", z, W, precision=lax.Precision.HIGHEST) + b

    t = ln(x, p["g1"], p["be1"])
    k = linear(t, p["Wk"], p["bk"]).reshape(B, L, F, H).transpose(0, 3, 2, 1)  # (B,H,F,L)
    q = linear(t, p["Wq"], p["bq"]).reshape(B, L, F, H).transpose(0, 3, 2, 1)
    v = linear(t, p["Wv"], p["bv"]).reshape(B, L, F, H).transpose(0, 3, 2, 1)
    att = jnp.einsum("bhfl,bhgl->bhfg", q, k,
                     precision=lax.Precision.HIGHEST) * (1.0 / math.sqrt(L))
    att = jax.nn.softmax(att, axis=-1)
    y = jnp.einsum("bhfg,bhgl->bhfl", att, v, precision=lax.Precision.HIGHEST)  # (B,H,F,L)
    y = jnp.transpose(y, (0, 2, 1, 3)).reshape(B, L, F * H)
    y = x + linear(y, p["Wp"], p["bp"])
    t2 = ln(y, p["g2"], p["be2"])
    h1 = linear(t2, p["W1"], p["b1"])
    g = 0.5 * h1 * (1.0 + lax.erf(h1 / math.sqrt(2.0)))
    return y + linear(g, p["W2"], p["b2"])


if __name__ == "__main__":
    B, L, F, H = 4, 8, 32, 4   # d_token=32, n_heads=4, seq=8, batch=4
    key = jax.random.PRNGKey(0)
    kx, kp = jax.random.split(key)
    x = jax.random.normal(kx, (B, L, F), jnp.float32)
    params = init_params(kp, F, H)

    prepped = prepare_params(params, L)            # one-time weight re-layout (cached outside fwd)
    out = jax.block_until_ready(transformer_encoder_layer(x, prepped, block_b=2))

    ref = ref_forward(x, params)
    # Tolerance accounts for bf16 matmul inputs (f32 accumulation), the approximate EUP
    # reciprocal in the softmax denominator, and the tanh-approximate GELU.
    np.testing.assert_allclose(np.asarray(out), np.asarray(ref), rtol=2e-2, atol=2e-2)
    print("KERNEL_OK")
</pallas_src>

<mosaic_0001>
module attributes {stable_mosaic.version = 11 : i64} {
  func.func @_encoder_layer_kernel(%arg0: i32, %arg1: memref<2x8x32xf32, #tpu.memory_space<vmem>>, %arg2: memref<6x32xf32, #tpu.memory_space<vmem>>, %arg3: memref<384x32xbf16, #tpu.memory_space<vmem>>, %arg4: memref<384x1xf32, #tpu.memory_space<vmem>>, %arg5: memref<128x32xbf16, #tpu.memory_space<vmem>>, %arg6: memref<32x128xbf16, #tpu.memory_space<vmem>>, %arg7: memref<1x128xf32, #tpu.memory_space<vmem>>, %arg8: memref<128x32xbf16, #tpu.memory_space<vmem>>, %arg9: memref<2x8x32xf32, #tpu.memory_space<vmem>>, %arg10: memref<16x128xf32, #tpu.memory_space<vmem>>) attributes {dimension_semantics = [#tpu.dimension_semantics<parallel>], iteration_bounds = array<i64: 2>, scalar_prefetch = 0 : i64, scratch_operands = 1 : i64, tpu.core_type = #tpu.core_type<tc>, window_params = [{transform_indices = @transform_0, window_bounds = array<i64: 2, 8, 32>}, {pipeline_mode = #tpu.pipeline_mode<synchronous>, transform_indices = @transform_1, window_bounds = array<i64: 6, 32>}, {pipeline_mode = #tpu.pipeline_mode<synchronous>, transform_indices = @transform_2, window_bounds = array<i64: 384, 32>}, {pipeline_mode = #tpu.pipeline_mode<synchronous>, transform_indices = @transform_3, window_bounds = array<i64: 384, 1>}, {pipeline_mode = #tpu.pipeline_mode<synchronous>, transform_indices = @transform_4, window_bounds = array<i64: 128, 32>}, {pipeline_mode = #tpu.pipeline_mode<synchronous>, transform_indices = @transform_5, window_bounds = array<i64: 32, 128>}, {pipeline_mode = #tpu.pipeline_mode<synchronous>, transform_indices = @transform_6, window_bounds = array<i64: 1, 128>}, {pipeline_mode = #tpu.pipeline_mode<synchronous>, transform_indices = @transform_7, window_bounds = array<i64: 128, 32>}, {transform_indices = @transform_8, window_bounds = array<i64: 2, 8, 32>}]} {
    %c0 = arith.constant 0 : index
    %c0_0 = arith.constant 0 : index
    %0 = vector.load %arg2[%c0, %c0_0] : memref<6x32xf32, #tpu.memory_space<vmem>>, vector<1x32xf32>
    %c1 = arith.constant 1 : index
    %c0_1 = arith.constant 0 : index
    %1 = vector.load %arg2[%c1, %c0_1] : memref<6x32xf32, #tpu.memory_space<vmem>>, vector<1x32xf32>
    %c2 = arith.constant 2 : index
    %c0_2 = arith.constant 0 : index
    %2 = vector.load %arg2[%c2, %c0_2] : memref<6x32xf32, #tpu.memory_space<vmem>>, vector<1x32xf32>
    %c3 = arith.constant 3 : index
    %c0_3 = arith.constant 0 : index
    %3 = vector.load %arg2[%c3, %c0_3] : memref<6x32xf32, #tpu.memory_space<vmem>>, vector<1x32xf32>
    %c4 = arith.constant 4 : index
    %c0_4 = arith.constant 0 : index
    %4 = vector.load %arg2[%c4, %c0_4] : memref<6x32xf32, #tpu.memory_space<vmem>>, vector<1x32xf32>
    %c5 = arith.constant 5 : index
    %c0_5 = arith.constant 0 : index
    %5 = vector.load %arg2[%c5, %c0_5] : memref<6x32xf32, #tpu.memory_space<vmem>>, vector<1x32xf32>
    %c0_6 = arith.constant 0 : index
    %c0_7 = arith.constant 0 : index
    %c0_8 = arith.constant 0 : index
    %6 = vector.load %arg1[%c0_6, %c0_7, %c0_8] : memref<2x8x32xf32, #tpu.memory_space<vmem>>, vector<2x8x32xf32>
    %7 = vector.shape_cast %6 : vector<2x8x32xf32> to vector<16x32xf32>
    %cst = arith.constant dense<0.000000e+00> : vector<16xf32>
    %8 = vector.multi_reduction <add>, %7, %cst [1] : vector<16x32xf32> to vector<16xf32>
    %9 = vector.shape_cast %8 : vector<16xf32> to vector<16x1xf32>
    %cst_9 = arith.constant 3.200000e+01 : f32
    %10 = vector.broadcast %cst_9 : f32 to vector<16x1xf32>
    %11 = arith.divf %9, %10 : vector<16x1xf32>
    %12 = vector.broadcast %11 : vector<16x1xf32> to vector<16x32xf32>
    %13 = arith.subf %7, %12 : vector<16x32xf32>
    %14 = arith.mulf %13, %13 : vector<16x32xf32>
    %cst_10 = arith.constant dense<0.000000e+00> : vector<16xf32>
    %15 = vector.multi_reduction <add>, %14, %cst_10 [1] : vector<16x32xf32> to vector<16xf32>
    %16 = vector.shape_cast %15 : vector<16xf32> to vector<16x1xf32>
    %cst_11 = arith.constant 3.200000e+01 : f32
    %17 = vector.broadcast %cst_11 : f32 to vector<16x1xf32>
    %18 = arith.divf %16, %17 : vector<16x1xf32>
    %19 = vector.broadcast %11 : vector<16x1xf32> to vector<16x32xf32>
    %20 = arith.subf %7, %19 : vector<16x32xf32>
    %cst_12 = arith.constant 9.99999974E-6 : f32
    %21 = vector.broadcast %cst_12 : f32 to vector<16x1xf32>
    %22 = arith.addf %18, %21 : vector<16x1xf32>
    %23 = math.rsqrt %22 : vector<16x1xf32>
    %24 = vector.broadcast %23 : vector<16x1xf32> to vector<16x32xf32>
    %25 = arith.mulf %20, %24 : vector<16x32xf32>
    %26 = vector.broadcast %0 : vector<1x32xf32> to vector<16x32xf32>
    %27 = arith.mulf %25, %26 : vector<16x32xf32>
    %28 = vector.broadcast %1 : vector<1x32xf32> to vector<16x32xf32>
    %29 = arith.addf %27, %28 : vector<16x32xf32>
    %c0_13 = arith.constant 0 : index
    %c0_14 = arith.constant 0 : index
    %30 = vector.load %arg3[%c0_13, %c0_14] : memref<384x32xbf16, #tpu.memory_space<vmem>>, vector<384x32xbf16>
    %31 = arith.truncf %29 : vector<16x32xf32> to vector<16x32xbf16>
    %cst_15 = arith.constant dense<0.000000e+00> : vector<384x16xf32>
    %32 = tpu.matmul %30, %31, %cst_15 {dimension_numbers = #tpu.dot_dimension_numbers<[1], [1], [0], [0], [0, 0, 1, 0], [], []>} : vector<384x32xbf16>, vector<16x32xbf16>, vector<384x16xf32> -> vector<384x16xf32>
    %c0_16 = arith.constant 0 : index
    %c0_17 = arith.constant 0 : index
    %33 = vector.load %arg4[%c0_16, %c0_17] : memref<384x1xf32, #tpu.memory_space<vmem>>, vector<384x1xf32>
    %34 = vector.broadcast %33 : vector<384x1xf32> to vector<384x16xf32>
    %35 = arith.addf %32, %34 : vector<384x16xf32>
    %36 = vector.extract_strided_slice %35 {offsets = [0, 0], sizes = [384, 8], strides = [1, 1]} : vector<384x16xf32> to vector<384x8xf32>
    %37 = vector.shape_cast %36 : vector<384x8xf32> to vector<3x4x32x8xf32>
    %38 = vector.extract_strided_slice %37 {offsets = [0, 0, 0, 0], sizes = [1, 4, 32, 8], strides = [1, 1, 1, 1]} : vector<3x4x32x8xf32> to vector<1x4x32x8xf32>
    %39 = vector.shape_cast %38 : vector<1x4x32x8xf32> to vector<4x32x8xf32>
    %40 = arith.truncf %39 : vector<4x32x8xf32> to vector<4x32x8xbf16>
    %41 = vector.extract_strided_slice %37 {offsets = [1, 0, 0, 0], sizes = [1, 4, 32, 8], strides = [1, 1, 1, 1]} : vector<3x4x32x8xf32> to vector<1x4x32x8xf32>
    %42 = vector.shape_cast %41 : vector<1x4x32x8xf32> to vector<4x32x8xf32>
    %43 = arith.truncf %42 : vector<4x32x8xf32> to vector<4x32x8xbf16>
    %44 = vector.extract_strided_slice %37 {offsets = [2, 0, 0, 0], sizes = [1, 4, 32, 8], strides = [1, 1, 1, 1]} : vector<3x4x32x8xf32> to vector<1x4x32x8xf32>
    %45 = vector.shape_cast %44 : vector<1x4x32x8xf32> to vector<4x32x8xf32>
    %46 = arith.truncf %45 : vector<4x32x8xf32> to vector<4x32x8xbf16>
    %cst_18 = arith.constant dense<0.000000e+00> : vector<4x32x32xf32>
    %47 = tpu.matmul %40, %43, %cst_18 {dimension_numbers = #tpu.dot_dimension_numbers<[2], [2], [1], [1], [0, 0, 0, 1, 1, 1], [0], [0]>} : vector<4x32x8xbf16>, vector<4x32x8xbf16>, vector<4x32x32xf32> -> vector<4x32x32xf32>
    %48 = vector.shape_cast %47 : vector<4x32x32xf32> to vector<128x32xf32>
    %cst_19 = arith.constant dense<0xFF800000> : vector<128xf32>
    %49 = vector.multi_reduction <maximumf>, %48, %cst_19 [1] : vector<128x32xf32> to vector<128xf32>
    %50 = vector.shape_cast %49 : vector<128xf32> to vector<128x1xf32>
    %51 = vector.broadcast %50 : vector<128x1xf32> to vector<128x32xf32>
    %52 = arith.subf %48, %51 : vector<128x32xf32>
    %53 = math.exp %52 : vector<128x32xf32>
    %cst_20 = arith.constant dense<0.000000e+00> : vector<128xf32>
    %54 = vector.multi_reduction <add>, %53, %cst_20 [1] : vector<128x32xf32> to vector<128xf32>
    %55 = vector.shape_cast %54 : vector<128xf32> to vector<128x1xf32>
    %56 = tpu.reciprocal %55 {approx = true} : vector<128x1xf32> -> vector<128x1xf32>
    %57 = vector.broadcast %56 : vector<128x1xf32> to vector<128x32xf32>
    %58 = arith.mulf %53, %57 : vector<128x32xf32>
    %59 = vector.shape_cast %58 : vector<128x32xf32> to vector<4x32x32xf32>
    %60 = arith.truncf %59 : vector<4x32x32xf32> to vector<4x32x32xbf16>
    %cst_21 = arith.constant dense<0.000000e+00> : vector<4x32x8xf32>
    %61 = tpu.matmul %60, %46, %cst_21 {dimension_numbers = #tpu.dot_dimension_numbers<[2], [1], [1], [2], [0, 0, 0, 1, 1, 2], [0], [0]>} : vector<4x32x32xbf16>, vector<4x32x8xbf16>, vector<4x32x8xf32> -> vector<4x32x8xf32>
    %62 = vector.shape_cast %61 : vector<4x32x8xf32> to vector<16x8x8xf32>
    %63 = vector.extract_strided_slice %62 {offsets = [0, 0, 0], sizes = [1, 8, 8], strides = [1, 1, 1]} : vector<16x8x8xf32> to vector<1x8x8xf32>
    %64 = vector.shape_cast %63 : vector<1x8x8xf32> to vector<8x8xf32>
    %c0_22 = arith.constant 0 : index
    %c0_23 = arith.constant 0 : index
    %65 = vector.load %arg10[%c0_22, %c0_23] : memref<16x128xf32, #tpu.memory_space<vmem>>, vector<8x8xf32>
    tpu.vector_store %arg10[%c0_22, %c0_23], %64 {strides = array<i32>} : memref<16x128xf32, #tpu.memory_space<vmem>>, vector<8x8xf32>,
    %66 = vector.extract_strided_slice %62 {offsets = [1, 0, 0], sizes = [1, 8, 8], strides = [1, 1, 1]} : vector<16x8x8xf32> to vector<1x8x8xf32>
    %67 = vector.shape_cast %66 : vector<1x8x8xf32> to vector<8x8xf32>
    %c0_24 = arith.constant 0 : index
    %c8 = arith.constant 8 : index
    %68 = vector.load %arg10[%c0_24, %c8] : memref<16x128xf32, #tpu.memory_space<vmem>>, vector<8x8xf32>
    tpu.vector_store %arg10[%c0_24, %c8], %67 {strides = array<i32>} : memref<16x128xf32, #tpu.memory_space<vmem>>, vector<8x8xf32>,
    %69 = vector.extract_strided_slice %62 {offsets = [2, 0, 0], sizes = [1, 8, 8], strides = [1, 1, 1]} : vector<16x8x8xf32> to vector<1x8x8xf32>
    %70 = vector.shape_cast %69 : vector<1x8x8xf32> to vector<8x8xf32>
    %c0_25 = arith.constant 0 : index
    %c16 = arith.constant 16 : index
    %71 = vector.load %arg10[%c0_25, %c16] : memref<16x128xf32, #tpu.memory_space<vmem>>, vector<8x8xf32>
    tpu.vector_store %arg10[%c0_25, %c16], %70 {strides = array<i32>} : memref<16x128xf32, #tpu.memory_space<vmem>>, vector<8x8xf32>,
    %72 = vector.extract_strided_slice %62 {offsets = [3, 0, 0], sizes = [1, 8, 8], strides = [1, 1, 1]} : vector<16x8x8xf32> to vector<1x8x8xf32>
    %73 = vector.shape_cast %72 : vector<1x8x8xf32> to vector<8x8xf32>
    %c0_26 = arith.constant 0 : index
    %c24 = arith.constant 24 : index
    %74 = vector.load %arg10[%c0_26, %c24] : memref<16x128xf32, #tpu.memory_space<vmem>>, vector<8x8xf32>
    tpu.vector_store %arg10[%c0_26, %c24], %73 {strides = array<i32>} : memref<16x128xf32, #tpu.memory_space<vmem>>, vector<8x8xf32>,
    %75 = vector.extract_strided_slice %62 {offsets = [4, 0, 0], sizes = [1, 8, 8], strides = [1, 1, 1]} : vector<16x8x8xf32> to vector<1x8x8xf32>
    %76 = vector.shape_cast %75 : vector<1x8x8xf32> to vector<8x8xf32>
    %c0_27 = arith.constant 0 : index
    %c32 = arith.constant 32 : index
    %77 = vector.load %arg10[%c0_27, %c32] : memref<16x128xf32, #tpu.memory_space<vmem>>, vector<8x8xf32>
    tpu.vector_store %arg10[%c0_27, %c32], %76 {strides = array<i32>} : memref<16x128xf32, #tpu.memory_space<vmem>>, vector<8x8xf32>,
    %78 = vector.extract_strided_slice %62 {offsets = [5, 0, 0], sizes = [1, 8, 8], strides = [1, 1, 1]} : vector<16x8x8xf32> to vector<1x8x8xf32>
    %79 = vector.shape_cast %78 : vector<1x8x8xf32> to vector<8x8xf32>
    %c0_28 = arith.constant 0 : index
    %c40 = arith.constant 40 : index
    %80 = vector.load %arg10[%c0_28, %c40] : memref<16x128xf32, #tpu.memory_space<vmem>>, vector<8x8xf32>
    tpu.vector_store %arg10[%c0_28, %c40], %79 {strides = array<i32>} : memref<16x128xf32, #tpu.memory_space<vmem>>, vector<8x8xf32>,
    %81 = vector.extract_strided_slice %62 {offsets = [6, 0, 0], sizes = [1, 8, 8], strides = [1, 1, 1]} : vector<16x8x8xf32> to vector<1x8x8xf32>
    %82 = vector.shape_cast %81 : vector<1x8x8xf32> to vector<8x8xf32>
    %c0_29 = arith.constant 0 : index
    %c48 = arith.constant 48 : index
    %83 = vector.load %arg10[%c0_29, %c48] : memref<16x128xf32, #tpu.memory_space<vmem>>, vector<8x8xf32>
    tpu.vector_store %arg10[%c0_29, %c48], %82 {strides = array<i32>} : memref<16x128xf32, #tpu.memory_space<vmem>>, vector<8x8xf32>,
    %84 = vector.extract_strided_slice %62 {offsets = [7, 0, 0], sizes = [1, 8, 8], strides = [1, 1, 1]} : vector<16x8x8xf32> to vector<1x8x8xf32>
    %85 = vector.shape_cast %84 : vector<1x8x8xf32> to vector<8x8xf32>
    %c0_30 = arith.constant 0 : index
    %c56 = arith.constant 56 : index
    %86 = vector.load %arg10[%c0_30, %c56] : memref<16x128xf32, #tpu.memory_space<vmem>>, vector<8x8xf32>
    tpu.vector_store %arg10[%c0_30, %c56], %85 {strides = array<i32>} : memref<16x128xf32, #tpu.memory_space<vmem>>, vector<8x8xf32>,
    %87 = vector.extract_strided_slice %62 {offsets = [8, 0, 0], sizes = [1, 8, 8], strides = [1, 1, 1]} : vector<16x8x8xf32> to vector<1x8x8xf32>
    %88 = vector.shape_cast %87 : vector<1x8x8xf32> to vector<8x8xf32>
    %c0_31 = arith.constant 0 : index
    %c64 = arith.constant 64 : index
    %89 = vector.load %arg10[%c0_31, %c64] : memref<16x128xf32, #tpu.memory_space<vmem>>, vector<8x8xf32>
    tpu.vector_store %arg10[%c0_31, %c64], %88 {strides = array<i32>} : memref<16x128xf32, #tpu.memory_space<vmem>>, vector<8x8xf32>,
    %90 = vector.extract_strided_slice %62 {offsets = [9, 0, 0], sizes = [1, 8, 8], strides = [1, 1, 1]} : vector<16x8x8xf32> to vector<1x8x8xf32>
    %91 = vector.shape_cast %90 : vector<1x8x8xf32> to vector<8x8xf32>
    %c0_32 = arith.constant 0 : index
    %c72 = arith.constant 72 : index
    %92 = vector.load %arg10[%c0_32, %c72] : memref<16x128xf32, #tpu.memory_space<vmem>>, vector<8x8xf32>
    tpu.vector_store %arg10[%c0_32, %c72], %91 {strides = array<i32>} : memref<16x128xf32, #tpu.memory_space<vmem>>, vector<8x8xf32>,
    %93 = vector.extract_strided_slice %62 {offsets = [10, 0, 0], sizes = [1, 8, 8], strides = [1, 1, 1]} : vector<16x8x8xf32> to vector<1x8x8xf32>
    %94 = vector.shape_cast %93 : vector<1x8x8xf32> to vector<8x8xf32>
    %c0_33 = arith.constant 0 : index
    %c80 = arith.constant 80 : index
    %95 = vector.load %arg10[%c0_33, %c80] : memref<16x128xf32, #tpu.memory_space<vmem>>, vector<8x8xf32>
    tpu.vector_store %arg10[%c0_33, %c80], %94 {strides = array<i32>} : memref<16x128xf32, #tpu.memory_space<vmem>>, vector<8x8xf32>,
    %96 = vector.extract_strided_slice %62 {offsets = [11, 0, 0], sizes = [1, 8, 8], strides = [1, 1, 1]} : vector<16x8x8xf32> to vector<1x8x8xf32>
    %97 = vector.shape_cast %96 : vector<1x8x8xf32> to vector<8x8xf32>
    %c0_34 = arith.constant 0 : index
    %c88 = arith.constant 88 : index
    %98 = vector.load %arg10[%c0_34, %c88] : memref<16x128xf32, #tpu.memory_space<vmem>>, vector<8x8xf32>
    tpu.vector_store %arg10[%c0_34, %c88], %97 {strides = array<i32>} : memref<16x128xf32, #tpu.memory_space<vmem>>, vector<8x8xf32>,
    %99 = vector.extract_strided_slice %62 {offsets = [12, 0, 0], sizes = [1, 8, 8], strides = [1, 1, 1]} : vector<16x8x8xf32> to vector<1x8x8xf32>
    %100 = vector.shape_cast %99 : vector<1x8x8xf32> to vector<8x8xf32>
    %c0_35 = arith.constant 0 : index
    %c96 = arith.constant 96 : index
    %101 = vector.load %arg10[%c0_35, %c96] : memref<16x128xf32, #tpu.memory_space<vmem>>, vector<8x8xf32>
    tpu.vector_store %arg10[%c0_35, %c96], %100 {strides = array<i32>} : memref<16x128xf32, #tpu.memory_space<vmem>>, vector<8x8xf32>,
    %102 = vector.extract_strided_slice %62 {offsets = [13, 0, 0], sizes = [1, 8, 8], strides = [1, 1, 1]} : vector<16x8x8xf32> to vector<1x8x8xf32>
    %103 = vector.shape_cast %102 : vector<1x8x8xf32> to vector<8x8xf32>
    %c0_36 = arith.constant 0 : index
    %c104 = arith.constant 104 : index
    %104 = vector.load %arg10[%c0_36, %c104] : memref<16x128xf32, #tpu.memory_space<vmem>>, vector<8x8xf32>
    tpu.vector_store %arg10[%c0_36, %c104], %103 {strides = array<i32>} : memref<16x128xf32, #tpu.memory_space<vmem>>, vector<8x8xf32>,
    %105 = vector.extract_strided_slice %62 {offsets = [14, 0, 0], sizes = [1, 8, 8], strides = [1, 1, 1]} : vector<16x8x8xf32> to vector<1x8x8xf32>
    %106 = vector.shape_cast %105 : vector<1x8x8xf32> to vector<8x8xf32>
    %c0_37 = arith.constant 0 : index
    %c112 = arith.constant 112 : index
    %107 = vector.load %arg10[%c0_37, %c112] : memref<16x128xf32, #tpu.memory_space<vmem>>, vector<8x8xf32>
    tpu.vector_store %arg10[%c0_37, %c112], %106 {strides = array<i32>} : memref<16x128xf32, #tpu.memory_space<vmem>>, vector<8x8xf32>,
    %108 = vector.extract_strided_slice %62 {offsets = [15, 0, 0], sizes = [1, 8, 8], strides = [1, 1, 1]} : vector<16x8x8xf32> to vector<1x8x8xf32>
    %109 = vector.shape_cast %108 : vector<1x8x8xf32> to vector<8x8xf32>
    %c0_38 = arith.constant 0 : index
    %c120 = arith.constant 120 : index
    %110 = vector.load %arg10[%c0_38, %c120] : memref<16x128xf32, #tpu.memory_space<vmem>>, vector<8x8xf32>
    tpu.vector_store %arg10[%c0_38, %c120], %109 {strides = array<i32>} : memref<16x128xf32, #tpu.memory_space<vmem>>, vector<8x8xf32>,
    %111 = vector.extract_strided_slice %35 {offsets = [0, 8], sizes = [384, 8], strides = [1, 1]} : vector<384x16xf32> to vector<384x8xf32>
    %112 = vector.shape_cast %111 : vector<384x8xf32> to vector<3x4x32x8xf32>
    %113 = vector.extract_strided_slice %112 {offsets = [0, 0, 0, 0], sizes = [1, 4, 32, 8], strides = [1, 1, 1, 1]} : vector<3x4x32x8xf32> to vector<1x4x32x8xf32>
    %114 = vector.shape_cast %113 : vector<1x4x32x8xf32> to vector<4x32x8xf32>
    %115 = arith.truncf %114 : vector<4x32x8xf32> to vector<4x32x8xbf16>
    %116 = vector.extract_strided_slice %112 {offsets = [1, 0, 0, 0], sizes = [1, 4, 32, 8], strides = [1, 1, 1, 1]} : vector<3x4x32x8xf32> to vector<1x4x32x8xf32>
    %117 = vector.shape_cast %116 : vector<1x4x32x8xf32> to vector<4x32x8xf32>
    %118 = arith.truncf %117 : vector<4x32x8xf32> to vector<4x32x8xbf16>
    %119 = vector.extract_strided_slice %112 {offsets = [2, 0, 0, 0], sizes = [1, 4, 32, 8], strides = [1, 1, 1, 1]} : vector<3x4x32x8xf32> to vector<1x4x32x8xf32>
    %120 = vector.shape_cast %119 : vector<1x4x32x8xf32> to vector<4x32x8xf32>
    %121 = arith.truncf %120 : vector<4x32x8xf32> to vector<4x32x8xbf16>
    %cst_39 = arith.constant dense<0.000000e+00> : vector<4x32x32xf32>
    %122 = tpu.matmul %115, %118, %cst_39 {dimension_numbers = #tpu.dot_dimension_numbers<[2], [2], [1], [1], [0, 0, 0, 1, 1, 1], [0], [0]>} : vector<4x32x8xbf16>, vector<4x32x8xbf16>, vector<4x32x32xf32> -> vector<4x32x32xf32>
    %123 = vector.shape_cast %122 : vector<4x32x32xf32> to vector<128x32xf32>
    %cst_40 = arith.constant dense<0xFF800000> : vector<128xf32>
    %124 = vector.multi_reduction <maximumf>, %123, %cst_40 [1] : vector<128x32xf32> to vector<128xf32>
    %125 = vector.shape_cast %124 : vector<128xf32> to vector<128x1xf32>
    %126 = vector.broadcast %125 : vector<128x1xf32> to vector<128x32xf32>
    %127 = arith.subf %123, %126 : vector<128x32xf32>
    %128 = math.exp %127 : vector<128x32xf32>
    %cst_41 = arith.constant dense<0.000000e+00> : vector<128xf32>
    %129 = vector.multi_reduction <add>, %128, %cst_41 [1] : vector<128x32xf32> to vector<128xf32>
    %130 = vector.shape_cast %129 : vector<128xf32> to vector<128x1xf32>
    %131 = tpu.reciprocal %130 {approx = true} : vector<128x1xf32> -> vector<128x1xf32>
    %132 = vector.broadcast %131 : vector<128x1xf32> to vector<128x32xf32>
    %133 = arith.mulf %128, %132 : vector<128x32xf32>
    %134 = vector.shape_cast %133 : vector<128x32xf32> to vector<4x32x32xf32>
    %135 = arith.truncf %134 : vector<4x32x32xf32> to vector<4x32x32xbf16>
    %cst_42 = arith.constant dense<0.000000e+00> : vector<4x32x8xf32>
    %136 = tpu.matmul %135, %121, %cst_42 {dimension_numbers = #tpu.dot_dimension_numbers<[2], [1], [1], [2], [0, 0, 0, 1, 1, 2], [0], [0]>} : vector<4x32x32xbf16>, vector<4x32x8xbf16>, vector<4x32x8xf32> -> vector<4x32x8xf32>
    %137 = vector.shape_cast %136 : vector<4x32x8xf32> to vector<16x8x8xf32>
    %138 = vector.extract_strided_slice %137 {offsets = [0, 0, 0], sizes = [1, 8, 8], strides = [1, 1, 1]} : vector<16x8x8xf32> to vector<1x8x8xf32>
    %139 = vector.shape_cast %138 : vector<1x8x8xf32> to vector<8x8xf32>
    %c8_43 = arith.constant 8 : index
    %c0_44 = arith.constant 0 : index
    %140 = vector.load %arg10[%c8_43, %c0_44] : memref<16x128xf32, #tpu.memory_space<vmem>>, vector<8x8xf32>
    tpu.vector_store %arg10[%c8_43, %c0_44], %139 {strides = array<i32>} : memref<16x128xf32, #tpu.memory_space<vmem>>, vector<8x8xf32>,
    %141 = vector.extract_strided_slice %137 {offsets = [1, 0, 0], sizes = [1, 8, 8], strides = [1, 1, 1]} : vector<16x8x8xf32> to vector<1x8x8xf32>
    %142 = vector.shape_cast %141 : vector<1x8x8xf32> to vector<8x8xf32>
    %c8_45 = arith.constant 8 : index
    %c8_46 = arith.constant 8 : index
    %143 = vector.load %arg10[%c8_45, %c8_46] : memref<16x128xf32, #tpu.memory_space<vmem>>, vector<8x8xf32>
    tpu.vector_store %arg10[%c8_45, %c8_46], %142 {strides = array<i32>} : memref<16x128xf32, #tpu.memory_space<vmem>>, vector<8x8xf32>,
    %144 = vector.extract_strided_slice %137 {offsets = [2, 0, 0], sizes = [1, 8, 8], strides = [1, 1, 1]} : vector<16x8x8xf32> to vector<1x8x8xf32>
    %145 = vector.shape_cast %144 : vector<1x8x8xf32> to vector<8x8xf32>
    %c8_47 = arith.constant 8 : index
    %c16_48 = arith.constant 16 : index
    %146 = vector.load %arg10[%c8_47, %c16_48] : memref<16x128xf32, #tpu.memory_space<vmem>>, vector<8x8xf32>
    tpu.vector_store %arg10[%c8_47, %c16_48], %145 {strides = array<i32>} : memref<16x128xf32, #tpu.memory_space<vmem>>, vector<8x8xf32>,
    %147 = vector.extract_strided_slice %137 {offsets = [3, 0, 0], sizes = [1, 8, 8], strides = [1, 1, 1]} : vector<16x8x8xf32> to vector<1x8x8xf32>
    %148 = vector.shape_cast %147 : vector<1x8x8xf32> to vector<8x8xf32>
    %c8_49 = arith.constant 8 : index
    %c24_50 = arith.constant 24 : index
    %149 = vector.load %arg10[%c8_49, %c24_50] : memref<16x128xf32, #tpu.memory_space<vmem>>, vector<8x8xf32>
    tpu.vector_store %arg10[%c8_49, %c24_50], %148 {strides = array<i32>} : memref<16x128xf32, #tpu.memory_space<vmem>>, vector<8x8xf32>,
    %150 = vector.extract_strided_slice %137 {offsets = [4, 0, 0], sizes = [1, 8, 8], strides = [1, 1, 1]} : vector<16x8x8xf32> to vector<1x8x8xf32>
    %151 = vector.shape_cast %150 : vector<1x8x8xf32> to vector<8x8xf32>
    %c8_51 = arith.constant 8 : index
    %c32_52 = arith.constant 32 : index
    %152 = vector.load %arg10[%c8_51, %c32_52] : memref<16x128xf32, #tpu.memory_space<vmem>>, vector<8x8xf32>
    tpu.vector_store %arg10[%c8_51, %c32_52], %151 {strides = array<i32>} : memref<16x128xf32, #tpu.memory_space<vmem>>, vector<8x8xf32>,
    %153 = vector.extract_strided_slice %137 {offsets = [5, 0, 0], sizes = [1, 8, 8], strides = [1, 1, 1]} : vector<16x8x8xf32> to vector<1x8x8xf32>
    %154 = vector.shape_cast %153 : vector<1x8x8xf32> to vector<8x8xf32>
    %c8_53 = arith.constant 8 : index
    %c40_54 = arith.constant 40 : index
    %155 = vector.load %arg10[%c8_53, %c40_54] : memref<16x128xf32, #tpu.memory_space<vmem>>, vector<8x8xf32>
    tpu.vector_store %arg10[%c8_53, %c40_54], %154 {strides = array<i32>} : memref<16x128xf32, #tpu.memory_space<vmem>>, vector<8x8xf32>,
    %156 = vector.extract_strided_slice %137 {offsets = [6, 0, 0], sizes = [1, 8, 8], strides = [1, 1, 1]} : vector<16x8x8xf32> to vector<1x8x8xf32>
    %157 = vector.shape_cast %156 : vector<1x8x8xf32> to vector<8x8xf32>
    %c8_55 = arith.constant 8 : index
    %c48_56 = arith.constant 48 : index
    %158 = vector.load %arg10[%c8_55, %c48_56] : memref<16x128xf32, #tpu.memory_space<vmem>>, vector<8x8xf32>
    tpu.vector_store %arg10[%c8_55, %c48_56], %157 {strides = array<i32>} : memref<16x128xf32, #tpu.memory_space<vmem>>, vector<8x8xf32>,
    %159 = vector.extract_strided_slice %137 {offsets = [7, 0, 0], sizes = [1, 8, 8], strides = [1, 1, 1]} : vector<16x8x8xf32> to vector<1x8x8xf32>
    %160 = vector.shape_cast %159 : vector<1x8x8xf32> to vector<8x8xf32>
    %c8_57 = arith.constant 8 : index
    %c56_58 = arith.constant 56 : index
    %161 = vector.load %arg10[%c8_57, %c56_58] : memref<16x128xf32, #tpu.memory_space<vmem>>, vector<8x8xf32>
    tpu.vector_store %arg10[%c8_57, %c56_58], %160 {strides = array<i32>} : memref<16x128xf32, #tpu.memory_space<vmem>>, vector<8x8xf32>,
    %162 = vector.extract_strided_slice %137 {offsets = [8, 0, 0], sizes = [1, 8, 8], strides = [1, 1, 1]} : vector<16x8x8xf32> to vector<1x8x8xf32>
    %163 = vector.shape_cast %162 : vector<1x8x8xf32> to vector<8x8xf32>
    %c8_59 = arith.constant 8 : index
    %c64_60 = arith.constant 64 : index
    %164 = vector.load %arg10[%c8_59, %c64_60] : memref<16x128xf32, #tpu.memory_space<vmem>>, vector<8x8xf32>
    tpu.vector_store %arg10[%c8_59, %c64_60], %163 {strides = array<i32>} : memref<16x128xf32, #tpu.memory_space<vmem>>, vector<8x8xf32>,
    %165 = vector.extract_strided_slice %137 {offsets = [9, 0, 0], sizes = [1, 8, 8], strides = [1, 1, 1]} : vector<16x8x8xf32> to vector<1x8x8xf32>
    %166 = vector.shape_cast %165 : vector<1x8x8xf32> to vector<8x8xf32>
    %c8_61 = arith.constant 8 : index
    %c72_62 = arith.constant 72 : index
    %167 = vector.load %arg10[%c8_61, %c72_62] : memref<16x128xf32, #tpu.memory_space<vmem>>, vector<8x8xf32>
    tpu.vector_store %arg10[%c8_61, %c72_62], %166 {strides = array<i32>} : memref<16x128xf32, #tpu.memory_space<vmem>>, vector<8x8xf32>,
    %168 = vector.extract_strided_slice %137 {offsets = [10, 0, 0], sizes = [1, 8, 8], strides = [1, 1, 1]} : vector<16x8x8xf32> to vector<1x8x8xf32>
    %169 = vector.shape_cast %168 : vector<1x8x8xf32> to vector<8x8xf32>
    %c8_63 = arith.constant 8 : index
    %c80_64 = arith.constant 80 : index
    %170 = vector.load %arg10[%c8_63, %c80_64] : memref<16x128xf32, #tpu.memory_space<vmem>>, vector<8x8xf32>
    tpu.vector_store %arg10[%c8_63, %c80_64], %169 {strides = array<i32>} : memref<16x128xf32, #tpu.memory_space<vmem>>, vector<8x8xf32>,
    %171 = vector.extract_strided_slice %137 {offsets = [11, 0, 0], sizes = [1, 8, 8], strides = [1, 1, 1]} : vector<16x8x8xf32> to vector<1x8x8xf32>
    %172 = vector.shape_cast %171 : vector<1x8x8xf32> to vector<8x8xf32>
    %c8_65 = arith.constant 8 : index
    %c88_66 = arith.constant 88 : index
    %173 = vector.load %arg10[%c8_65, %c88_66] : memref<16x128xf32, #tpu.memory_space<vmem>>, vector<8x8xf32>
    tpu.vector_store %arg10[%c8_65, %c88_66], %172 {strides = array<i32>} : memref<16x128xf32, #tpu.memory_space<vmem>>, vector<8x8xf32>,
    %174 = vector.extract_strided_slice %137 {offsets = [12, 0, 0], sizes = [1, 8, 8], strides = [1, 1, 1]} : vector<16x8x8xf32> to vector<1x8x8xf32>
    %175 = vector.shape_cast %174 : vector<1x8x8xf32> to vector<8x8xf32>
    %c8_67 = arith.constant 8 : index
    %c96_68 = arith.constant 96 : index
    %176 = vector.load %arg10[%c8_67, %c96_68] : memref<16x128xf32, #tpu.memory_space<vmem>>, vector<8x8xf32>
    tpu.vector_store %arg10[%c8_67, %c96_68], %175 {strides = array<i32>} : memref<16x128xf32, #tpu.memory_space<vmem>>, vector<8x8xf32>,
    %177 = vector.extract_strided_slice %137 {offsets = [13, 0, 0], sizes = [1, 8, 8], strides = [1, 1, 1]} : vector<16x8x8xf32> to vector<1x8x8xf32>
    %178 = vector.shape_cast %177 : vector<1x8x8xf32> to vector<8x8xf32>
    %c8_69 = arith.constant 8 : index
    %c104_70 = arith.constant 104 : index
    %179 = vector.load %arg10[%c8_69, %c104_70] : memref<16x128xf32, #tpu.memory_space<vmem>>, vector<8x8xf32>
    tpu.vector_store %arg10[%c8_69, %c104_70], %178 {strides = array<i32>} : memref<16x128xf32, #tpu.memory_space<vmem>>, vector<8x8xf32>,
    %180 = vector.extract_strided_slice %137 {offsets = [14, 0, 0], sizes = [1, 8, 8], strides = [1, 1, 1]} : vector<16x8x8xf32> to vector<1x8x8xf32>
    %181 = vector.shape_cast %180 : vector<1x8x8xf32> to vector<8x8xf32>
    %c8_71 = arith.constant 8 : index
    %c112_72 = arith.constant 112 : index
    %182 = vector.load %arg10[%c8_71, %c112_72] : memref<16x128xf32, #tpu.memory_space<vmem>>, vector<8x8xf32>
    tpu.vector_store %arg10[%c8_71, %c112_72], %181 {strides = array<i32>} : memref<16x128xf32, #tpu.memory_space<vmem>>, vector<8x8xf32>,
    %183 = vector.extract_strided_slice %137 {offsets = [15, 0, 0], sizes = [1, 8, 8], strides = [1, 1, 1]} : vector<16x8x8xf32> to vector<1x8x8xf32>
    %184 = vector.shape_cast %183 : vector<1x8x8xf32> to vector<8x8xf32>
    %c8_73 = arith.constant 8 : index
    %c120_74 = arith.constant 120 : index
    %185 = vector.load %arg10[%c8_73, %c120_74] : memref<16x128xf32, #tpu.memory_space<vmem>>, vector<8x8xf32>
    tpu.vector_store %arg10[%c8_73, %c120_74], %184 {strides = array<i32>} : memref<16x128xf32, #tpu.memory_space<vmem>>, vector<8x8xf32>,
    %c0_75 = arith.constant 0 : index
    %c0_76 = arith.constant 0 : index
    %186 = vector.load %arg10[%c0_75, %c0_76] : memref<16x128xf32, #tpu.memory_space<vmem>>, vector<16x128xf32>
    %187 = arith.truncf %186 : vector<16x128xf32> to vector<16x128xbf16>
    %c0_77 = arith.constant 0 : index
    %c0_78 = arith.constant 0 : index
    %188 = vector.load %arg5[%c0_77, %c0_78] : memref<128x32xbf16, #tpu.memory_space<vmem>>, vector<128x32xbf16>
    %cst_79 = arith.constant dense<0.000000e+00> : vector<16x32xf32>
    %189 = tpu.matmul %187, %188, %cst_79 {dimension_numbers = #tpu.dot_dimension_numbers<[1], [0], [0], [1], [0, 0, 1, 1], [], []>} : vector<16x128xbf16>, vector<128x32xbf16>, vector<16x32xf32> -> vector<16x32xf32>
    %190 = arith.addf %7, %189 : vector<16x32xf32>
    %191 = vector.broadcast %2 : vector<1x32xf32> to vector<16x32xf32>
    %192 = arith.addf %190, %191 : vector<16x32xf32>
    %cst_80 = arith.constant dense<0.000000e+00> : vector<16xf32>
    %193 = vector.multi_reduction <add>, %192, %cst_80 [1] : vector<16x32xf32> to vector<16xf32>
    %194 = vector.shape_cast %193 : vector<16xf32> to vector<16x1xf32>
    %cst_81 = arith.constant 3.200000e+01 : f32
    %195 = vector.broadcast %cst_81 : f32 to vector<16x1xf32>
    %196 = arith.divf %194, %195 : vector<16x1xf32>
    %197 = vector.broadcast %196 : vector<16x1xf32> to vector<16x32xf32>
    %198 = arith.subf %192, %197 : vector<16x32xf32>
    %199 = arith.mulf %198, %198 : vector<16x32xf32>
    %cst_82 = arith.constant dense<0.000000e+00> : vector<16xf32>
    %200 = vector.multi_reduction <add>, %199, %cst_82 [1] : vector<16x32xf32> to vector<16xf32>
    %201 = vector.shape_cast %200 : vector<16xf32> to vector<16x1xf32>
    %cst_83 = arith.constant 3.200000e+01 : f32
    %202 = vector.broadcast %cst_83 : f32 to vector<16x1xf32>
    %203 = arith.divf %201, %202 : vector<16x1xf32>
    %204 = vector.broadcast %196 : vector<16x1xf32> to vector<16x32xf32>
    %205 = arith.subf %192, %204 : vector<16x32xf32>
    %cst_84 = arith.constant 9.99999974E-6 : f32
    %206 = vector.broadcast %cst_84 : f32 to vector<16x1xf32>
    %207 = arith.addf %203, %206 : vector<16x1xf32>
    %208 = math.rsqrt %207 : vector<16x1xf32>
    %209 = vector.broadcast %208 : vector<16x1xf32> to vector<16x32xf32>
    %210 = arith.mulf %205, %209 : vector<16x32xf32>
    %211 = vector.broadcast %3 : vector<1x32xf32> to vector<16x32xf32>
    %212 = arith.mulf %210, %211 : vector<16x32xf32>
    %213 = vector.broadcast %4 : vector<1x32xf32> to vector<16x32xf32>
    %214 = arith.addf %212, %213 : vector<16x32xf32>
    %215 = arith.truncf %214 : vector<16x32xf32> to vector<16x32xbf16>
    %c0_85 = arith.constant 0 : index
    %c0_86 = arith.constant 0 : index
    %216 = vector.load %arg6[%c0_85, %c0_86] : memref<32x128xbf16, #tpu.memory_space<vmem>>, vector<32x128xbf16>
    %cst_87 = arith.constant dense<0.000000e+00> : vector<16x128xf32>
    %217 = tpu.matmul %215, %216, %cst_87 {dimension_numbers = #tpu.dot_dimension_numbers<[1], [0], [0], [1], [0, 0, 1, 1], [], []>} : vector<16x32xbf16>, vector<32x128xbf16>, vector<16x128xf32> -> vector<16x128xf32>
    %c0_88 = arith.constant 0 : index
    %c0_89 = arith.constant 0 : index
    %218 = vector.load %arg7[%c0_88, %c0_89] : memref<1x128xf32, #tpu.memory_space<vmem>>, vector<1x128xf32>
    %219 = vector.broadcast %218 : vector<1x128xf32> to vector<16x128xf32>
    %220 = arith.addf %217, %219 : vector<16x128xf32>
    %cst_90 = arith.constant 5.000000e-01 : f32
    %221 = vector.broadcast %cst_90 : f32 to vector<16x128xf32>
    %222 = arith.mulf %221, %220 : vector<16x128xf32>
    %223 = arith.mulf %220, %220 : vector<16x128xf32>
    %224 = arith.mulf %223, %220 : vector<16x128xf32>
    %cst_91 = arith.constant 4.471500e-02 : f32
    %225 = vector.broadcast %cst_91 : f32 to vector<16x128xf32>
    %226 = arith.mulf %225, %224 : vector<16x128xf32>
    %227 = arith.addf %220, %226 : vector<16x128xf32>
    %cst_92 = arith.constant 0.797884583 : f32
    %228 = vector.broadcast %cst_92 : f32 to vector<16x128xf32>
    %229 = arith.mulf %228, %227 : vector<16x128xf32>
    %230 = math.tanh %229 : vector<16x128xf32>
    %cst_93 = arith.constant 1.000000e+00 : f32
    %231 = vector.broadcast %cst_93 : f32 to vector<16x128xf32>
    %232 = arith.addf %231, %230 : vector<16x128xf32>
    %233 = arith.mulf %222, %232 : vector<16x128xf32>
    %234 = arith.truncf %233 : vector<16x128xf32> to vector<16x128xbf16>
    %c0_94 = arith.constant 0 : index
    %c0_95 = arith.constant 0 : index
    %235 = vector.load %arg8[%c0_94, %c0_95] : memref<128x32xbf16, #tpu.memory_space<vmem>>, vector<128x32xbf16>
    %cst_96 = arith.constant dense<0.000000e+00> : vector<16x32xf32>
    %236 = tpu.matmul %234, %235, %cst_96 {dimension_numbers = #tpu.dot_dimension_numbers<[1], [0], [0], [1], [0, 0, 1, 1], [], []>} : vector<16x128xbf16>, vector<128x32xbf16>, vector<16x32xf32> -> vector<16x32xf32>
    %237 = arith.addf %192, %236 : vector<16x32xf32>
    %238 = vector.broadcast %5 : vector<1x32xf32> to vector<16x32xf32>
    %239 = arith.addf %237, %238 : vector<16x32xf32>
    %240 = vector.shape_cast %239 : vector<16x32xf32> to vector<2x8x32xf32>
    %c0_97 = arith.constant 0 : index
    %c0_98 = arith.constant 0 : index
    %c0_99 = arith.constant 0 : index
    %241 = vector.load %arg9[%c0_97, %c0_98, %c0_99] : memref<2x8x32xf32, #tpu.memory_space<vmem>>, vector<2x8x32xf32>
    tpu.vector_store %arg9[%c0_97, %c0_98, %c0_99], %240 {strides = array<i32>} : memref<2x8x32xf32, #tpu.memory_space<vmem>>, vector<2x8x32xf32>,
    return
  }
  func.func @transform_0(%arg0: i32) -> (i32, i32, i32) {
    %c0_i32 = arith.constant 0 : i32
    %c0_i32_0 = arith.constant 0 : i32
    %c0_i32_1 = arith.constant 0 : i32
    return %arg0, %c0_i32, %c0_i32_0 : i32, i32, i32
  }
  func.func @transform_1(%arg0: i32) -> (i32, i32) {
    %c0_i32 = arith.constant 0 : i32
    %c0_i32_0 = arith.constant 0 : i32
    %c0_i32_1 = arith.constant 0 : i32
    return %c0_i32, %c0_i32_0 : i32, i32
  }
  func.func @transform_2(%arg0: i32) -> (i32, i32) {
    %c0_i32 = arith.constant 0 : i32
    %c0_i32_0 = arith.constant 0 : i32
    %c0_i32_1 = arith.constant 0 : i32
    return %c0_i32, %c0_i32_0 : i32, i32
  }
  func.func @transform_3(%arg0: i32) -> (i32, i32) {
    %c0_i32 = arith.constant 0 : i32
    %c0_i32_0 = arith.constant 0 : i32
    %c0_i32_1 = arith.constant 0 : i32
    return %c0_i32, %c0_i32_0 : i32, i32
  }
  func.func @transform_4(%arg0: i32) -> (i32, i32) {
    %c0_i32 = arith.constant 0 : i32
    %c0_i32_0 = arith.constant 0 : i32
    %c0_i32_1 = arith.constant 0 : i32
    return %c0_i32, %c0_i32_0 : i32, i32
  }
  func.func @transform_5(%arg0: i32) -> (i32, i32) {
    %c0_i32 = arith.constant 0 : i32
    %c0_i32_0 = arith.constant 0 : i32
    %c0_i32_1 = arith.constant 0 : i32
    return %c0_i32, %c0_i32_0 : i32, i32
  }
  func.func @transform_6(%arg0: i32) -> (i32, i32) {
    %c0_i32 = arith.constant 0 : i32
    %c0_i32_0 = arith.constant 0 : i32
    %c0_i32_1 = arith.constant 0 : i32
    return %c0_i32, %c0_i32_0 : i32, i32
  }
  func.func @transform_7(%arg0: i32) -> (i32, i32) {
    %c0_i32 = arith.constant 0 : i32
    %c0_i32_0 = arith.constant 0 : i32
    %c0_i32_1 = arith.constant 0 : i32
    return %c0_i32, %c0_i32_0 : i32, i32
  }
  func.func @transform_8(%arg0: i32) -> (i32, i32, i32) {
    %c0_i32 = arith.constant 0 : i32
    %c0_i32_0 = arith.constant 0 : i32
    %c0_i32_1 = arith.constant 0 : i32
    return %arg0, %c0_i32, %c0_i32_0 : i32, i32, i32
  }
}

</mosaic_0001>

<bundles_post_ra>
// kernel: tpu_custom_call.1
= control target key start
LH: loop header
LB: loop body
LE: loop exit
PB: predicated region body
PF: predicated region fallthrough
CT: control target
= control target key end

     0   :  { %s5586_s0 = inlined_call_operand.hbm [shape: f32[4,8,32], index: 0, kind: input, shape index: {}]   ;;  %s5587_s1 = inlined_call_operand.hbm [shape: f32[6,32], index: 1, kind: input, shape index: {}]   ;;  %s5588_s2 = inlined_call_operand.hbm [shape: bf16[384,32], index: 2, kind: input, shape index: {}]   ;;  %s5589_s3 = inlined_call_operand.hbm [shape: f32[384,1], index: 3, kind: input, shape index: {}]   ;;  %s5590_s4 = inlined_call_operand.hbm [shape: bf16[128,32], index: 4, kind: input, shape index: {}]   ;;  %s5591_s5 = inlined_call_operand.hbm [shape: bf16[32,128], index: 5, kind: input, shape index: {}]   ;;  %s5592_s6 = inlined_call_operand.hbm [shape: f32[1,128], index: 6, kind: input, shape index: {}]   ;;  %s5593_s7 = inlined_call_operand.hbm [shape: bf16[128,32], index: 7, kind: input, shape index: {}]   ;;  %s5594_s8 = inlined_call_operand.hbm [shape: f32[4,8,32], index: 8, kind: output, shape index: {}]  }
   0x1   :  { %5604 = sst [smem:[#allocation24_spill]] %s5587_s1 }
   0x2   :  { %5605 = sst [smem:[#allocation25_spill]] %s5589_s3 }
   0x3   :  { %13 = vsyncpa [#allocation4], 0 }
   0x4   :  { %15 = vsyncpa [#allocation4 + $0x1], 0 }
   0x5   :  { %16 = vsyncpa [#allocation7], 0 }
   0x6   :  { %17 = vsyncpa [#allocation10], 0 }
   0x7   :  { %18 = vsyncpa [#allocation13], 0 }
   0x8   :  { %19 = vsyncpa [#allocation16], 0 }
   0x9   :  { %20 = vsyncpa [#allocation5], 0 }
   0xa   :  { %22 = vsyncpa [#allocation5 + $0x1], 0  ;;  %s4510_s27 = smov 0   ;;  %s4512_s28 = smov 0  }
   0xb   :  { %s4514_s29 = smov 0   ;;  %s4516_s30 = smov 0  }
   0xc LB: > { %s4433_s9 = smov [#allocation6]   ;;  %s4531_s11 = sadd.s32 4294967295, %s4431_s30   ;;  %s4431_s30 = sphi %s4516_s30, %s5643_s30   ;;  %s4427_s29 = sphi %s4514_s29, %s5642_s29   ;;  %s4423_s28 = sphi %s4512_s28, %s5641_s28   ;;  %s4419_s27 = sphi %s4510_s27, %s5640_s27  }
   0xd   : > { %s245_s10 = sshll.u32 %s4433_s9, 4  ;;  %p3309_p0 = scmp.ge.s32.totalorder %s4431_s30, 1  ;;  %s246_s10 = int_to_ptr.vmem [resolvable:$true] %s245_s10 }
   0xe   : > { %p5595_p1 = scmp.eq.s32.totalorder %s4531_s11, 0  ;;  %p232_p2 = scmp.lt.s32.totalorder %s4431_s30, 3 }
   0xf   : > { %s4434_s13 = smov [#allocation9]   ;;  %s4435_s16 = smov [#allocation12]  }
  0x10   : > { %p4536_p3 = pnand %p3309_p0, %p232_p2  ;;  %s268_s14 = sshll.u32 %s4434_s13, 4  ;;  %s4543_s14 = int_to_ptr.vmem [resolvable:$true] %s268_s14 }
  0x11   : > { %s4551_s17 = sshll.u32 %s4435_s16, 4  ;;  %s5608_s1 = sld [smem:[#allocation24_spill]]  ;;  %s295_s17 = int_to_ptr.vmem [resolvable:$true] %s4551_s17 }
  0x12   : > { %s5606_s12 = scalar_select %p4536_p3, 1, 0 }
  0x13   : > { %p3829_p5 = pneg %p4536_p3 }
  0x15   : > { %p4547_p6 = pnand %p3829_p5, %p5595_p1 }
  0x17   : > { %s4123_s20 = scalar_lea.hbm %s5608_s1, 128  ;;  %p4561_p8 = pneg %p4547_p6 }
  0x18   : > { %p4124_p7 = scmp.ne.s32.totalorder %s5608_s1, %s4123_s20  ;;  %p4130_p11 = scmp.lt.u32.totalorder %s4123_s20, %s5608_s1 }
  0x1a   : > { %p4126_p9 = pnand %p4561_p8, %p4124_p7 }
  0x1c   : > { %p4127_p10 = pneg %p4126_p9 }
  0x1e   : > { %p4132_p12 = pnand %p4130_p11, %p4127_p10 }
  0x20   : > { %4135 = shalt.err (!%p4132_p12)
}
  0x21   : > { %s4136_s26 = scalar_lea.vmem %s246_s10, 128  ;;  %p4144_p5 = scmp.lt.s32.totalorder %s246_s10, %s246_s10 }
  0x22   : > { %p4137_p13 = scmp.ne.s32.totalorder %s246_s10, %s4136_s26  ;;  %p4145_p4 = scmp.lt.s32.totalorder %s4136_s26, %s4136_s26 }
  0x24   : > { %p4139_p0 = pnand %p4137_p13, %p4561_p8  ;;  %p4146_p1 = por %p4145_p4, %p4144_p5 }
  0x26   : > { %p4140_p2 = pneg %p4139_p0 }
  0x28   : > { %p4147_p3 = pnand %p4146_p1, %p4140_p2 }
  0x2a   : > { %4150 = shalt.err (!%p4147_p3)
}
  0x2b   : > { %3832 = dma.hbm_to_vmem [thread:$0]  (!%p4547_p6), %s5608_s1, 128, %s246_s10, [#allocation7]  }
  0x2c   : > { %s5610_s3 = sld [smem:[#allocation25_spill]] }
  0x32   : > { %s4151_s19 = scalar_lea.hbm %s5610_s3, 6144 }
  0x33   : > { %p4152_p7 = scmp.ne.s32.totalorder %s5610_s3, %s4151_s19  ;;  %p4158_p1 = scmp.lt.u32.totalorder %s4151_s19, %s5610_s3 }
  0x35   : > { %p4154_p9 = pnand %p4152_p7, %p4561_p8 }
  0x37   : > { %p4155_p4 = pneg %p4154_p9 }
  0x39   : > { %p4160_p3 = pnand %p4158_p1, %p4155_p4 }
  0x3b   : > { %4163 = shalt.err (!%p4160_p3)
}
  0x3c   : > { %s4164_s10 = scalar_lea.vmem %s4543_s14, 6144  ;;  %p4172_p13 = scmp.lt.s32.totalorder %s4543_s14, %s4543_s14 }
  0x3d   : > { %p4165_p10 = scmp.ne.s32.totalorder %s4543_s14, %s4164_s10  ;;  %p4173_p0 = scmp.lt.s32.totalorder %s4164_s10, %s4164_s10 }
  0x3f   : > { %p4167_p11 = pnand %p4165_p10, %p4561_p8  ;;  %p4174_p2 = por %p4173_p0, %p4172_p13 }
  0x41   : > { %p4168_p12 = pneg %p4167_p11 }
  0x43   : > { %p4175_p5 = pnand %p4174_p2, %p4168_p12 }
  0x45   : > { %4178 = shalt.err (!%p4175_p5)
}
  0x46   : > { %s5597_s25 = smov 128   ;;  %s5598_s26 = smov 8  }
  0x47   : > { %3838 = dma.hbm_to_vmem [thread:$0]  (!%p4547_p6), %s5610_s3, 6144, %s4543_s14, [#allocation10], %s5597_s25, %s5597_s25, %s5598_s26  }
  0x48   : > { %s4179_s19 = scalar_lea.hbm %s5591_s5, 256 }
  0x49   : > { %p4180_p7 = scmp.ne.s32.totalorder %s5591_s5, %s4179_s19  ;;  %p4186_p1 = scmp.lt.u32.totalorder %s4179_s19, %s5591_s5 }
  0x4b   : > { %p4182_p9 = pnand %p4180_p7, %p4561_p8 }
  0x4d   : > { %p4183_p4 = pneg %p4182_p9 }
  0x4f   : > { %p4188_p3 = pnand %p4186_p1, %p4183_p4 }
  0x51   : > { %4191 = shalt.err (!%p4188_p3)
}
  0x52   : > { %s4192_s10 = scalar_lea.vmem %s295_s17, 256  ;;  %p4200_p13 = scmp.lt.s32.totalorder %s295_s17, %s295_s17 }
  0x53   : > { %p4193_p10 = scmp.ne.s32.totalorder %s295_s17, %s4192_s10  ;;  %p4201_p0 = scmp.lt.s32.totalorder %s4192_s10, %s4192_s10 }
  0x55   : > { %p4195_p11 = pnand %p4193_p10, %p4561_p8  ;;  %p4202_p2 = por %p4201_p0, %p4200_p13 }
  0x57   : > { %p4196_p12 = pneg %p4195_p11 }
  0x59   : > { %p4203_p5 = pnand %p4202_p2, %p4196_p12 }
  0x5b   : > { %4206 = shalt.err (!%p4203_p5)
}
  0x5c   : > { %s4438_s14 = smov 64   ;;  %s4439_s9 = smov 4  }
  0x5d   : > { %3844 = dma.hbm_to_vmem [thread:$0]  (!%p4547_p6), %s5591_s5, 256, %s295_s17, [#allocation13], %s4438_s14, %s4438_s14, %s4439_s9  }
  0x5e   : > { %s4440_s18 = smov [#allocation8]   ;;  %s4441_s20 = smov [#allocation11]  }
  0x5f   : > { %s255_s19 = sshll.u32 %s4440_s18, 4  ;;  %s281_s21 = sshll.u32 %s4441_s20, 4  ;;  %s256_s19 = int_to_ptr.vmem [resolvable:$true] %s255_s19  ;;  %s282_s21 = int_to_ptr.vmem [resolvable:$true] %s281_s21 }
  0x60   : > { %s4207_s10 = scalar_lea.hbm %s5588_s2, 3072 }
  0x61   : > { %p4208_p7 = scmp.ne.s32.totalorder %s5588_s2, %s4207_s10  ;;  %p4214_p1 = scmp.lt.u32.totalorder %s4207_s10, %s5588_s2 }
  0x63   : > { %p4210_p9 = pnand %p4208_p7, %p4561_p8 }
  0x65   : > { %p4211_p4 = pneg %p4210_p9 }
  0x67   : > { %p4216_p3 = pnand %p4214_p1, %p4211_p4 }
  0x69   : > { %4219 = shalt.err (!%p4216_p3)
}
  0x6a   : > { %s4220_s17 = scalar_lea.vmem %s256_s19, 3072  ;;  %p4228_p13 = scmp.lt.s32.totalorder %s256_s19, %s256_s19 }
  0x6b   : > { %p4221_p10 = scmp.ne.s32.totalorder %s256_s19, %s4220_s17  ;;  %p4229_p0 = scmp.lt.s32.totalorder %s4220_s17, %s4220_s17 }
  0x6d   : > { %p4223_p11 = pnand %p4221_p10, %p4561_p8  ;;  %p4230_p2 = por %p4229_p0, %p4228_p13 }
  0x6f   : > { %p4224_p12 = pneg %p4223_p11 }
  0x71   : > { %p4231_p5 = pnand %p4230_p2, %p4224_p12 }
  0x73   : > { %4234 = shalt.err (!%p4231_p5)
}
  0x74   : > { %3835 = dma.hbm_to_vmem [thread:$0]  (!%p4547_p6), %s5588_s2, 3072, %s256_s19, [#allocation7], %s4438_s14, %s4438_s14, %s4439_s9  }
  0x75   : > { %s4235_s13 = scalar_lea.hbm %s5590_s4, 1024 }
  0x76   : > { %p4236_p7 = scmp.ne.s32.totalorder %s5590_s4, %s4235_s13  ;;  %p4242_p1 = scmp.lt.u32.totalorder %s4235_s13, %s5590_s4 }
  0x78   : > { %p4238_p9 = pnand %p4236_p7, %p4561_p8 }
  0x7a   : > { %p4239_p4 = pneg %p4238_p9 }
  0x7c   : > { %p4244_p3 = pnand %p4242_p1, %p4239_p4 }
  0x7e   : > { %4247 = shalt.err (!%p4244_p3)
}
  0x7f   : > { %s4248_s24 = scalar_lea.vmem %s282_s21, 1024  ;;  %p4256_p13 = scmp.lt.s32.totalorder %s282_s21, %s282_s21 }
  0x80   : > { %p4249_p10 = scmp.ne.s32.totalorder %s282_s21, %s4248_s24  ;;  %p4257_p0 = scmp.lt.s32.totalorder %s4248_s24, %s4248_s24 }
  0x82   : > { %p4251_p11 = pnand %p4249_p10, %p4561_p8  ;;  %p4258_p2 = por %p4257_p0, %p4256_p13 }
  0x84   : > { %p4252_p12 = pneg %p4251_p11 }
  0x86   : > { %p4259_p5 = pnand %p4258_p2, %p4252_p12 }
  0x88   : > { %4262 = shalt.err (!%p4259_p5)
}
  0x89   : > { %3841 = dma.hbm_to_vmem [thread:$0]  (!%p4547_p6), %s5590_s4, 1024, %s282_s21, [#allocation10], %s4438_s14, %s4438_s14, %s4439_s9  }
  0x8a   : > { %s4442_s17 = smov [#allocation14]   ;;  %s4443_s3 = smov [#allocation15]  }
  0x8b   : > { %s308_s1 = sshll.u32 %s4442_s17, 4  ;;  %s318_s25 = sshll.u32 %s4443_s3, 4  ;;  %s309_s1 = int_to_ptr.vmem [resolvable:$true] %s308_s1  ;;  %s319_s25 = int_to_ptr.vmem [resolvable:$true] %s318_s25 }
  0x8c   : > { %s4263_s16 = scalar_lea.hbm %s5592_s6, 16 }
  0x8d   : > { %p4264_p7 = scmp.ne.s32.totalorder %s5592_s6, %s4263_s16  ;;  %p4270_p1 = scmp.lt.u32.totalorder %s4263_s16, %s5592_s6 }
  0x8f   : > { %p4266_p9 = pnand %p4264_p7, %p4561_p8 }
  0x91   : > { %p4267_p4 = pneg %p4266_p9 }
  0x93   : > { %p4272_p3 = pnand %p4270_p1, %p4267_p4 }
  0x95   : > { %4275 = shalt.err (!%p4272_p3)
}
  0x96   : > { %s4276_s21 = scalar_lea.vmem %s309_s1, 16  ;;  %s4283_s19 = scalar_lea.vmem %s309_s1, 32 }
  0x97   : > { %p4277_p10 = scmp.ne.s32.totalorder %s309_s1, %s4276_s21  ;;  %p4284_p13 = scmp.lt.s32.totalorder %s309_s1, %s309_s1 }
  0x98   : > { %p4285_p0 = scmp.lt.s32.totalorder %s4283_s19, %s4276_s21 }
  0x99   : > { %p4279_p11 = pnand %p4277_p10, %p4561_p8 }
  0x9a   : > { %p4286_p2 = por %p4285_p0, %p4284_p13 }
  0x9b   : > { %p4280_p12 = pneg %p4279_p11 }
  0x9d   : > { %p4287_p5 = pnand %p4286_p2, %p4280_p12 }
  0x9f   : > { %4290 = shalt.err (!%p4287_p5)
}
  0xa0   : > { %3847 = dma.hbm_to_vmem [thread:$0]  (!%p4547_p6), %s5592_s6, 16, %s309_s1, [#allocation13]  }
  0xa1   : > { %s4291_s13 = scalar_lea.hbm %s5593_s7, 1024 }
  0xa2   : > { %p4292_p7 = scmp.ne.s32.totalorder %s5593_s7, %s4291_s13  ;;  %p4298_p1 = scmp.lt.u32.totalorder %s4291_s13, %s5593_s7 }
  0xa4   : > { %p4294_p9 = pnand %p4292_p7, %p4561_p8 }
  0xa6   : > { %p4295_p4 = pneg %p4294_p9 }
  0xa8   : > { %p4300_p3 = pnand %p4298_p1, %p4295_p4 }
  0xaa   : > { %4303 = shalt.err (!%p4300_p3)
}
  0xab   : > { %s4304_s24 = scalar_lea.vmem %s319_s25, 1024  ;;  %p4312_p13 = scmp.lt.s32.totalorder %s319_s25, %s319_s25 }
  0xac   : > { %p4305_p10 = scmp.ne.s32.totalorder %s319_s25, %s4304_s24  ;;  %p4313_p0 = scmp.lt.s32.totalorder %s4304_s24, %s4304_s24 }
  0xae   : > { %p4307_p11 = pnand %p4305_p10, %p4561_p8  ;;  %p4314_p2 = por %p4313_p0, %p4312_p13 }
  0xb0   : > { %p4308_p12 = pneg %p4307_p11 }
  0xb2   : > { %p4315_p5 = pnand %p4314_p2, %p4308_p12 }
  0xb4   : > { %4318 = shalt.err (!%p4315_p5)
}
  0xb5   : > { %3850 = dma.hbm_to_vmem [thread:$0]  (!%p4547_p6), %s5593_s7, 1024, %s319_s25, [#allocation16], %s4438_s14, %s4438_s14, %s4439_s9  }
  0xb6   : > { %s3308_s15 = sadd.s32 4294967294, %s4431_s30   ;;  %s4708_s23 = sadd.s32 1, %s4431_s30  }
  0xb7   : > { %s35_s19 = sadd.s32 1, %s4427_s29  ;;  %s32_s10 = ssub.s32 %s4431_s30, %s4708_s23 }
  0xb8   : > { %p42_p8 = scmp.ne.s32.totalorder %s4427_s29, %s4423_s28  ;;  %p33_p7 = scmp.eq.s32.totalorder %s32_s10, 0 }
  0xb9   : > { %p43_p9 = scmp.eq.s32.totalorder %s4431_s30, 0  ;;  %p48_p4 = scmp.ne.s32.totalorder %s4423_s28, %s4419_s27 }
  0xba   : > { %p219_p1 = scmp.eq.s32.totalorder %s4531_s11, 1  ;;  %p5611_p10 = scmp.eq.s32.totalorder %s4531_s11, 0 }
  0xbb   : > { %s4720_s17 = scalar_select %p33_p7, %s4427_s29, %s35_s19  }
  0xbc   : > { %p44_p3 = por %p43_p9, %p42_p8  ;;  %p4724_p11 = por %p5611_p10, %p48_p4 }
  0xbd   : > { %p4728_p6 = por %p219_p1, %p42_p8  ;;  %p225_p12 = scmp.eq.s32.totalorder %s3308_s15, 1 }
  0xbe   : > { %p3866_p13 = scmp.lt.s32.totalorder %s4431_s30, 2  ;;  %s332_s9 = sand.u32 1, %s4427_s29  }
  0xbf   : > { %s5613_s14 = scalar_select %p4728_p6, 1, 0 }
  0xc0   : > { %p4734_p0 = por %p225_p12, %p48_p4  ;;  %s3318_s26 = sshll.u32 %s332_s9, 4 }
  0xc1   : > { %s3442_s13 = sshll.u32 %s4431_s30, 8  ;;  %s336_s22 = scalar_lea.vmem [#allocation3], %s3318_s26 }
  0xc2   : > { %s5614_s25 = scalar_select %p4734_p0, 1, 0 }
  0xc3   : > { %s4742_s20 = scalar_lea.hbm %s5586_s0, %s3442_s13  ;;  %s343_s24 = sshll.u32 %s336_s22, 4  ;;  %s4748_s24 = int_to_ptr.vmem [resolvable:$true] %s343_s24 }
  0xc4   : > { %p4744_p2 = pnand %p3866_p13, %p44_p3  ;;  %s4750_s21 = scalar_lea.sflag [#allocation4], %s332_s9 }
  0xc5   : > { %s4319_s15 = scalar_lea.hbm %s4742_s20, 256  ;;  %s4324_s26 = scalar_lea.hbm %s5586_s0, 512 }
  0xc6   : > { %p4320_p5 = scmp.ne.s32.totalorder %s4742_s20, %s4319_s15  ;;  %p4321_p8 = pneg %p4744_p2 }
  0xc7   : > { %p4325_p4 = scmp.lt.u32.totalorder %s4742_s20, %s5586_s0  ;;  %p4326_p1 = scmp.lt.u32.totalorder %s4324_s26, %s4319_s15 }
  0xc8   : > { %p4322_p7 = pnand %p4321_p8, %p4320_p5  ;;  %p4328_p10 = scmp.lt.u32.totalorder %s4319_s15, %s4742_s20 }
  0xc9   : > { %p4327_p3 = por %p4326_p1, %p4325_p4 }
  0xca   : > { %p4323_p9 = pneg %p4322_p7 }
  0xcb   : > { %p4329_p12 = por %p4328_p10, %p4327_p3 }
  0xcd   : > { %p4330_p13 = pnand %p4329_p12, %p4323_p9 }
  0xcf   : > { %4333 = shalt.err (!%p4330_p13)
}
  0xd0   : > { %s4334_s9 = scalar_lea.vmem %s4748_s24, 256  ;;  %s4444_s18 = smov [#allocation3]  }
  0xd1   : > { %p4335_p5 = scmp.ne.s32.totalorder %s4748_s24, %s4334_s9  ;;  %s4339_s22 = sshll.u32 %s4444_s18, 4  ;;  %s4340_s22 = int_to_ptr.vmem [resolvable:$false] %s4339_s22 }
  0xd2   : > { %s4341_s19 = scalar_lea.vmem %s4340_s22, 512  ;;  %p4342_p6 = scmp.lt.s32.totalorder %s4748_s24, %s4340_s22 }
  0xd3   : > { %p4337_p7 = pnand %p4335_p5, %p4321_p8  ;;  %p4343_p4 = scmp.lt.s32.totalorder %s4341_s19, %s4334_s9 }
  0xd5   : > { %p4338_p0 = pneg %p4337_p7  ;;  %p4344_p1 = por %p4343_p4, %p4342_p6 }
  0xd7   : > { %p4345_p3 = pnand %p4344_p1, %p4338_p0 }
  0xd9   : > { %4348 = shalt.err (!%p4345_p3)
}
  0xda   : > { %s5616_s15 = smov 8   ;;  %s5617_s10 = smov 128  }
  0xdb   : > { %3854 = dma.hbm_to_vmem [thread:$0]  (!%p4744_p2), %s4742_s20, 256, %s4748_s24, %s4750_s21, %s5617_s10, %s5617_s10, %s5616_s15  }
  0xdc   : > { %p5618_p8 = scmp.ne.s32.totalorder %s5606_s12, 0 }
  0xdd   : > { %s4784_s26 = sand.u32 (!%p5618_p8), 1, %s4423_s28  }
  0xde   : > { %355 = sbr.rel (%p5618_p8) target bundleno = 3532 (0xdcc), region = 52  ;;  %s5600_s13 = sshll.u32 (!%p5618_p8), %s4784_s26, 4 }
  0xdf   : > { %s358_s16 = scalar_lea.sflag (!%p5618_p8), [#allocation4], %s4784_s26  ;;  %s4790_s1 = scalar_lea.vmem (!%p5618_p8), [#allocation3], %s5600_s13 }
  0xe5   : > { %4394 = dma.done.wait (%p4724_p11), %s358_s16, 256  }
  0xe6   : > { %4396 = vsyncadd (%p4724_p11), %s358_s16, 4294967040  ;;  %p5619_p6 = scmp.eq.s32.totalorder %s4531_s11, 0 }
  0xe8   : > { %4398 = dma.done.wait (%p5619_p6), [#allocation7], 3200   ;;  %p5620_p0 = pmov %p5619_p6 }
  0xea   : > { %4400 = vsyncadd (%p5620_p0), [#allocation7], 4294964096  ;;  %p5621_p2 = pmov %p5620_p0 }
  0xeb   : > { %p5622_p9 = pmov %p5620_p0 }
  0xec   : > { %4402 = dma.done.wait (%p5621_p2), [#allocation10], 7168  }
  0xed   : > { %4404 = vsyncadd (%p5622_p9), [#allocation10], 4294960128  ;;  %p5623_p10 = pmov %p5620_p0 }
  0xee   : > { %p5624_p12 = pmov %p5620_p0 }
  0xef   : > { %4406 = dma.done.wait (%p5623_p10), [#allocation13], 272  }
  0xf0   : > { %4408 = vsyncadd (%p5624_p12), [#allocation13], 4294967024  ;;  %p5625_p11 = pmov %p5620_p0 }
  0xf1   : > { %p5626_p13 = pmov %p5620_p0 }
  0xf2   : > { %4410 = dma.done.wait (%p5625_p11), [#allocation16], 1024  }
  0xf3   : > { %4412 = vsyncadd (%p5626_p13), [#allocation16], 4294966272  ;;  %vm5603_vm0 = vcmask 261120   ;;  %v431_v0 = vld [vmem:[%s4790_s1] sm:$0xff]  ;;  %v432_v1 = vld [vmem:[%s4790_s1 + $0x8] sm:$0xff]  ;;  %v4445_v16 = vmov 0  }
  0xf4   : > { %v434_v2 = vsel %vm5603_vm0, %v431_v0, 0.0  ;;  %v437_v3 = vsel %vm5603_vm0, %v432_v1, 0.0  ;;  %v3939_v14 = vld [vmem:[#allocation8] sm:$0xff]   ;;  %v539_v15 = vld [vmem:[#allocation9 + $0x88] sm:$0xff]  ;;  %3938 = vset.pattern.permute.xlu1 %v4445_v16  ;;  %3937 = vset.pattern.permute.xlu0 %v4445_v16  ;;  %v540_v17 = vld [vmem:[#allocation9 + $0x90] sm:$0xff]  ;;  %vm1254_vm1 = vcmask 64512  }
  0xf5   : > { %435 = vadd.xlane.f32.xlu0 %v434_v2  ;;  %3556 = vmatprep.mubr.msk.bf16.mxu0 %vm5603_vm0, %v3939_v14  ;;  %v541_v18 = vld [vmem:[#allocation9 + $0x98] sm:$0xff]  ;;  %v522_v19 = vld [vmem:[#allocation9] sm:$0xff]  ;;  %v523_v20 = vld [vmem:[#allocation9 + $0x8] sm:$0xff]  ;;  %s4446_s12 = smov 120   ;;  %s4447_s3 = smov 8   ;;  %vm1908_vm2 = vcmask 130112  }
  0xf6   : > { %v542_v21 = vld [vmem:[#allocation9 + $0xa0] sm:$0xff]  ;;  %v543_v22 = vld [vmem:[#allocation9 + $0xa8] sm:$0xff]  ;;  %v524_v23 = vld [vmem:[#allocation9 + $0x10] sm:$0xff]  ;;  %s4448_s20 = smov 16   ;;  %s4449_s24 = smov 24   ;;  %vm1914_vm3 = vcmask 195712  }
  0xf7   : > { %v544_v24 = vld [vmem:[#allocation9 + $0xb0] sm:$0xff]  ;;  %v538_v25 = vld [vmem:[#allocation9 + $0x80] sm:$0xff]  ;;  %v525_v27 = vld [vmem:[#allocation9 + $0x18] sm:$0xff]  ;;  %s4450_s21 = smov 32   ;;  %s5601_s9 = smov 40   ;;  %vm1920_vm4 = vcmask 261312  }
  0xf8   : > { %v526_v26 = vld [vmem:[#allocation9 + $0x20] sm:$0xff]  ;;  %v545_v29 = vld [vmem:[#allocation9 + $0xb8] sm:$0xff]  ;;  %v528_v30 = vld [vmem:[#allocation9 + $0x30] sm:$0xff]  ;;  %s4452_s18 = smov 48   ;;  %s5602_s22 = smov 56   ;;  %vm1926_vm5 = vcmask 326912  }
  0xf9   : > { %438 = vadd.xlane.f32.xlu0 %v437_v3  ;;  %v546_v28 = vld [vmem:[#allocation9 + $0xc0] sm:$0xff]  ;;  %v527_v31 = vld [vmem:[#allocation9 + $0x28] sm:$0xff]  ;;  %v548_v32 = vld [vmem:[#allocation9 + $0xd0] sm:$0xff]  ;;  %s4454_s19 = smov 64   ;;  %s4455_s15 = smov 72   ;;  %vm1932_vm6 = vcmask 392512  }
  0xfa   : > { %v547_v33 = vld [vmem:[#allocation9 + $0xc8] sm:$0xff]  ;;  %v530_v34 = vld [vmem:[#allocation9 + $0x40] sm:$0xff]  ;;  %v529_v35 = vld [vmem:[#allocation9 + $0x38] sm:$0xff]  ;;  %s4456_s10 = smov 80   ;;  %s4457_s16 = smov 88   ;;  %vm1938_vm7 = vcmask 458112  }
  0xfb   : > { %v550_v36 = vld [vmem:[#allocation9 + $0xe0] sm:$0xff]  ;;  %v549_v37 = vld [vmem:[#allocation9 + $0xd8] sm:$0xff]  ;;  %v532_v38 = vld [vmem:[#allocation9 + $0x50] sm:$0xff]  ;;  %s4458_s13 = smov 96   ;;  %vm1944_vm8 = vcmask 523712   ;;  %vm1950_vm9 = vcmask 589312  }
  0xfc   : > { %v531_v39 = vld [vmem:[#allocation9 + $0x48] sm:$0xff]  ;;  %v552_v40 = vld [vmem:[#allocation9 + $0xf0] sm:$0xff]  ;;  %v534_v42 = vld [vmem:[#allocation9 + $0x60] sm:$0xff]  ;;  %vm1956_vm10 = vcmask 654912   ;;  %vm1962_vm11 = vcmask 720512   ;;  %vm1968_vm12 = vcmask 786112  }
  0xfd   : > { %v551_v41 = vld [vmem:[#allocation9 + $0xe8] sm:$0xff]  ;;  %v533_v43 = vld [vmem:[#allocation9 + $0x58] sm:$0xff]  ;;  %v536_v44 = vld [vmem:[#allocation9 + $0x70] sm:$0xff]  ;;  %vm1974_vm13 = vcmask 851712   ;;  %vm1980_vm14 = vcmask 917312   ;;  %vm1986_vm15 = vcmask 982912  }
  0xfe   : > { %v553_v45 = vld [vmem:[#allocation9 + $0xf8] sm:$0xff]  ;;  %v555_v46 = vld [vmem:[#allocation9 + $0x108] sm:$0xff]  ;;  %v556_v48 = vld [vmem:[#allocation9 + $0x110] sm:$0xff]  ;;  %p5637_p7 = scmp.ne.s32.totalorder %s5613_s14, 0 }
  0xff   : > { %v535_v47 = vld [vmem:[#allocation9 + $0x68] sm:$0xff]  ;;  %v537_v49 = vld [vmem:[#allocation9 + $0x78] sm:$0xff]  ;;  %v554_v51 = vld [vmem:[#allocation9 + $0x100] sm:$0xff] }
 0x100   : > { %v559_v50 = vld [vmem:[#allocation9 + $0x128] sm:$0xff]  ;;  %v560_v52 = vld [vmem:[#allocation9 + $0x130] sm:$0xff]  ;;  %v557_v55 = vld [vmem:[#allocation9 + $0x118] sm:$0xff] }
 0x101   : > { %v562_v56 = vld [vmem:[#allocation9 + $0x140] sm:$0xff]  ;;  %v565_v61 = vld [vmem:[#allocation9 + $0x158] sm:$0xff] }
 0x102   : > { %v558_v60 = vld [vmem:[#allocation9 + $0x120] sm:$0xff]  ;;  %v561_v63 = vld [vmem:[#allocation9 + $0x138] sm:$0xff] }
 0x10f   : > { %652 = vperm.xlu0 %3937, %v538_v25   ;;  %v3949_v25 = vld [vmem:[#allocation8 + $0x50] sm:$0xff]  }
 0x113   : > { %587 = vperm.xlu0 %3937, %v525_v27   ;;  %v3951_v27 = vld [vmem:[#allocation8 + $0x60] sm:$0xff]  }
 0x117   : > { %687 = vperm.xlu0 %3937, %v545_v29   ;;  %v3953_v29 = vld [vmem:[#allocation8 + $0x70] sm:$0xff]  }
 0x11b   : > { %597 = vperm.xlu0 %3937, %v527_v31   ;;  %v3955_v31 = vld [vmem:[#allocation8 + $0x80] sm:$0xff]  }
 0x11f   : > { %697 = vperm.xlu0 %3937, %v547_v33   ;;  %v3957_v33 = vld [vmem:[#allocation8 + $0x90] sm:$0xff]  }
 0x123   : > { %607 = vperm.xlu0 %3937, %v529_v35   ;;  %v3959_v35 = vld [vmem:[#allocation8 + $0xa0] sm:$0xff]  }
 0x127   : > { %707 = vperm.xlu0 %3937, %v549_v37   ;;  %v3961_v37 = vld [vmem:[#allocation8 + $0xb0] sm:$0xff]  }
 0x12b   : > { %617 = vperm.xlu0 %3937, %v531_v39  }
 0x12f   : > { %717 = vperm.xlu0 %3937, %v551_v41  }
 0x133   : > { %627 = vperm.xlu0 %3937, %v533_v43  }
 0x137   : > { %727 = vperm.xlu0 %3937, %v553_v45  }
 0x13b   : > { %637 = vperm.xlu0 %3937, %v535_v47  }
 0x13f   : > { %647 = vperm.xlu0 %3937, %v537_v49  }
 0x143   : > { %732 = vperm.xlu0 %3937, %v554_v51  }
 0x147   : > { %747 = vperm.xlu0 %3937, %v557_v55  }
 0x14b   : > { %752 = vperm.xlu0 %3937, %v558_v60  }
 0x14f   : > { %767 = vperm.xlu0 %3937, %v561_v63  }
 0x182   : > { %v436_v4 = vpop.xlane.xlu0 %435 }
 0x183   : > { %v441_v5 = vmul.f32 0.03125, %v436_v4  ;;  %v3331_v4 = vld [vmem:[#allocation6] ss:$0 sm:$0xff] }
 0x185   : > { %v4816_v6 = vsub.f32 %v431_v0, %v441_v5  ;;  %v567_v0 = vld [vmem:[#allocation9 + $0x168] sm:$0xff]  ;;  %v564_v5 = vld [vmem:[#allocation9 + $0x150] sm:$0xff] }
 0x186   : > { %v439_v7 = vpop.xlane.xlu0 %438 }
 0x187   : > { %v442_v8 = vmul.f32 0.03125, %v439_v7  ;;  %v445_v9 = vmul.f32 %v4816_v6, %v4816_v6 }
 0x189   : > { %v4820_v10 = vsub.f32 %v432_v1, %v442_v8  ;;  %v447_v11 = vsel %vm5603_vm0, %v445_v9, 0.0  ;;  %v563_v1 = vld [vmem:[#allocation9 + $0x148] sm:$0xff] }
 0x18a   : > { %448 = vadd.xlane.f32.xlu1 %v447_v11  ;;  %777 = vperm.xlu0 %3937, %v563_v1   ;;  %v3332_v11 = vld [vmem:[#allocation6 + $0x1] ss:$0 sm:$0xff] }
 0x18b   : > { %v446_v12 = vmul.f32 %v4820_v10, %v4820_v10 }
 0x18d   : > { %v450_v13 = vsel %vm5603_vm0, %v446_v12, 0.0 }
 0x18e   : > { %451 = vadd.xlane.f32.xlu1 %v450_v13  ;;  %782 = vperm.xlu0 %3937, %v564_v5   ;;  %v566_v13 = vld [vmem:[#allocation9 + $0x160] sm:$0xff] }
 0x192   : > { %792 = vperm.xlu0 %3937, %v566_v13  }
 0x19f   : > { %657 = vperm.xlu1 %3938, %v539_v15  }
 0x1a3   : > { %662 = vperm.xlu1 %3938, %v540_v17  }
 0x1a7   : > { %667 = vperm.xlu1 %3938, %v541_v18   ;;  %v3941_v18 = vld [vmem:[#allocation8 + $0x10] sm:$0xff]  }
 0x1ab   : > { %572 = vperm.xlu1 %3938, %v522_v19   ;;  %v3943_v19 = vld [vmem:[#allocation8 + $0x20] sm:$0xff]  }
 0x1af   : > { %577 = vperm.xlu1 %3938, %v523_v20   ;;  %v3944_v20 = vld [vmem:[#allocation8 + $0x28] sm:$0xff]  }
 0x1b3   : > { %672 = vperm.xlu1 %3938, %v542_v21   ;;  %v3945_v21 = vld [vmem:[#allocation8 + $0x30] sm:$0xff]  }
 0x1b7   : > { %677 = vperm.xlu1 %3938, %v543_v22   ;;  %v3946_v22 = vld [vmem:[#allocation8 + $0x38] sm:$0xff]  }
 0x1bb   : > { %582 = vperm.xlu1 %3938, %v524_v23   ;;  %v3947_v23 = vld [vmem:[#allocation8 + $0x40] sm:$0xff]  }
 0x1bf   : > { %682 = vperm.xlu1 %3938, %v544_v24   ;;  %v3948_v24 = vld [vmem:[#allocation8 + $0x48] sm:$0xff]  }
 0x1c3   : > { %592 = vperm.xlu1 %3938, %v526_v26   ;;  %v3950_v26 = vld [vmem:[#allocation8 + $0x58] sm:$0xff]  }
 0x1c7   : > { %692 = vperm.xlu1 %3938, %v546_v28   ;;  %v3952_v28 = vld [vmem:[#allocation8 + $0x68] sm:$0xff]  }
 0x1cb   : > { %602 = vperm.xlu1 %3938, %v528_v30   ;;  %v3954_v30 = vld [vmem:[#allocation8 + $0x78] sm:$0xff]  }
 0x1cf   : > { %702 = vperm.xlu1 %3938, %v548_v32   ;;  %v3956_v32 = vld [vmem:[#allocation8 + $0x88] sm:$0xff]  }
 0x1d3   : > { %612 = vperm.xlu1 %3938, %v530_v34   ;;  %v3958_v34 = vld [vmem:[#allocation8 + $0x98] sm:$0xff]  }
 0x1d7   : > { %712 = vperm.xlu1 %3938, %v550_v36   ;;  %v3960_v36 = vld [vmem:[#allocation8 + $0xa8] sm:$0xff]  }
 0x1db   : > { %622 = vperm.xlu1 %3938, %v532_v38   ;;  %v3962_v38 = vld [vmem:[#allocation8 + $0xb8] sm:$0xff]  }
 0x1df   : > { %722 = vperm.xlu1 %3938, %v552_v40  }
 0x1e3   : > { %632 = vperm.xlu1 %3938, %v534_v42  }
 0x1e7   : > { %642 = vperm.xlu1 %3938, %v536_v44  }
 0x1eb   : > { %737 = vperm.xlu1 %3938, %v555_v46   ;;  %v4864_v46 = vpop.permute.xlu0 %652 }
 0x1ef   : > { %742 = vperm.xlu1 %3938, %v556_v48   ;;  %v588_v48 = vpop.permute.xlu0 %587 }
 0x1f3   : > { %757 = vperm.xlu1 %3938, %v559_v50   ;;  %v4868_v50 = vpop.permute.xlu0 %687 }
 0x1f7   : > { %762 = vperm.xlu1 %3938, %v560_v52   ;;  %v598_v52 = vpop.permute.xlu0 %597 }
 0x1fb   : > { %772 = vperm.xlu1 %3938, %v562_v56  }
 0x1ff   : > { %787 = vperm.xlu1 %3938, %v565_v61  }
 0x203   : > { %797 = vperm.xlu1 %3938, %v567_v0  }
 0x217   : > { %v449_v53 = vpop.xlane.xlu1 %448 }
 0x218   : > { %v453_v54 = vmul.f32 0.03125, %v449_v53 }
 0x21a   : > { %v455_v57 = vadd.f32 1e-05, %v453_v54  ;;  %v4872_v54 = vpop.permute.xlu0 %697 }
 0x21b   : > { %v452_v58 = vpop.xlane.xlu1 %451 }
 0x21c   : > { %3981 = vrsqrt.f32 %v455_v57  ;;  %v454_v59 = vmul.f32 0.03125, %v452_v58 }
 0x21e   : > { %v456_v62 = vadd.f32 1e-05, %v454_v59  ;;  %v608_v56 = vpop.permute.xlu0 %607 }
 0x21f   : > { %v4854_v39 = vpop.permute.xlu1 %657 }
 0x220   : > { %3983 = vrsqrt.f32 %v456_v62 }
 0x222   : > { %v4876_v58 = vpop.permute.xlu0 %707 }
 0x223   : > { %v4856_v40 = vpop.permute.xlu1 %662 }
 0x226   : > { %v3982_v2 = vpop.eup %3981  ;;  %v618_v60 = vpop.permute.xlu0 %617 }
 0x227   : > { %v459_v3 = vmul.f32 %v3982_v2, %v4816_v6  ;;  %v3940_v6 = vld [vmem:[#allocation8 + $0x8] sm:$0xff]   ;;  %v4858_v41 = vpop.permute.xlu1 %667 }
 0x229   : > { %v465_v9 = vmul.f32 %v3331_v4, %v459_v3 }
 0x22a   : > { %v3984_v7 = vpop.eup %3983  ;;  %v4880_v0 = vpop.permute.xlu0 %717 }
 0x22b   : > { %v460_v8 = vmul.f32 %v3984_v7, %v4820_v10  ;;  %v471_v14 = vadd.f32 %v3332_v11, %v465_v9  ;;  %v3942_v10 = vld [vmem:[#allocation8 + $0x18] sm:$0xff]   ;;  %v573_v42 = vpop.permute.xlu1 %572 }
 0x22d   : > { %v466_v12 = vmul.f32 %v3331_v4, %v460_v8 }
 0x22f   : > { %v472_v15 = vadd.f32 %v3332_v11, %v466_v12  ;;  %v578_v43 = vpop.permute.xlu1 %577  ;;  %v628_v12 = vpop.permute.xlu0 %627 }
 0x231   : > { %v521_v16 = vpack.c.bf16 %v472_v15, %v471_v14 }
 0x233   : > { %3780 = vmatprep.subr.msk.bf16.mxu0 %vm5603_vm0, %v521_v16  ;;  %v1003_v17 = vsel %vm5603_vm0, %v521_v16, 0  ;;  %v4860_v44 = vpop.permute.xlu1 %672 }
 0x234   : > { %3555 = vmatpush3.bf16.xpose.msra.mxu0 %v1003_v17 }
 0x237   : > { %v4862_v45 = vpop.permute.xlu1 %677 }
 0x23b   : > { %3557 = vmatmul.mubr.msk.bf16.vlgmr.msra.gmra.mrb[0].mxu0 %vm5603_vm0, %v3940_v6  ;;  %v583_v47 = vpop.permute.xlu1 %582 }
 0x23c   : > { %3560 = vmatprep.mubr.msk.bf16.mxu0 %vm5603_vm0, %v3941_v18 }
 0x23f   : > { %v4866_v49 = vpop.permute.xlu1 %682 }
 0x243   : > { %3561 = vmatmul.mubr.msk.bf16.gmra.mrb[4].mxu0 %vm5603_vm0, %v3942_v10  ;;  %v593_v51 = vpop.permute.xlu1 %592 }
 0x244   : > { %3564 = vmatprep.mubr.msk.bf16.mxu0 %vm5603_vm0, %v3943_v19 }
 0x247   : > { %v4870_v53 = vpop.permute.xlu1 %692 }
 0x24b   : > { %3565 = vmatmul.mubr.msk.bf16.gmra.mrb[8].mxu0 %vm5603_vm0, %v3944_v20  ;;  %v603_v55 = vpop.permute.xlu1 %602 }
 0x24c   : > { %3568 = vmatprep.mubr.msk.bf16.mxu0 %vm5603_vm0, %v3945_v21  ;;  %v4892_v21 = vpop.permute.xlu0 %727 }
 0x24f   : > { %v4874_v57 = vpop.permute.xlu1 %702 }
 0x253   : > { %3569 = vmatmul.mubr.msk.bf16.gmra.mrb[12].mxu0 %vm5603_vm0, %v3946_v22  ;;  %v613_v59 = vpop.permute.xlu1 %612 }
 0x254   : > { %3572 = vmatprep.mubr.msk.bf16.mxu0 %vm5603_vm0, %v3947_v23 }
 0x257   : > { %v4878_v62 = vpop.permute.xlu1 %712 }
 0x25b   : > { %3573 = vmatmul.mubr.msk.bf16.gmra.mrb[16].mxu0 %vm5603_vm0, %v3948_v24  ;;  %v623_v11 = vpop.permute.xlu1 %622 }
 0x25c   : > { %3576 = vmatprep.mubr.msk.bf16.mxu0 %vm5603_vm0, %v3949_v25 }
 0x25f   : > { %v4888_v19 = vpop.permute.xlu1 %722 }
 0x263   : > { %3577 = vmatmul.mubr.msk.bf16.gmra.mrb[20].mxu0 %vm5603_vm0, %v3950_v26  ;;  %v633_v26 = vpop.permute.xlu1 %632 }
 0x264   : > { %3580 = vmatprep.mubr.msk.bf16.mxu0 %vm5603_vm0, %v3951_v27 }
 0x26b   : > { %3581 = vmatmul.mubr.msk.bf16.gmra.mrb[24].mxu0 %vm5603_vm0, %v3952_v28 }
 0x26c   : > { %3584 = vmatprep.mubr.msk.bf16.mxu0 %vm5603_vm0, %v3953_v29 }
 0x273   : > { %3585 = vmatmul.mubr.msk.bf16.gmra.mrb[28].mxu0 %vm5603_vm0, %v3954_v30  ;;  %v638_v30 = vpop.permute.xlu0 %637 }
 0x274   : > { %3588 = vmatprep.mubr.msk.bf16.mxu0 %vm5603_vm0, %v3955_v31 }
 0x27b   : > { %3589 = vmatmul.mubr.msk.bf16.gmra.mrb[32].mxu0 %vm5603_vm0, %v3956_v32 }
 0x27c   : > { %3592 = vmatprep.mubr.msk.bf16.mxu0 %vm5603_vm0, %v3957_v33 }
 0x283   : > { %3593 = vmatmul.mubr.msk.bf16.gmra.mrb[36].mxu0 %vm5603_vm0, %v3958_v34 }
 0x284   : > { %3596 = vmatprep.mubr.msk.bf16.mxu0 %vm5603_vm0, %v3959_v35 }
 0x28b   : > { %3597 = vmatmul.mubr.msk.bf16.gmra.mrb[40].mxu0 %vm5603_vm0, %v3960_v36  ;;  %v643_v36 = vpop.permute.xlu1 %642 }
 0x28c   : > { %3600 = vmatprep.mubr.msk.bf16.mxu0 %vm5603_vm0, %v3961_v37 }
 0x293   : > { %3601 = vmatmul.mubr.msk.bf16.gmra.mrb[44].mxu0 %vm5603_vm0, %v3962_v38  ;;  %v648_v38 = vpop.permute.xlu0 %647 }
 0x30e   : > { %v3558_v61 = vpop.f32.mrb[0].mxu0 }
 0x30f   : > { %v1039_v63 = vpop.f32.mrb[1].mxu0  ;;  %v1048_v2 = vadd.f32 %v3558_v61, %v583_v47 }
 0x310   : > { %v3559_v1 = vpop.f32.mrb[2].mxu0  ;;  %v1040_v5 = vadd.f32 %v1039_v63, %v573_v42 }
 0x311   : > { %v1051_v3 = vadd.f32 %v3559_v1, %v588_v48  ;;  %v1042_v4 = vpop.f32.mrb[3].mxu0 }
 0x312   : > { %v1043_v7 = vadd.f32 %v1042_v4, %v578_v43 }
 0x313   : > { %v4882_v8 = vpack.c.bf16 %v1051_v3, %v1048_v2 }
 0x314   : > { %v4884_v9 = vpack.c.bf16 %v1043_v7, %v1040_v5 }
 0x316   : > { %v3562_v13 = vpop.f32.mrb[4].mxu0  ;;  %3608 = vmatprep.mubr.msk.bf16.mxu1 %vm1254_vm1, %v4884_v9 }
 0x317   : > { %v1055_v14 = vpop.f32.mrb[5].mxu0  ;;  %v1064_v16 = vadd.f32 %v3562_v13, %v603_v55 }
 0x318   : > { %v3563_v15 = vpop.f32.mrb[6].mxu0  ;;  %v1056_v18 = vadd.f32 %v1055_v14, %v593_v51 }
 0x319   : > { %v1067_v17 = vadd.f32 %v3563_v15, %v608_v56  ;;  %v1058_v6 = vpop.f32.mrb[7].mxu0 }
 0x31a   : > { %v1059_v10 = vadd.f32 %v1058_v6, %v598_v52 }
 0x31b   : > { %v4890_v20 = vpack.c.bf16 %v1067_v17, %v1064_v16 }
 0x31c   : > { %v4894_v22 = vpack.c.bf16 %v1059_v10, %v1056_v18 }
 0x31e   : > { %v3566_v23 = vpop.f32.mrb[8].mxu0 }
 0x31f   : > { %v1071_v24 = vpop.f32.mrb[9].mxu0  ;;  %v1080_v27 = vadd.f32 %v3566_v23, %v623_v11 }
 0x320   : > { %v3567_v25 = vpop.f32.mrb[10].mxu0  ;;  %v1072_v31 = vadd.f32 %v1071_v24, %v613_v59  ;;  %v733_v24 = vpop.permute.xlu0 %732 }
 0x321   : > { %v1083_v28 = vadd.f32 %v3567_v25, %v628_v12  ;;  %v1074_v29 = vpop.f32.mrb[11].mxu0 }
 0x322   : > { %v1075_v32 = vadd.f32 %v1074_v29, %v618_v60 }
 0x323   : > { %v4896_v33 = vpack.c.bf16 %v1083_v28, %v1080_v27 }
 0x324   : > { %v4898_v34 = vpack.c.bf16 %v1075_v32, %v1072_v31 }
 0x326   : > { %v3570_v35 = vpop.f32.mrb[12].mxu0 }
 0x327   : > { %v1087_v37 = vpop.f32.mrb[13].mxu0  ;;  %v1096_v43 = vadd.f32 %v3570_v35, %v643_v36 }
 0x328   : > { %v3571_v42 = vpop.f32.mrb[14].mxu0  ;;  %v1088_v51 = vadd.f32 %v1087_v37, %v633_v26 }
 0x329   : > { %v1099_v47 = vadd.f32 %v3571_v42, %v648_v38  ;;  %v1090_v48 = vpop.f32.mrb[15].mxu0 }
 0x32a   : > { %v1091_v52 = vadd.f32 %v1090_v48, %v638_v30 }
 0x32b   : > { %v4900_v55 = vpack.c.bf16 %v1099_v47, %v1096_v43 }
 0x32c   : > { %v4902_v56 = vpack.c.bf16 %v1091_v52, %v1088_v51 }
 0x32e   : > { %v3574_v59 = vpop.f32.mrb[16].mxu0 }
 0x32f   : > { %v1103_v60 = vpop.f32.mrb[17].mxu0  ;;  %v1112_v63 = vadd.f32 %v3574_v59, %v4856_v40 }
 0x330   : > { %v3575_v61 = vpop.f32.mrb[18].mxu0  ;;  %v1104_v3 = vadd.f32 %v1103_v60, %v4864_v46 }
 0x331   : > { %v1115_v1 = vadd.f32 %v3575_v61, %v4858_v41  ;;  %v1106_v2 = vpop.f32.mrb[19].mxu0 }
 0x332   : > { %v1107_v4 = vadd.f32 %v1106_v2, %v4854_v39 }
 0x333   : > { %v4908_v5 = vpack.c.bf16 %v1115_v1, %v1112_v63 }
 0x334   : > { %v4910_v7 = vpack.c.bf16 %v1107_v4, %v1104_v3 }
 0x335   : > { %v1265_v18 = vsel %vm1254_vm1, %v4908_v5, 0 }
 0x336   : > { %v3578_v11 = vpop.f32.mrb[20].mxu0  ;;  %3781 = vmatprep.subr.msk.bf16.mxu1 %vm1254_vm1, %v4910_v7  ;;  %v1262_v12 = vsel %vm1254_vm1, %v4910_v7, 0 }
 0x337   : > { %v1119_v13 = vpop.f32.mrb[21].mxu0  ;;  %3605 = vmatpush3.bf16.xpose.msra.mxu1 %v1262_v12  ;;  %v1128_v41 = vadd.f32 %v3578_v11, %v4866_v49  ;;  %v738_v49 = vpop.permute.xlu1 %737 }
 0x338   : > { %v3579_v40 = vpop.f32.mrb[22].mxu0  ;;  %3782 = vmatprep.subr.msk.bf16.mxu1 %vm1254_vm1, %v4908_v5  ;;  %v1120_v14 = vadd.f32 %v1119_v13, %v4860_v44 }
 0x339   : > { %v1131_v39 = vadd.f32 %v3579_v40, %v4868_v50  ;;  %v1122_v46 = vpop.f32.mrb[23].mxu0 }
 0x33a   : > { %v1123_v15 = vadd.f32 %v1122_v46, %v4862_v45 }
 0x33b   : > { %v4922_v16 = vpack.c.bf16 %v1131_v39, %v1128_v41 }
 0x33c   : > { %v4924_v17 = vpack.c.bf16 %v1123_v15, %v1120_v14 }
 0x33d   : > { %v1326_v51 = vsel %vm1254_vm1, %v4922_v16, 0 }
 0x33e   : > { %v3582_v6 = vpop.f32.mrb[24].mxu0  ;;  %v1323_v30 = vsel %vm1254_vm1, %v4924_v17, 0 }
 0x33f   : > { %v1135_v10 = vpop.f32.mrb[25].mxu0  ;;  %3607 = vmatpush3.bf16.xpose.msra.mxu1 %v1265_v18  ;;  %v1144_v50 = vadd.f32 %v3582_v6, %v4874_v57  ;;  %v743_v57 = vpop.permute.xlu1 %742 }
 0x340   : > { %v3583_v23 = vpop.f32.mrb[26].mxu0  ;;  %3783 = vmatprep.subr.msk.bf16.mxu1 %vm1254_vm1, %v4924_v17  ;;  %v1136_v25 = vadd.f32 %v1135_v10, %v4870_v53  ;;  %v748_v53 = vpop.permute.xlu0 %747 }
 0x341   : > { %v1147_v44 = vadd.f32 %v3583_v23, %v4876_v58  ;;  %v1138_v45 = vpop.f32.mrb[27].mxu0 }
 0x342   : > { %v1139_v26 = vadd.f32 %v1138_v45, %v4872_v54 }
 0x343   : > { %v4934_v27 = vpack.c.bf16 %v1147_v44, %v1144_v50  ;;  %v758_v43 = vpop.permute.xlu1 %757 }
 0x344   : > { %v4936_v28 = vpack.c.bf16 %v1139_v26, %v1136_v25  ;;  %v753_v47 = vpop.permute.xlu0 %752 }
 0x345   : > { %v1387_v23 = vsel %vm1254_vm1, %v4934_v27, 0 }
 0x346   : > { %v3586_v29 = vpop.f32.mrb[28].mxu0  ;;  %3609 = vmatmul.mubr.msk.bf16.vlgmr.msra.gmra.mrb[0].mxu1 %vm1254_vm1, %v4882_v8  ;;  %v1384_v4 = vsel %vm1254_vm1, %v4936_v28, 0 }
 0x347   : > { %v1151_v31 = vpop.f32.mrb[29].mxu0  ;;  %3613 = vmatpush3.bf16.xpose.msra.mxu1 %v1323_v30  ;;  %3616 = vmatprep.mubr.msk.bf16.mxu1 %vm1254_vm1, %v4894_v22  ;;  %v1160_v54 = vadd.f32 %v3586_v29, %v4888_v19  ;;  %v763_v61 = vpop.permute.xlu1 %762 }
 0x348   : > { %v3587_v58 = vpop.f32.mrb[30].mxu0  ;;  %3784 = vmatprep.subr.msk.bf16.mxu1 %vm1254_vm1, %v4922_v16  ;;  %v1152_v36 = vadd.f32 %v1151_v31, %v4878_v62  ;;  %v768_v1 = vpop.permute.xlu0 %767 }
 0x349   : > { %v1163_v32 = vadd.f32 %v3587_v58, %v4892_v21  ;;  %v1154_v35 = vpop.f32.mrb[31].mxu0 }
 0x34a   : > { %v1155_v37 = vadd.f32 %v1154_v35, %v4880_v0 }
 0x34b   : > { %v4950_v38 = vpack.c.bf16 %v1163_v32, %v1160_v54  ;;  %v773_v13 = vpop.permute.xlu1 %772 }
 0x34c   : > { %v4952_v42 = vpack.c.bf16 %v1155_v37, %v1152_v36  ;;  %v778_v46 = vpop.permute.xlu0 %777 }
 0x34e   : > { %v3590_v48 = vpop.f32.mrb[32].mxu0  ;;  %v1445_v58 = vsel %vm1254_vm1, %v4952_v42, 0 }
 0x34f   : > { %v1167_v52 = vpop.f32.mrb[33].mxu0  ;;  %3615 = vmatpush3.bf16.xpose.msra.mxu1 %v1326_v51  ;;  %v1176_v21 = vadd.f32 %v3590_v48, %v743_v57  ;;  %v1448_v51 = vsel %vm1254_vm1, %v4950_v38, 0 }
 0x350   : > { %v3591_v19 = vpop.f32.mrb[34].mxu0  ;;  %3785 = vmatprep.subr.msk.bf16.mxu1 %vm1254_vm1, %v4936_v28  ;;  %v1168_v0 = vadd.f32 %v1167_v52, %v733_v24  ;;  %v783_v44 = vpop.permute.xlu0 %782 }
 0x351   : > { %v1179_v62 = vadd.f32 %v3591_v19, %v748_v53  ;;  %v1170_v59 = vpop.f32.mrb[35].mxu0 }
 0x352   : > { %v1171_v60 = vadd.f32 %v1170_v59, %v738_v49  ;;  %v788_v49 = vpop.permute.xlu1 %787 }
 0x353   : > { %v4958_v63 = vpack.c.bf16 %v1179_v62, %v1176_v21 }
 0x354   : > { %v4960_v2 = vpack.c.bf16 %v1171_v60, %v1168_v0  ;;  %v793_v36 = vpop.permute.xlu0 %792 }
 0x356   : > { %v3594_v3 = vpop.f32.mrb[36].mxu0  ;;  %3617 = vmatmul.mubr.msk.bf16.vlgmr.msra.gmra.mrb[4].mxu1 %vm1254_vm1, %v4890_v20  ;;  %v798_v32 = vpop.permute.xlu1 %797 }
 0x357   : > { %v1183_v11 = vpop.f32.mrb[37].mxu0  ;;  %3621 = vmatpush3.bf16.xpose.msra.mxu1 %v1384_v4  ;;  %3624 = vmatprep.mubr.msk.bf16.mxu1 %vm1254_vm1, %v4898_v34  ;;  %v1192_v40 = vadd.f32 %v3594_v3, %v763_v61 }
 0x358   : > { %v3595_v12 = vpop.f32.mrb[38].mxu0  ;;  %3786 = vmatprep.subr.msk.bf16.mxu1 %vm1254_vm1, %v4934_v27  ;;  %v1184_v14 = vadd.f32 %v1183_v11, %v753_v47 }
 0x359   : > { %v1195_v41 = vadd.f32 %v3595_v12, %v768_v1  ;;  %v1186_v39 = vpop.f32.mrb[39].mxu0 }
 0x35a   : > { %v1187_v15 = vadd.f32 %v1186_v39, %v758_v43 }
 0x35b   : > { %v4970_v6 = vpack.c.bf16 %v1195_v41, %v1192_v40 }
 0x35c   : > { %v4972_v18 = vpack.c.bf16 %v1187_v15, %v1184_v14 }
 0x35e   : > { %v3598_v10 = vpop.f32.mrb[40].mxu0 }
 0x35f   : > { %v1199_v50 = vpop.f32.mrb[41].mxu0  ;;  %3623 = vmatpush3.bf16.xpose.msra.mxu1 %v1387_v23  ;;  %v1208_v24 = vadd.f32 %v3598_v10, %v783_v44 }
 0x360   : > { %v3599_v45 = vpop.f32.mrb[42].mxu0  ;;  %3787 = vmatprep.subr.msk.bf16.mxu1 %vm1254_vm1, %v4952_v42  ;;  %v1200_v29 = vadd.f32 %v1199_v50, %v773_v13 }
 0x361   : > { %v1211_v25 = vadd.f32 %v3599_v45, %v788_v49  ;;  %v1202_v26 = vpop.f32.mrb[43].mxu0 }
 0x362   : > { %v1203_v30 = vadd.f32 %v1202_v26, %v778_v46 }
 0x363   : > { %v4978_v57 = vpack.c.bf16 %v1211_v25, %v1208_v24 }
 0x364   : > { %v4980_v31 = vpack.c.bf16 %v1203_v30, %v1200_v29 }
 0x366   : > { %v4982_v53 = vpop.f32.mrb[44].mxu0  ;;  %3625 = vmatmul.mubr.msk.bf16.vlgmr.msra.gmra.mrb[8].mxu1 %vm1254_vm1, %v4896_v33 }
 0x367   : > { %v1215_v54 = vpop.f32.mrb[45].mxu0  ;;  %3629 = vmatpush3.bf16.xpose.msra.mxu1 %v1445_v58  ;;  %3632 = vmatprep.mubr.msk.bf16.mxu1 %vm1254_vm1, %v4902_v56 }
 0x368   : > { %v4990_v35 = vpop.f32.mrb[46].mxu0  ;;  %3788 = vmatprep.subr.msk.bf16.mxu1 %vm1254_vm1, %v4950_v38  ;;  %v1216_v43 = vadd.f32 %v1215_v54, %v793_v36  ;;  %v568_v54 = vld [vmem:[#allocation9 + $0x170] sm:$0xff] }
 0x369   : > { %v1218_v37 = vpop.f32.mrb[47].mxu0 }
 0x36a   : > { %v1219_v47 = vadd.f32 %v1218_v37, %v798_v32 }
 0x36c   : > { %v4994_v48 = vpack.c.bf16 %v1219_v47, %v1216_v43 }
 0x36f   : > { %3631 = vmatpush3.bf16.xpose.msra.mxu1 %v1448_v51 }
 0x370   : > { %3636 = vmatprep.subr.bf16.mxu1 %v4960_v2 }
 0x376   : > { %3633 = vmatmul.mubr.msk.bf16.vlgmr.msra.gmra.mrb[12].mxu1 %vm1254_vm1, %v4900_v55 }
 0x377   : > { %3637 = vmatpush3.bf16.msra.mxu1 %v4960_v2 }
 0x378   : > { %3638 = vmatprep.subr.bf16.mxu1 %v4958_v63 }
 0x37b   : > { %3639 = vmatpush3.bf16.msra.mxu1 %v4958_v63 }
 0x37c   : > { %3644 = vmatprep.subr.bf16.mxu1 %v4972_v18 }
 0x419   : > { %v3610_v52 = vpop.f32.mrb[0].mxu1 }
 0x41a   : > { %v1301_v19 = vpop.f32.mrb[1].mxu1  ;;  %v1505_v21 = vsel %vm5603_vm0, %v3610_v52, -inf }
 0x41b   : > { %1506 = vmax.xlane.f32.xlu0 %v1505_v21  ;;  %v3611_v62 = vpop.f32.mrb[2].mxu1  ;;  %v1499_v59 = vsel %vm5603_vm0, %v1301_v19, -inf }
 0x41c   : > { %1500 = vmax.xlane.f32.xlu1 %v1499_v59  ;;  %v1304_v0 = vpop.f32.mrb[3].mxu1  ;;  %v1508_v61 = vsel %vm5603_vm0, %v3611_v62, -inf }
 0x41d   : > { %v1502_v60 = vsel %vm5603_vm0, %v1304_v0, -inf }
 0x41f   : > { %1503 = vmax.xlane.f32.xlu0 %v1502_v60 }
 0x420   : > { %1509 = vmax.xlane.f32.xlu1 %v1508_v61 }
 0x429   : > { %v3618_v1 = vpop.f32.mrb[4].mxu1 }
 0x42a   : > { %v5009_v3 = vpop.f32.mrb[5].mxu1  ;;  %v1517_v4 = vsel %vm5603_vm0, %v3618_v1, -inf }
 0x42b   : > { %1518 = vmax.xlane.f32.xlu0 %v1517_v4  ;;  %v5012_v11 = vpop.f32.mrb[6].mxu1  ;;  %v1511_v40 = vsel %vm5603_vm0, %v5009_v3, -inf }
 0x42c   : > { %v5014_v12 = vpop.f32.mrb[7].mxu1  ;;  %v1520_v13 = vsel %vm5603_vm0, %v5012_v11, -inf }
 0x42d   : > { %1521 = vmax.xlane.f32.xlu1 %v1520_v13  ;;  %v1514_v41 = vsel %vm5603_vm0, %v5014_v12, -inf }
 0x42f   : > { %1512 = vmax.xlane.f32.xlu0 %v1511_v40 }
 0x431   : > { %1515 = vmax.xlane.f32.xlu1 %v1514_v41 }
 0x439   : > { %v5022_v39 = vpop.f32.mrb[8].mxu1 }
 0x43a   : > { %v5024_v46 = vpop.f32.mrb[9].mxu1  ;;  %v1529_v14 = vsel %vm5603_vm0, %v5022_v39, -inf }
 0x43b   : > { %1530 = vmax.xlane.f32.xlu0 %v1529_v14  ;;  %v5028_v15 = vpop.f32.mrb[10].mxu1  ;;  %v1523_v49 = vsel %vm5603_vm0, %v5024_v46, -inf }
 0x43c   : > { %v5030_v10 = vpop.f32.mrb[11].mxu1  ;;  %v1532_v23 = vsel %vm5603_vm0, %v5028_v15, -inf }
 0x43d   : > { %1533 = vmax.xlane.f32.xlu1 %v1532_v23  ;;  %v1526_v50 = vsel %vm5603_vm0, %v5030_v10, -inf }
 0x43f   : > { %1524 = vmax.xlane.f32.xlu0 %v1523_v49 }
 0x441   : > { %1527 = vmax.xlane.f32.xlu1 %v1526_v50 }
 0x449   : > { %v5038_v44 = vpop.f32.mrb[12].mxu1 }
 0x44a   : > { %v5040_v45 = vpop.f32.mrb[13].mxu1  ;;  %v1541_v24 = vsel %vm5603_vm0, %v5038_v44, -inf }
 0x44b   : > { %1542 = vmax.xlane.f32.xlu0 %v1541_v24  ;;  %v5044_v25 = vpop.f32.mrb[14].mxu1  ;;  %v1535_v30 = vsel %vm5603_vm0, %v5040_v45, -inf }
 0x44c   : > { %v5046_v26 = vpop.f32.mrb[15].mxu1  ;;  %v1544_v29 = vsel %vm5603_vm0, %v5044_v25, -inf }
 0x44d   : > { %1545 = vmax.xlane.f32.xlu1 %v1544_v29  ;;  %v1538_v58 = vsel %vm5603_vm0, %v5046_v26, -inf }
 0x44f   : > { %1536 = vmax.xlane.f32.xlu0 %v1535_v30 }
 0x451   : > { %1539 = vmax.xlane.f32.xlu1 %v1538_v58 }
 0x462   : > { %802 = vperm.xlu1 %3938, %v568_v54  }
 0x4a8   : > { %v1507_v32 = vpop.xlane.xlu0 %1506 }
 0x4a9   : > { %v1549_v36 = vsub.f32 %v3610_v52, %v1507_v32  ;;  %v1501_v37 = vpop.xlane.xlu1 %1500 }
 0x4aa   : > { %v1547_v43 = vsub.f32 %v1301_v19, %v1501_v37 }
 0x4ab   : > { %v1567_v47 = vmul.f32 1.442695, %v1549_v36 }
 0x4ac   : > { %v1563_v51 = vmul.f32 1.442695, %v1547_v43  ;;  %v1504_v21 = vpop.xlane.xlu0 %1503 }
 0x4ad   : > { %3985 = vpow2.f32 %v1567_v47  ;;  %v1548_v59 = vsub.f32 %v1304_v0, %v1504_v21  ;;  %v1510_v60 = vpop.xlane.xlu1 %1509 }
 0x4ae   : > { %v1550_v61 = vsub.f32 %v3611_v62, %v1510_v60  ;;  %3987 = vpow2.f32 %v1563_v51 }
 0x4af   : > { %v1565_v4 = vmul.f32 1.442695, %v1548_v59 }
 0x4b0   : > { %v1569_v13 = vmul.f32 1.442695, %v1550_v61 }
 0x4b2   : > { %3989 = vpow2.f32 %v1569_v13 }
 0x4b3   : > { %3991 = vpow2.f32 %v1565_v4 }
 0x4b7   : > { %v5054_v40 = vpop.eup %3985 }
 0x4b8   : > { %v1519_v41 = vpop.xlane.xlu0 %1518  ;;  %v1601_v52 = vsel %vm5603_vm0, %v5054_v40, 0.0  ;;  %v5058_v14 = vpop.eup %3987 }
 0x4b9   : > { %v1553_v19 = vsub.f32 %v3618_v1, %v1519_v41  ;;  %1602 = vadd.xlane.f32.xlu0 %v1601_v52  ;;  %v1595_v24 = vsel %vm5603_vm0, %v5058_v14, 0.0 }
 0x4ba   : > { %v1522_v23 = vpop.xlane.xlu1 %1521 }
 0x4bb   : > { %v1575_v49 = vmul.f32 1.442695, %v1553_v19  ;;  %v1554_v0 = vsub.f32 %v5012_v11, %v1522_v23 }
 0x4bc   : > { %v5061_v62 = vpop.eup %3989  ;;  %v1513_v50 = vpop.xlane.xlu0 %1512 }
 0x4bd   : > { %3993 = vpow2.f32 %v1575_v49  ;;  %v1577_v29 = vmul.f32 1.442695, %v1554_v0  ;;  %v1551_v30 = vsub.f32 %v5009_v3, %v1513_v50  ;;  %1596 = vadd.xlane.f32.xlu0 %v1595_v24  ;;  %v1604_v58 = vsel %vm5603_vm0, %v5061_v62, 0.0  ;;  %v5068_v1 = vpop.eup %3991 }
 0x4be   : > { %v1516_v54 = vpop.xlane.xlu1 %1515  ;;  %1605 = vadd.xlane.f32.xlu1 %v1604_v58  ;;  %v1598_v37 = vsel %vm5603_vm0, %v5068_v1, 0.0 }
 0x4bf   : > { %3995 = vpow2.f32 %v1577_v29  ;;  %v1571_v11 = vmul.f32 1.442695, %v1551_v30  ;;  %v1552_v32 = vsub.f32 %v5014_v12, %v1516_v54 }
 0x4c1   : > { %3997 = vpow2.f32 %v1571_v11  ;;  %v1573_v36 = vmul.f32 1.442695, %v1552_v32  ;;  %v569_v32 = vld [vmem:[#allocation9 + $0x178] sm:$0xff] }
 0x4c2   : > { %1599 = vadd.xlane.f32.xlu1 %v1598_v37 }
 0x4c3   : > { %3999 = vpow2.f32 %v1573_v36 }
 0x4c7   : > { %v5073_v3 = vpop.eup %3993 }
 0x4c8   : > { %v1531_v43 = vpop.xlane.xlu0 %1530  ;;  %v1613_v47 = vsel %vm5603_vm0, %v5073_v3, 0.0 }
 0x4c9   : > { %v5077_v51 = vpop.eup %3995  ;;  %v1557_v21 = vsub.f32 %v5022_v39, %v1531_v43  ;;  %1614 = vadd.xlane.f32.xlu0 %v1613_v47 }
 0x4ca   : > { %v1534_v59 = vpop.xlane.xlu1 %1533  ;;  %v1616_v12 = vsel %vm5603_vm0, %v5077_v51, 0.0 }
 0x4cb   : > { %v5082_v60 = vpop.eup %3997  ;;  %v1583_v61 = vmul.f32 1.442695, %v1557_v21  ;;  %v1558_v4 = vsub.f32 %v5028_v15, %v1534_v59  ;;  %1617 = vadd.xlane.f32.xlu1 %v1616_v12 }
 0x4cc   : > { %v1525_v13 = vpop.xlane.xlu0 %1524  ;;  %v1607_v41 = vsel %vm5603_vm0, %v5082_v60, 0.0 }
 0x4cd   : > { %v5087_v52 = vpop.eup %3999  ;;  %4001 = vpow2.f32 %v1583_v61  ;;  %v1555_v39 = vsub.f32 %v5024_v46, %v1525_v13  ;;  %1608 = vadd.xlane.f32.xlu0 %v1607_v41  ;;  %v1585_v19 = vmul.f32 1.442695, %v1558_v4 }
 0x4ce   : > { %v1528_v23 = vpop.xlane.xlu1 %1527  ;;  %v1610_v49 = vsel %vm5603_vm0, %v5087_v52, 0.0 }
 0x4cf   : > { %v1579_v0 = vmul.f32 1.442695, %v1555_v39  ;;  %v1556_v50 = vsub.f32 %v5030_v10, %v1528_v23  ;;  %1611 = vadd.xlane.f32.xlu1 %v1610_v49 }
 0x4d1   : > { %4003 = vpow2.f32 %v1579_v0  ;;  %v1581_v15 = vmul.f32 1.442695, %v1556_v50 }
 0x4d2   : > { %4005 = vpow2.f32 %v1585_v19 }
 0x4d3   : > { %4007 = vpow2.f32 %v1581_v15 }
 0x4d7   : > { %v5093_v24 = vpop.eup %4001 }
 0x4d8   : > { %v1625_v29 = vsel %vm5603_vm0, %v5093_v24, 0.0  ;;  %v1543_v37 = vpop.xlane.xlu0 %1542 }
 0x4d9   : > { %1626 = vadd.xlane.f32.xlu0 %v1625_v29  ;;  %v1561_v21 = vsub.f32 %v5038_v44, %v1543_v37 }
 0x4da   : > { %v1546_v36 = vpop.xlane.xlu1 %1545 }
 0x4db   : > { %v5097_v46 = vpop.eup %4003  ;;  %v1562_v43 = vsub.f32 %v5044_v25, %v1546_v36  ;;  %v1591_v4 = vmul.f32 1.442695, %v1561_v21 }
 0x4dc   : > { %v5099_v30 = vpop.eup %4005  ;;  %v1619_v58 = vsel %vm5603_vm0, %v5097_v46, 0.0  ;;  %v1537_v59 = vpop.xlane.xlu0 %1536 }
 0x4dd   : > { %v5103_v54 = vpop.eup %4007  ;;  %1620 = vadd.xlane.f32.xlu1 %v1619_v58  ;;  %v1628_v11 = vsel %vm5603_vm0, %v5099_v30, 0.0  ;;  %v1593_v12 = vmul.f32 1.442695, %v1562_v43  ;;  %v1559_v13 = vsub.f32 %v5040_v45, %v1537_v59 }
 0x4de   : > { %v1622_v10 = vsel %vm5603_vm0, %v5103_v54, 0.0  ;;  %v1540_v47 = vpop.xlane.xlu1 %1539 }
 0x4df   : > { %1623 = vadd.xlane.f32.xlu0 %v1622_v10  ;;  %v1560_v61 = vsub.f32 %v5046_v26, %v1540_v47  ;;  %4009 = vpow2.f32 %v1593_v12 }
 0x4e0   : > { %4011 = vpow2.f32 %v1591_v4 }
 0x4e1   : > { %1629 = vadd.xlane.f32.xlu1 %v1628_v11  ;;  %v1589_v41 = vmul.f32 1.442695, %v1560_v61 }
 0x4e3   : > { %4013 = vpow2.f32 %v1589_v41 }
 0x4e9   : > { %v5115_v39 = vpop.eup %4009 }
 0x4ea   : > { %v5117_v19 = vpop.eup %4011  ;;  %v1640_v44 = vsel %vm5603_vm0, %v5115_v39, 0.0 }
 0x4eb   : > { %v1637_v26 = vsel %vm5603_vm0, %v5117_v19, 0.0 }
 0x4ed   : > { %v5121_v25 = vpop.eup %4013 }
 0x4ee   : > { %v1634_v23 = vsel %vm5603_vm0, %v5121_v25, 0.0 }
 0x4f2   : > { %2002 = vrot.lane.b32.xlu1 %v4910_v7, %s4446_s12  ;;  %v1587_v7 = vmul.f32 1.442695, %v1559_v13 }
 0x4f4   : > { %4015 = vpow2.f32 %v1587_v7 }
 0x4f5   : > { %807 = vperm.xlu0 %3937, %v569_v32  }
 0x4fe   : > { %v5125_v45 = vpop.eup %4015 }
 0x4ff   : > { %v1631_v49 = vsel %vm5603_vm0, %v5125_v45, 0.0 }
 0x514   : > { %1641 = vadd.xlane.f32.xlu0 %v1640_v44 }
 0x516   : > { %1638 = vadd.xlane.f32.xlu1 %v1637_v26 }
 0x518   : > { %1635 = vadd.xlane.f32.xlu0 %v1634_v23 }
 0x51a   : > { %1632 = vadd.xlane.f32.xlu1 %v1631_v49 }
 0x52b   : > { %2004 = vrot.lane.b32.xlu1 %v4908_v5, %s4446_s12 }
 0x52e   : > { %2075 = vrot.lane.b32.xlu0 %v4924_v17, %s4446_s12 }
 0x52f   : > { %1996 = vrot.lane.b32.xlu1 %v4884_v9, %s4446_s12  ;;  %v5159_v9 = vpop.permute.xlu1 %802 }
 0x530   : > { %v1224_v12 = vadd.f32 %v4982_v53, %v5159_v9 }
 0x532   : > { %2077 = vrot.lane.b32.xlu0 %v4922_v16, %s4446_s12 }
 0x533   : > { %1998 = vrot.lane.b32.xlu1 %v4882_v8, %s4446_s12 }
 0x536   : > { %2148 = vrot.lane.b32.xlu0 %v4936_v28, %s4446_s12 }
 0x537   : > { %2221 = vrot.lane.b32.xlu1 %v4952_v42, %s4446_s12 }
 0x53a   : > { %2069 = vrot.lane.b32.xlu0 %v4894_v22, %s4446_s12 }
 0x53b   : > { %2150 = vrot.lane.b32.xlu1 %v4934_v27, %s4446_s12 }
 0x53e   : > { %2071 = vrot.lane.b32.xlu0 %v4890_v20, %s4446_s12 }
 0x53f   : > { %2142 = vrot.lane.b32.xlu1 %v4898_v34, %s4446_s12 }
 0x542   : > { %2223 = vrot.lane.b32.xlu0 %v4950_v38, %s4446_s12 }
 0x543   : > { %2215 = vrot.lane.b32.xlu1 %v4902_v56, %s4446_s12 }
 0x546   : > { %v1603_v8 = vpop.xlane.xlu0 %1602  ;;  %2144 = vrot.lane.b32.xlu0 %v4896_v33, %s4446_s12 }
 0x54a   : > { %2217 = vrot.lane.b32.xlu0 %v4900_v55, %s4446_s12  ;;  %v1597_v22 = vpop.xlane.xlu0 %1596 }
 0x54b   : > { %v1606_v20 = vpop.xlane.xlu1 %1605 }
 0x54c   : > { %4017 = vrcp.f32 %v1606_v20 }
 0x54d   : > { %4019 = vrcp.f32 %v1597_v22 }
 0x54e   : > { %4021 = vrcp.f32 %v1603_v8 }
 0x54f   : > { %v1600_v34 = vpop.xlane.xlu1 %1599 }
 0x550   : > { %4023 = vrcp.f32 %v1600_v34 }
 0x556   : > { %v1615_v5 = vpop.xlane.xlu0 %1614  ;;  %v4018_v16 = vpop.eup %4017 }
 0x557   : > { %v4020_v17 = vpop.eup %4019  ;;  %v1662_v33 = vmul.f32 %v4018_v16, %v5061_v62 }
 0x558   : > { %v1618_v56 = vpop.xlane.xlu1 %1617  ;;  %v4022_v27 = vpop.eup %4021  ;;  %v1659_v55 = vmul.f32 %v4020_v17, %v5058_v14 }
 0x559   : > { %4025 = vrcp.f32 %v1618_v56  ;;  %v1661_v0 = vmul.f32 %v4022_v27, %v5054_v40 }
 0x55a   : > { %v4024_v28 = vpop.eup %4023  ;;  %v1609_v38 = vpop.xlane.xlu0 %1608 }
 0x55b   : > { %4027 = vrcp.f32 %v1609_v38  ;;  %v1660_v42 = vmul.f32 %v4024_v28, %v5068_v1  ;;  %v1676_v29 = vpack.c.bf16 %v1662_v33, %v1661_v0 }
 0x55c   : > { %4029 = vrcp.f32 %v1615_v5  ;;  %v1612_v50 = vpop.xlane.xlu1 %1611 }
 0x55d   : > { %4031 = vrcp.f32 %v1612_v50  ;;  %v1675_v15 = vpack.c.bf16 %v1660_v42, %v1659_v55 }
 0x55f   : > { %3640 = vmatprep.mubr.msk.bf16.mxu1 %vm5603_vm0, %v1675_v15 }
 0x560   : > { %3641 = vmatmul.mubr.msk.bf16.vlgmr.msra.gmra.mrb[16].mxu1 %vm5603_vm0, %v1676_v29 }
 0x561   : > { %3645 = vmatpush3.bf16.msra.mxu1 %v4972_v18 }
 0x562   : > { %3646 = vmatprep.subr.bf16.mxu1 %v4970_v6 }
 0x563   : > { %v4026_v62 = vpop.eup %4025 }
 0x564   : > { %v1666_v1 = vmul.f32 %v4026_v62, %v5077_v51 }
 0x565   : > { %v4028_v58 = vpop.eup %4027  ;;  %3647 = vmatpush3.bf16.msra.mxu1 %v4970_v6 }
 0x566   : > { %v4030_v14 = vpop.eup %4029  ;;  %3652 = vmatprep.subr.bf16.mxu1 %v4980_v31  ;;  %v1627_v10 = vpop.xlane.xlu0 %1626  ;;  %v1663_v11 = vmul.f32 %v4028_v58, %v5082_v60 }
 0x567   : > { %v4032_v40 = vpop.eup %4031  ;;  %v1665_v36 = vmul.f32 %v4030_v14, %v5073_v3 }
 0x568   : > { %v1664_v32 = vmul.f32 %v4032_v40, %v5087_v52 }
 0x569   : > { %v1678_v47 = vpack.c.bf16 %v1666_v1, %v1665_v36 }
 0x56a   : > { %v1621_v37 = vpop.xlane.xlu1 %1620  ;;  %v1677_v43 = vpack.c.bf16 %v1664_v32, %v1663_v11 }
 0x56b   : > { %4033 = vrcp.f32 %v1621_v37 }
 0x56c   : > { %4035 = vrcp.f32 %v1627_v10  ;;  %v1624_v21 = vpop.xlane.xlu0 %1623  ;;  %3648 = vmatprep.mubr.msk.bf16.mxu1 %vm5603_vm0, %v1677_v43 }
 0x56d   : > { %4037 = vrcp.f32 %v1624_v21  ;;  %3649 = vmatmul.mubr.msk.bf16.vlgmr.msra.gmra.mrb[20].mxu1 %vm5603_vm0, %v1678_v47 }
 0x56e   : > { %3653 = vmatpush3.bf16.msra.mxu1 %v4980_v31  ;;  %v1630_v51 = vpop.xlane.xlu1 %1629 }
 0x56f   : > { %3654 = vmatprep.subr.bf16.mxu1 %v4978_v57  ;;  %4039 = vrcp.f32 %v1630_v51 }
 0x572   : > { %3655 = vmatpush3.bf16.msra.mxu1 %v4978_v57  ;;  %v2003_v3 = vpop.permute.xlu1 %2002 }
 0x573   : > { %3660 = vmatprep.subr.bf16.mxu1 %v4994_v48  ;;  %v2013_v60 = vsel %vm1254_vm1, %v2003_v3, 0  ;;  %3789 = vmatprep.subr.msk.bf16.mxu0 %vm1254_vm1, %v2003_v3 }
 0x574   : > { %v808_v52 = vpop.permute.xlu0 %807  ;;  %3669 = vmatpush3.bf16.xpose.msra.mxu0 %v2013_v60 }
 0x575   : > { %v4034_v59 = vpop.eup %4033  ;;  %v1227_v61 = vadd.f32 %v4990_v35, %v808_v52 }
 0x576   : > { %v4036_v4 = vpop.eup %4035  ;;  %v1667_v7 = vmul.f32 %v4034_v59, %v5097_v46 }
 0x577   : > { %v4038_v13 = vpop.eup %4037  ;;  %v5188_v41 = vpack.c.bf16 %v1227_v61, %v1224_v12  ;;  %v1669_v23 = vmul.f32 %v4036_v4, %v5093_v24 }
 0x578   : > { %v1668_v44 = vmul.f32 %v4038_v13, %v5103_v54 }
 0x579   : > { %v4040_v26 = vpop.eup %4039 }
 0x57a   : > { %v1670_v49 = vmul.f32 %v4040_v26, %v5099_v30  ;;  %v1679_v8 = vpack.c.bf16 %v1668_v44, %v1667_v7 }
 0x57c   : > { %3656 = vmatprep.mubr.msk.bf16.mxu1 %vm5603_vm0, %v1679_v8  ;;  %v1680_v22 = vpack.c.bf16 %v1670_v49, %v1669_v23 }
 0x57e   : > { %3657 = vmatmul.mubr.msk.bf16.vlgmr.msra.gmra.mrb[24].mxu1 %vm5603_vm0, %v1680_v22 }
 0x57f   : > { %3661 = vmatpush3.bf16.msra.mxu1 %v4994_v48 }
 0x580   : > { %3662 = vmatprep.subr.bf16.mxu1 %v5188_v41 }
 0x583   : > { %3663 = vmatpush3.bf16.msra.mxu1 %v5188_v41 }
 0x5a1   : > { %v1642_v53 = vpop.xlane.xlu0 %1641 }
 0x5a3   : > { %v1639_v35 = vpop.xlane.xlu1 %1638 }
 0x5a4   : > { %4041 = vrcp.f32 %v1639_v35 }
 0x5a5   : > { %v1636_v46 = vpop.xlane.xlu0 %1635 }
 0x5a6   : > { %4043 = vrcp.f32 %v1636_v46 }
 0x5a7   : > { %4045 = vrcp.f32 %v1642_v53  ;;  %v1633_v24 = vpop.xlane.xlu1 %1632 }
 0x5a8   : > { %4047 = vrcp.f32 %v1633_v24 }
 0x5a9   : > { %v2076_v30 = vpop.permute.xlu0 %2075 }
 0x5aa   : > { %3791 = vmatprep.subr.msk.bf16.mxu1 %vm1254_vm1, %v2076_v30  ;;  %v2086_v62 = vsel %vm1254_vm1, %v2076_v30, 0 }
 0x5ab   : > { %v2005_v54 = vpop.permute.xlu1 %2004 }
 0x5ac   : > { %v2016_v9 = vsel %vm1254_vm1, %v2005_v54, 0  ;;  %3790 = vmatprep.subr.msk.bf16.mxu0 %vm1254_vm1, %v2005_v54 }
 0x5ad   : > { %v2078_v20 = vpop.permute.xlu0 %2077  ;;  %3671 = vmatpush3.bf16.xpose.msra.mxu0 %v2016_v9 }
 0x5ae   : > { %v4042_v34 = vpop.eup %4041  ;;  %v2089_v40 = vsel %vm1254_vm1, %v2078_v20, 0 }
 0x5af   : > { %v1997_v5 = vpop.permute.xlu1 %1996  ;;  %v1673_v28 = vmul.f32 %v4042_v34, %v5117_v19 }
 0x5b0   : > { %v4044_v16 = vpop.eup %4043  ;;  %3672 = vmatprep.mubr.msk.bf16.mxu0 %vm1254_vm1, %v1997_v5 }
 0x5b1   : > { %v4046_v17 = vpop.eup %4045  ;;  %v2149_v56 = vpop.permute.xlu0 %2148  ;;  %v1672_v55 = vmul.f32 %v4044_v16, %v5121_v25 }
 0x5b2   : > { %v4048_v27 = vpop.eup %4047  ;;  %3793 = vmatprep.subr.msk.bf16.mxu0 %vm1254_vm1, %v2149_v56  ;;  %v1674_v42 = vmul.f32 %v4046_v17, %v5115_v39  ;;  %v2159_v0 = vsel %vm1254_vm1, %v2149_v56, 0 }
 0x5b3   : > { %v1999_v33 = vpop.permute.xlu1 %1998  ;;  %v1671_v38 = vmul.f32 %v4048_v27, %v5125_v45 }
 0x5b4   : > { %3673 = vmatmul.mubr.msk.bf16.vlgmr.msra.gmra.mrb[48].mxu0 %vm1254_vm1, %v1999_v33  ;;  %v1682_v29 = vpack.c.bf16 %v1674_v42, %v1673_v28 }
 0x5b5   : > { %v2070_v50 = vpop.permute.xlu0 %2069  ;;  %3685 = vmatpush3.bf16.xpose.msra.mxu0 %v2159_v0  ;;  %v1681_v15 = vpack.c.bf16 %v1672_v55, %v1671_v38 }
 0x5b7   : > { %3664 = vmatprep.mubr.msk.bf16.mxu1 %vm5603_vm0, %v1681_v15  ;;  %v2222_v19 = vpop.permute.xlu1 %2221 }
 0x5b8   : > { %3665 = vmatmul.mubr.msk.bf16.vlgmr.msra.gmra.mrb[28].mxu1 %vm5603_vm0, %v1682_v29  ;;  %v2232_v10 = vsel %vm1254_vm1, %v2222_v19, 0 }
 0x5b9   : > { %3677 = vmatpush3.bf16.xpose.msra.mxu1 %v2086_v62  ;;  %v2072_v45 = vpop.permute.xlu0 %2071  ;;  %3680 = vmatprep.mubr.msk.bf16.mxu1 %vm1254_vm1, %v2070_v50 }
 0x5ba   : > { %3792 = vmatprep.subr.msk.bf16.mxu1 %vm1254_vm1, %v2078_v20 }
 0x5bb   : > { %v2151_v39 = vpop.permute.xlu1 %2150 }
 0x5bc   : > { %v2162_v25 = vsel %vm1254_vm1, %v2151_v39, 0  ;;  %3794 = vmatprep.subr.msk.bf16.mxu0 %vm1254_vm1, %v2151_v39 }
 0x5bd   : > { %v2224_v58 = vpop.permute.xlu0 %2223  ;;  %3687 = vmatpush3.bf16.xpose.msra.mxu0 %v2162_v25 }
 0x5be   : > { %v2235_v32 = vsel %vm1254_vm1, %v2224_v58, 0 }
 0x5bf   : > { %v2143_v14 = vpop.permute.xlu1 %2142 }
 0x5c0   : > { %3688 = vmatprep.mubr.msk.bf16.mxu0 %vm1254_vm1, %v2143_v14 }
 0x5c1   : > { %3679 = vmatpush3.bf16.xpose.msra.mxu1 %v2089_v40  ;;  %v2145_v1 = vpop.permute.xlu0 %2144 }
 0x5c2   : > { %3795 = vmatprep.subr.msk.bf16.mxu1 %vm1254_vm1, %v2222_v19 }
 0x5c3   : > { %v2216_v11 = vpop.permute.xlu1 %2215 }
 0x5c4   : > { %3689 = vmatmul.mubr.msk.bf16.vlgmr.msra.gmra.mrb[52].mxu0 %vm1254_vm1, %v2145_v1 }
 0x5c5   : > { %v2218_v36 = vpop.permute.xlu0 %2217 }
 0x5c8   : > { %3681 = vmatmul.mubr.msk.bf16.vlgmr.msra.gmra.mrb[32].mxu1 %vm1254_vm1, %v2072_v45 }
 0x5c9   : > { %3693 = vmatpush3.bf16.xpose.msra.mxu1 %v2232_v10  ;;  %3696 = vmatprep.mubr.msk.bf16.mxu1 %vm1254_vm1, %v2216_v11 }
 0x5ca   : > { %3796 = vmatprep.subr.msk.bf16.mxu1 %vm1254_vm1, %v2224_v58 }
 0x5d1   : > { %3695 = vmatpush3.bf16.xpose.msra.mxu1 %v2235_v32 }
 0x5d8   : > { %3697 = vmatmul.mubr.msk.bf16.vlgmr.msra.gmra.mrb[36].mxu1 %vm1254_vm1, %v2218_v36 }
 0x633   : > { %v5227_v37 = vpop.f32.mrb[16].mxu1 }
 0x634   : > { %v1723_v43 = vpop.f32.mrb[17].mxu1 }
 0x635   : > { %1903 = vst.msk [vmem:[#allocation2] sm:$0xff] %vm1254_vm1, %v1723_v43  ;;  %v5230_v47 = vpop.f32.mrb[18].mxu1 }
 0x636   : > { %v5232_v21 = vpop.f32.mrb[19].mxu1 }
 0x640   : > { %v5234_v51 = vpop.f32.mrb[20].mxu1 }
 0x641   : > { %v5236_v3 = vpop.f32.mrb[21].mxu1 }
 0x642   : > { %v5238_v60 = vpop.f32.mrb[22].mxu1 }
 0x643   : > { %v5240_v52 = vpop.f32.mrb[23].mxu1 }
 0x651   : > { %v5242_v59 = vpop.f32.mrb[24].mxu1 }
 0x652   : > { %v5244_v12 = vpop.f32.mrb[25].mxu1 }
 0x653   : > { %v5246_v61 = vpop.f32.mrb[26].mxu1 }
 0x654   : > { %v5248_v4 = vpop.f32.mrb[27].mxu1 }
 0x687   : > { %v3674_v13 = vpop.f32.mrb[48].mxu0 }
 0x688   : > { %v2052_v7 = vpop.f32.mrb[49].mxu0  ;;  %v2292_v24 = vsel %vm5603_vm0, %v3674_v13, -inf }
 0x689   : > { %v3675_v44 = vpop.f32.mrb[50].mxu0  ;;  %v2286_v26 = vsel %vm5603_vm0, %v2052_v7, -inf }
 0x68a   : > { %2287 = vmax.xlane.f32.xlu1 %v2286_v26  ;;  %v2055_v23 = vpop.f32.mrb[51].mxu0  ;;  %v2295_v35 = vsel %vm5603_vm0, %v3675_v44, -inf }
 0x68b   : > { %v5251_v49 = vpop.f32.mrb[28].mxu1  ;;  %v2289_v8 = vsel %vm5603_vm0, %v2055_v23, -inf }
 0x68c   : > { %v5254_v22 = vpop.f32.mrb[29].mxu1  ;;  %2290 = vmax.xlane.f32.xlu0 %v2289_v8 }
 0x68d   : > { %v5256_v53 = vpop.f32.mrb[30].mxu1 }
 0x68e   : > { %v5259_v46 = vpop.f32.mrb[31].mxu1  ;;  %2296 = vmax.xlane.f32.xlu1 %v2295_v35 }
 0x690   : > { %2293 = vmax.xlane.f32.xlu0 %v2292_v24 }
 0x697   : > { %v3690_v30 = vpop.f32.mrb[52].mxu0 }
 0x698   : > { %v2198_v54 = vpop.f32.mrb[53].mxu0  ;;  %v2316_v27 = vsel %vm5603_vm0, %v3690_v30, -inf }
 0x699   : > { %v5262_v9 = vpop.f32.mrb[54].mxu0  ;;  %v2310_v20 = vsel %vm5603_vm0, %v2198_v54, -inf }
 0x69a   : > { %2311 = vmax.xlane.f32.xlu0 %v2310_v20  ;;  %v2201_v34 = vpop.f32.mrb[55].mxu0  ;;  %v2319_v33 = vsel %vm5603_vm0, %v5262_v9, -inf }
 0x69b   : > { %v5265_v5 = vpop.f32.mrb[32].mxu1  ;;  %v2313_v16 = vsel %vm5603_vm0, %v2201_v34, -inf }
 0x69c   : > { %v5268_v17 = vpop.f32.mrb[33].mxu1  ;;  %2314 = vmax.xlane.f32.xlu1 %v2313_v16 }
 0x69d   : > { %v5270_v56 = vpop.f32.mrb[34].mxu1 }
 0x69e   : > { %v5273_v28 = vpop.f32.mrb[35].mxu1  ;;  %2317 = vmax.xlane.f32.xlu0 %v2316_v27  ;;  %v2307_v24 = vsel %vm5603_vm0, %v5270_v56, -inf }
 0x69f   : > { %v2301_v27 = vsel %vm5603_vm0, %v5273_v28, -inf }
 0x6a0   : > { %2320 = vmax.xlane.f32.xlu1 %v2319_v33 }
 0x6ab   : > { %v5277_v38 = vpop.f32.mrb[36].mxu1 }
 0x6ac   : > { %v5279_v55 = vpop.f32.mrb[37].mxu1 }
 0x6ad   : > { %v5281_v42 = vpop.f32.mrb[38].mxu1 }
 0x6ae   : > { %v5283_v0 = vpop.f32.mrb[39].mxu1 }
 0x717   : > { %v2288_v50 = vpop.xlane.xlu1 %2287 }
 0x718   : > { %v2334_v15 = vsub.f32 %v2052_v7, %v2288_v50 }
 0x719   : > { %v2291_v29 = vpop.xlane.xlu0 %2290 }
 0x71a   : > { %v2350_v19 = vmul.f32 1.442695, %v2334_v15  ;;  %v2335_v62 = vsub.f32 %v2055_v23, %v2291_v29  ;;  %v2328_v15 = vsel %vm5603_vm0, %v5277_v38, -inf }
 0x71b   : > { %v2297_v39 = vpop.xlane.xlu1 %2296 }
 0x71c   : > { %4049 = vpow2.f32 %v2350_v19  ;;  %v2352_v45 = vmul.f32 1.442695, %v2335_v62  ;;  %v2337_v25 = vsub.f32 %v3675_v44, %v2297_v39  ;;  %v2322_v19 = vsel %vm5603_vm0, %v5279_v55, -inf }
 0x71d   : > { %v2294_v58 = vpop.xlane.xlu0 %2293 }
 0x71e   : > { %4051 = vpow2.f32 %v2352_v45  ;;  %v2356_v14 = vmul.f32 1.442695, %v2337_v25  ;;  %v2336_v40 = vsub.f32 %v3674_v13, %v2294_v58  ;;  %v2304_v13 = vsel %vm5603_vm0, %v5265_v5, -inf }
 0x71f   : > { %v2331_v58 = vsel %vm5603_vm0, %v5281_v42, -inf }
 0x720   : > { %4053 = vpow2.f32 %v2356_v14  ;;  %v2354_v36 = vmul.f32 1.442695, %v2336_v40 }
 0x722   : > { %4055 = vpow2.f32 %v2354_v36 }
 0x726   : > { %v5285_v1 = vpop.eup %4049 }
 0x727   : > { %v2312_v10 = vpop.xlane.xlu0 %2311  ;;  %v2382_v11 = vsel %vm5603_vm0, %v5285_v1, 0.0 }
 0x728   : > { %v5289_v32 = vpop.eup %4051  ;;  %2383 = vadd.xlane.f32.xlu0 %v2382_v11  ;;  %v2342_v26 = vsub.f32 %v2198_v54, %v2312_v10  ;;  %v2298_v54 = vsel %vm5603_vm0, %v5268_v17, -inf  ;;  %v2325_v10 = vsel %vm5603_vm0, %v5283_v0, -inf }
 0x729   : > { %v2315_v43 = vpop.xlane.xlu1 %2314  ;;  %v2385_v7 = vsel %vm5603_vm0, %v5289_v32, 0.0 }
 0x72a   : > { %v2343_v44 = vsub.f32 %v2201_v34, %v2315_v43  ;;  %2386 = vadd.xlane.f32.xlu1 %v2385_v7  ;;  %v2366_v20 = vmul.f32 1.442695, %v2342_v26  ;;  %v5302_v33 = vpop.eup %4053 }
 0x72b   : > { %v2318_v23 = vpop.xlane.xlu0 %2317 }
 0x72c   : > { %v2368_v8 = vmul.f32 1.442695, %v2343_v44  ;;  %2305 = vmax.xlane.f32.xlu0 %v2304_v13  ;;  %v2344_v16 = vsub.f32 %v3690_v30, %v2318_v23  ;;  %v2391_v30 = vsel %vm5603_vm0, %v5302_v33, 0.0 }
 0x72d   : > { %v2321_v35 = vpop.xlane.xlu1 %2320 }
 0x72e   : > { %4057 = vpow2.f32 %v2368_v8  ;;  %2308 = vmax.xlane.f32.xlu1 %v2307_v24  ;;  %v2345_v34 = vsub.f32 %v5262_v9, %v2321_v35  ;;  %v2370_v50 = vmul.f32 1.442695, %v2344_v16  ;;  %v5308_v9 = vpop.eup %4055 }
 0x72f   : > { %4059 = vpow2.f32 %v2366_v20  ;;  %v2388_v39 = vsel %vm5603_vm0, %v5308_v9, 0.0 }
 0x730   : > { %2299 = vmax.xlane.f32.xlu0 %v2298_v54  ;;  %v2372_v29 = vmul.f32 1.442695, %v2345_v34  ;;  %4061 = vpow2.f32 %v2370_v50 }
 0x732   : > { %2302 = vmax.xlane.f32.xlu1 %v2301_v27  ;;  %4063 = vpow2.f32 %v2372_v29 }
 0x734   : > { %2329 = vmax.xlane.f32.xlu0 %v2328_v15 }
 0x736   : > { %2392 = vadd.xlane.f32.xlu1 %v2391_v30 }
 0x738   : > { %v5312_v62 = vpop.eup %4057  ;;  %2323 = vmax.xlane.f32.xlu0 %v2322_v19 }
 0x739   : > { %v2409_v45 = vsel %vm5603_vm0, %v5312_v62, 0.0  ;;  %v5318_v25 = vpop.eup %4059 }
 0x73a   : > { %2410 = vadd.xlane.f32.xlu1 %v2409_v45  ;;  %v2406_v14 = vsel %vm5603_vm0, %v5318_v25, 0.0  ;;  %v5324_v40 = vpop.eup %4061 }
 0x73b   : > { %v2412_v36 = vsel %vm5603_vm0, %v5324_v40, 0.0 }
 0x73c   : > { %2389 = vadd.xlane.f32.xlu0 %v2388_v39  ;;  %v5328_v11 = vpop.eup %4063 }
 0x73d   : > { %v2415_v43 = vsel %vm5603_vm0, %v5328_v11, 0.0 }
 0x73e   : > { %2332 = vmax.xlane.f32.xlu1 %v2331_v58 }
 0x740   : > { %2407 = vadd.xlane.f32.xlu0 %v2406_v14 }
 0x742   : > { %2326 = vmax.xlane.f32.xlu1 %v2325_v10 }
 0x744   : > { %2413 = vadd.xlane.f32.xlu0 %v2412_v36 }
 0x746   : > { %2416 = vadd.xlane.f32.xlu1 %v2415_v43 }
 0x757   : > { %2474 = vrot.lane.b32.xlu1 %v4958_v63, %s4446_s12 }
 0x75a   : > { %2472 = vrot.lane.b32.xlu0 %v4960_v2, %s4446_s12 }
 0x75b   : > { %2535 = vrot.lane.b32.xlu1 %v4972_v18, %s4446_s12 }
 0x75e   : > { %2537 = vrot.lane.b32.xlu0 %v4970_v6, %s4446_s12 }
 0x75f   : > { %2598 = vrot.lane.b32.xlu1 %v4980_v31, %s4446_s12 }
 0x762   : > { %2600 = vrot.lane.b32.xlu0 %v4978_v57, %s4446_s12 }
 0x7b5   : > { %v2384_v7 = vpop.xlane.xlu0 %2383 }
 0x7b6   : > { %4065 = vrcp.f32 %v2384_v7 }
 0x7b7   : > { %v2387_v26 = vpop.xlane.xlu1 %2386 }
 0x7b8   : > { %4067 = vrcp.f32 %v2387_v26 }
 0x7b9   : > { %v2306_v63 = vpop.xlane.xlu0 %2305 }
 0x7ba   : > { %v2340_v44 = vsub.f32 %v5265_v5, %v2306_v63 }
 0x7bb   : > { %v2309_v2 = vpop.xlane.xlu1 %2308 }
 0x7bc   : > { %v2362_v23 = vmul.f32 1.442695, %v2340_v44  ;;  %v2341_v18 = vsub.f32 %v5270_v56, %v2309_v2 }
 0x7bd   : > { %v2300_v13 = vpop.xlane.xlu0 %2299 }
 0x7be   : > { %4069 = vpow2.f32 %v2362_v23  ;;  %v2364_v6 = vmul.f32 1.442695, %v2341_v18  ;;  %v2338_v8 = vsub.f32 %v5268_v17, %v2300_v13 }
 0x7bf   : > { %v2303_v31 = vpop.xlane.xlu1 %2302 }
 0x7c0   : > { %v4066_v35 = vpop.eup %4065  ;;  %4071 = vpow2.f32 %v2364_v6  ;;  %v2358_v57 = vmul.f32 1.442695, %v2338_v8  ;;  %v2339_v24 = vsub.f32 %v5273_v28, %v2303_v31 }
 0x7c1   : > { %v2330_v20 = vpop.xlane.xlu0 %2329  ;;  %v2446_v56 = vmul.f32 %v4066_v35, %v5285_v1 }
 0x7c2   : > { %v4068_v16 = vpop.eup %4067  ;;  %4073 = vpow2.f32 %v2358_v57  ;;  %v2360_v54 = vmul.f32 1.442695, %v2339_v24  ;;  %v2348_v5 = vsub.f32 %v5277_v38, %v2330_v20 }
 0x7c3   : > { %v2393_v34 = vpop.xlane.xlu1 %2392  ;;  %v2447_v27 = vmul.f32 %v4068_v16, %v5289_v32 }
 0x7c4   : > { %4075 = vpow2.f32 %v2360_v54  ;;  %v2378_v50 = vmul.f32 1.442695, %v2348_v5 }
 0x7c5   : > { %v2324_v17 = vpop.xlane.xlu0 %2323  ;;  %v2462_v15 = vpack.c.bf16 %v2447_v27, %v2446_v56 }
 0x7c6   : > { %4077 = vpow2.f32 %v2378_v50  ;;  %v2346_v29 = vsub.f32 %v5279_v55, %v2324_v17 }
 0x7c7   : > { %3704 = vmatprep.mubr.msk.bf16.mxu1 %vm5603_vm0, %v2462_v15  ;;  %v2411_v28 = vpop.xlane.xlu1 %2410 }
 0x7c8   : > { %v5355_v30 = vpop.eup %4069  ;;  %v2374_v19 = vmul.f32 1.442695, %v2346_v29 }
 0x7c9   : > { %v2390_v45 = vpop.xlane.xlu0 %2389  ;;  %v2400_v38 = vsel %vm5603_vm0, %v5355_v30, 0.0 }
 0x7ca   : > { %v5359_v1 = vpop.eup %4071  ;;  %4079 = vpow2.f32 %v2374_v19  ;;  %2401 = vadd.xlane.f32.xlu0 %v2400_v38 }
 0x7cb   : > { %4081 = vrcp.f32 %v2390_v45  ;;  %v2333_v32 = vpop.xlane.xlu1 %2332  ;;  %v2403_v39 = vsel %vm5603_vm0, %v5359_v1, 0.0 }
 0x7cc   : > { %v5363_v55 = vpop.eup %4073  ;;  %4083 = vrcp.f32 %v2393_v34  ;;  %v2349_v58 = vsub.f32 %v5281_v42, %v2333_v32  ;;  %2404 = vadd.xlane.f32.xlu1 %v2403_v39 }
 0x7cd   : > { %4085 = vrcp.f32 %v2411_v28  ;;  %v2408_v14 = vpop.xlane.xlu0 %2407  ;;  %v2394_v10 = vsel %vm5603_vm0, %v5363_v55, 0.0 }
 0x7ce   : > { %v5368_v36 = vpop.eup %4075  ;;  %v2380_v43 = vmul.f32 1.442695, %v2349_v58  ;;  %4087 = vrcp.f32 %v2408_v14  ;;  %2395 = vadd.xlane.f32.xlu0 %v2394_v10 }
 0x7cf   : > { %v2327_v7 = vpop.xlane.xlu1 %2326  ;;  %v2397_v26 = vsel %vm5603_vm0, %v5368_v36, 0.0 }
 0x7d0   : > { %v5372_v63 = vpop.eup %4077  ;;  %4089 = vpow2.f32 %v2380_v43  ;;  %v2347_v42 = vsub.f32 %v5283_v0, %v2327_v7  ;;  %2398 = vadd.xlane.f32.xlu1 %v2397_v26 }
 0x7d1   : > { %v2414_v44 = vpop.xlane.xlu0 %2413  ;;  %v2424_v2 = vsel %vm5603_vm0, %v5372_v63, 0.0 }
 0x7d2   : > { %v2376_v23 = vmul.f32 1.442695, %v2347_v42  ;;  %2425 = vadd.xlane.f32.xlu0 %v2424_v2 }
 0x7d3   : > { %v2417_v18 = vpop.xlane.xlu1 %2416 }
 0x7d4   : > { %v5377_v13 = vpop.eup %4079  ;;  %4091 = vpow2.f32 %v2376_v23 }
 0x7d5   : > { %v4082_v6 = vpop.eup %4081  ;;  %4093 = vrcp.f32 %v2417_v18  ;;  %v2473_v8 = vpop.permute.xlu0 %2472  ;;  %v2418_v31 = vsel %vm5603_vm0, %v5377_v13, 0.0 }
 0x7d6   : > { %v4084_v35 = vpop.eup %4083  ;;  %2419 = vadd.xlane.f32.xlu0 %v2418_v31  ;;  %3700 = vmatprep.subr.bf16.mxu1 %v2473_v8  ;;  %4095 = vrcp.f32 %v2414_v44  ;;  %v2448_v20 = vmul.f32 %v4082_v6, %v5308_v9 }
 0x7d7   : > { %v4086_v0 = vpop.eup %4085  ;;  %3701 = vmatpush3.bf16.msra.mxu1 %v2473_v8  ;;  %v2475_v57 = vpop.permute.xlu1 %2474  ;;  %v2449_v5 = vmul.f32 %v4084_v35, %v5302_v33 }
 0x7d8   : > { %v4088_v24 = vpop.eup %4087  ;;  %3702 = vmatprep.subr.bf16.mxu1 %v2475_v57  ;;  %v2455_v50 = vmul.f32 %v4086_v0, %v5312_v62 }
 0x7d9   : > { %v2454_v16 = vmul.f32 %v4088_v24, %v5318_v25  ;;  %v2538_v34 = vpop.permute.xlu0 %2537  ;;  %v2463_v17 = vpack.c.bf16 %v2449_v5, %v2448_v20 }
 0x7da   : > { %v5383_v54 = vpop.eup %4089 }
 0x7db   : > { %3703 = vmatpush3.bf16.msra.mxu1 %v2475_v57  ;;  %v2536_v56 = vpop.permute.xlu1 %2535  ;;  %v2427_v27 = vsel %vm5603_vm0, %v5383_v54, 0.0  ;;  %v2466_v9 = vpack.c.bf16 %v2455_v50, %v2454_v16 }
 0x7dc   : > { %2428 = vadd.xlane.f32.xlu1 %v2427_v27  ;;  %3708 = vmatprep.subr.bf16.mxu0 %v2536_v56 }
 0x7dd   : > { %3709 = vmatpush3.bf16.msra.mxu0 %v2536_v56  ;;  %v2601_v28 = vpop.permute.xlu0 %2600 }
 0x7de   : > { %v5389_v15 = vpop.eup %4091  ;;  %3705 = vmatmul.mubr.msk.bf16.vlgmr.msra.gmra.mrb[40].mxu1 %vm5603_vm0, %v2463_v17  ;;  %3710 = vmatprep.subr.bf16.mxu0 %v2538_v34 }
 0x7df   : > { %v4094_v25 = vpop.eup %4093  ;;  %3720 = vmatprep.mubr.msk.bf16.mxu1 %vm5603_vm0, %v2466_v9  ;;  %v2599_v33 = vpop.permute.xlu1 %2598  ;;  %v2421_v29 = vsel %vm5603_vm0, %v5389_v15, 0.0 }
 0x7e0   : > { %2422 = vadd.xlane.f32.xlu1 %v2421_v29  ;;  %3716 = vmatprep.subr.bf16.mxu1 %v2599_v33  ;;  %v4096_v62 = vpop.eup %4095  ;;  %v2457_v19 = vmul.f32 %v4094_v25, %v5328_v11  ;;  %v3963_v25 = vld [vmem:[#allocation11] sm:$0xff]   ;;  %v3964_v29 = vld [vmem:[#allocation11 + $0x8] sm:$0xff]  }
 0x7e1   : > { %3711 = vmatpush3.bf16.msra.mxu0 %v2538_v34  ;;  %3717 = vmatpush3.bf16.msra.mxu1 %v2599_v33  ;;  %v2456_v45 = vmul.f32 %v4096_v62, %v5324_v40  ;;  %v4461_v33 = vmov 0.0  }
 0x7e2   : > { %3718 = vmatprep.subr.bf16.mxu1 %v2601_v28 }
 0x7e3   : > { %v2467_v38 = vpack.c.bf16 %v2457_v19, %v2456_v45  ;;  %v3965_v45 = vld [vmem:[#allocation11 + $0x10] sm:$0xff]  }
 0x7e5   : > { %3719 = vmatpush3.bf16.msra.mxu1 %v2601_v28 }
 0x7e6   : > { %3732 = vmatprep.subr.bf16.mxu1 %v4461_v33 }
 0x7e8   : > { %3721 = vmatmul.mubr.msk.bf16.vlgmr.msra.gmra.mrb[44].mxu1 %vm5603_vm0, %v2467_v38 }
 0x7e9   : > { %3733 = vmatpush3.bf16.msra.mxu1 %v3963_v25  ;;  %v3422_v25 = vld [vmem:[#allocation6 + $0x3] ss:$0 sm:$0xff] }
 0x7ea   : > { %3734 = vmatprep.subr.bf16.mxu1 %v4461_v33 }
 0x7ec   : > { %2663 = vrot.lane.b32.xlu0 %v5188_v41, %s4446_s12 }
 0x7ed   : > { %3735 = vmatpush3.bf16.msra.mxu1 %v3964_v29 }
 0x7ee   : > { %3736 = vmatprep.subr.bf16.mxu1 %v4461_v33 }
 0x7f1   : > { %2661 = vrot.lane.b32.xlu1 %v4994_v48, %s4446_s12  ;;  %3737 = vmatpush3.bf16.msra.mxu1 %v3965_v45  ;;  %v3423_v45 = vld [vmem:[#allocation6 + $0x4] ss:$0 sm:$0xff] }
 0x7f2   : > { %3738 = vmatprep.subr.bf16.mxu1 %v4461_v33 }
 0x7f5   : > { %1905 = vrot.lane.b32.xlu1 %v5232_v21, %s4447_s3 }
 0x7f9   : > { %1911 = vrot.lane.b32.xlu1 %v5227_v37, %s4448_s20 }
 0x7fd   : > { %1917 = vrot.lane.b32.xlu1 %v5230_v47, %s4449_s24 }
 0x801   : > { %1923 = vrot.lane.b32.xlu1 %v5236_v3, %s4450_s21 }
 0x805   : > { %1929 = vrot.lane.b32.xlu1 %v5240_v52, %s5601_s9  ;;  %s4459_s9 = smov 104  }
 0x809   : > { %1935 = vrot.lane.b32.xlu1 %v5234_v51, %s4452_s18 }
 0x80d   : > { %1941 = vrot.lane.b32.xlu1 %v5238_v60, %s5602_s22  ;;  %s4460_s22 = smov 112  }
 0x811   : > { %1947 = vrot.lane.b32.xlu1 %v5244_v12, %s4454_s19 }
 0x815   : > { %1953 = vrot.lane.b32.xlu1 %v5248_v4, %s4455_s15 }
 0x819   : > { %1959 = vrot.lane.b32.xlu1 %v5242_v59, %s4456_s10 }
 0x81d   : > { %1965 = vrot.lane.b32.xlu1 %v5246_v61, %s4457_s16 }
 0x821   : > { %1971 = vrot.lane.b32.xlu1 %v5254_v22, %s4458_s13 }
 0x825   : > { %1977 = vrot.lane.b32.xlu1 %v5259_v46, %s4459_s9 }
 0x829   : > { %1983 = vrot.lane.b32.xlu1 %v5251_v49, %s4460_s22 }
 0x82d   : > { %1989 = vrot.lane.b32.xlu1 %v5256_v53, %s4446_s12 }
 0x857   : > { %v2402_v48 = vpop.xlane.xlu0 %2401 }
 0x859   : > { %v2405_v41 = vpop.xlane.xlu1 %2404 }
 0x85a   : > { %4097 = vrcp.f32 %v2405_v41  ;;  %v3967_v41 = vld [vmem:[#allocation11 + $0x20] sm:$0xff]  }
 0x85b   : > { %v2396_v37 = vpop.xlane.xlu0 %2395 }
 0x85c   : > { %4099 = vrcp.f32 %v2396_v37  ;;  %v3968_v37 = vld [vmem:[#allocation11 + $0x28] sm:$0xff]  }
 0x85d   : > { %4101 = vrcp.f32 %v2402_v48  ;;  %v2399_v47 = vpop.xlane.xlu1 %2398  ;;  %v3966_v48 = vld [vmem:[#allocation11 + $0x18] sm:$0xff]  }
 0x85e   : > { %4103 = vrcp.f32 %v2399_v47  ;;  %3739 = vmatpush3.bf16.msra.mxu1 %v3966_v48 }
 0x85f   : > { %v2426_v21 = vpop.xlane.xlu0 %2425  ;;  %3740 = vmatprep.subr.bf16.mxu1 %v4461_v33 }
 0x862   : > { %3741 = vmatpush3.bf16.msra.mxu1 %v3967_v41 }
 0x863   : > { %v2420_v12 = vpop.xlane.xlu0 %2419  ;;  %3742 = vmatprep.subr.bf16.mxu1 %v4461_v33 }
 0x864   : > { %v4098_v51 = vpop.eup %4097 }
 0x865   : > { %v2453_v59 = vmul.f32 %v4098_v51, %v5359_v1 }
 0x866   : > { %v4100_v3 = vpop.eup %4099  ;;  %3743 = vmatpush3.bf16.msra.mxu1 %v3968_v37 }
 0x867   : > { %v4102_v60 = vpop.eup %4101  ;;  %v2450_v4 = vmul.f32 %v4100_v3, %v5363_v55  ;;  %v2664_v1 = vpop.permute.xlu0 %2663  ;;  %3744 = vmatprep.subr.bf16.mxu1 %v4461_v33 }
 0x868   : > { %v4104_v52 = vpop.eup %4103  ;;  %v2452_v22 = vmul.f32 %v4102_v60, %v5355_v30 }
 0x869   : > { %v2429_v61 = vpop.xlane.xlu1 %2428  ;;  %v2451_v49 = vmul.f32 %v4104_v52, %v5368_v36  ;;  %v3970_v52 = vld [vmem:[#allocation11 + $0x38] sm:$0xff]  }
 0x86a   : > { %4105 = vrcp.f32 %v2429_v61  ;;  %v2465_v46 = vpack.c.bf16 %v2453_v59, %v2452_v22 }
 0x86b   : > { %v2464_v53 = vpack.c.bf16 %v2451_v49, %v2450_v4  ;;  %4107 = vrcp.f32 %v2420_v12 }
 0x86c   : > { %4109 = vrcp.f32 %v2426_v21  ;;  %v3969_v21 = vld [vmem:[#allocation11 + $0x30] sm:$0xff]  }
 0x86d   : > { %3712 = vmatprep.mubr.msk.bf16.mxu0 %vm5603_vm0, %v2464_v53  ;;  %v2423_v40 = vpop.xlane.xlu1 %2422  ;;  %3745 = vmatpush3.bf16.msra.mxu1 %v3969_v21  ;;  %v3974_v21 = vld [vmem:[#allocation15 + $0x8] sm:$0xff]  }
 0x86e   : > { %4111 = vrcp.f32 %v2423_v40  ;;  %3713 = vmatmul.mubr.msk.bf16.vlgmr.msra.gmra.mrb[56].mxu0 %vm5603_vm0, %v2465_v46  ;;  %3746 = vmatprep.subr.bf16.mxu1 %v4461_v33 }
 0x871   : > { %v2662_v11 = vpop.permute.xlu1 %2661  ;;  %3747 = vmatpush3.bf16.msra.mxu1 %v3970_v52  ;;  %v3978_v52 = vld [vmem:[#allocation15 + $0x28] sm:$0xff]  }
 0x872   : > { %3724 = vmatprep.subr.bf16.mxu0 %v2662_v11 }
 0x873   : > { %3725 = vmatpush3.bf16.msra.mxu0 %v2662_v11 }
 0x874   : > { %3726 = vmatprep.subr.bf16.mxu0 %v2664_v1  ;;  %v4106_v32 = vpop.eup %4105 }
 0x875   : > { %v1906_v39 = vpop.permute.xlu1 %1905  ;;  %v4108_v30 = vpop.eup %4107  ;;  %v2461_v14 = vmul.f32 %v4106_v32, %v5383_v54 }
 0x876   : > { %1909 = vst.msk [vmem:[#allocation2] sm:$0xff] %vm1908_vm2, %v1906_v39  ;;  %v4110_v55 = vpop.eup %4109  ;;  %v2458_v36 = vmul.f32 %v4108_v30, %v5377_v13 }
 0x877   : > { %3727 = vmatpush3.bf16.msra.mxu0 %v2664_v1  ;;  %v2460_v7 = vmul.f32 %v4110_v55, %v5372_v63 }
 0x878   : > { %v4112_v58 = vpop.eup %4111  ;;  %3752 = vmatprep.subr.bf16.mxu0 %v4461_v33 }
 0x879   : > { %v1912_v10 = vpop.permute.xlu1 %1911  ;;  %v2459_v43 = vmul.f32 %v4112_v58, %v5389_v15  ;;  %v2469_v42 = vpack.c.bf16 %v2461_v14, %v2460_v7  ;;  %v3421_v58 = vld [vmem:[#allocation6 + $0x2] ss:$0 sm:$0xff] }
 0x87a   : > { %1915 = vst.msk [vmem:[#allocation2] sm:$0xff] %vm1914_vm3, %v1912_v10  ;;  %v4121_v10 = vld [vmem:[%s4790_s1] sm:$0xff] }
 0x87b   : > { %v2468_v26 = vpack.c.bf16 %v2459_v43, %v2458_v36 }
 0x87d   : > { %3728 = vmatprep.mubr.msk.bf16.mxu0 %vm5603_vm0, %v2468_v26  ;;  %v1918_v44 = vpop.permute.xlu1 %1917 }
 0x87e   : > { %1921 = vst.msk [vmem:[#allocation2] sm:$0xff] %vm1920_vm4, %v1918_v44  ;;  %3729 = vmatmul.mubr.msk.bf16.vlgmr.msra.gmra.mrb[60].mxu0 %vm5603_vm0, %v2469_v42  ;;  %vm1992_vm0 = vcmask 1048512   ;;  %v4122_v42 = vld [vmem:[%s4790_s1 + $0x8] sm:$0xff]  ;;  %s5634_s1 = sshll.u32 %s4784_s26, 4 }
 0x881   : > { %v1924_v2 = vpop.permute.xlu1 %1923 }
 0x882   : > { %1927 = vst.msk [vmem:[#allocation2] sm:$0xff] %vm1926_vm5, %v1924_v2 }
 0x885   : > { %v1930_v23 = vpop.permute.xlu1 %1929 }
 0x886   : > { %1933 = vst.msk [vmem:[#allocation2] sm:$0xff] %vm1932_vm6, %v1930_v23 }
 0x889   : > { %v1936_v63 = vpop.permute.xlu1 %1935 }
 0x88a   : > { %1939 = vst.msk [vmem:[#allocation2] sm:$0xff] %vm1938_vm7, %v1936_v63 }
 0x88d   : > { %v1942_v18 = vpop.permute.xlu1 %1941 }
 0x88e   : > { %1945 = vst.msk [vmem:[#allocation2] sm:$0xff] %vm1944_vm8, %v1942_v18 }
 0x891   : > { %v1948_v13 = vpop.permute.xlu1 %1947 }
 0x892   : > { %1951 = vst.msk [vmem:[#allocation2] sm:$0xff] %vm1950_vm9, %v1948_v13 }
 0x895   : > { %v1954_v6 = vpop.permute.xlu1 %1953 }
 0x896   : > { %1957 = vst.msk [vmem:[#allocation2] sm:$0xff] %vm1956_vm10, %v1954_v6 }
 0x899   : > { %v1960_v8 = vpop.permute.xlu1 %1959 }
 0x89a   : > { %1963 = vst.msk [vmem:[#allocation2] sm:$0xff] %vm1962_vm11, %v1960_v8 }
 0x89d   : > { %v1966_v31 = vpop.permute.xlu1 %1965 }
 0x89e   : > { %1969 = vst.msk [vmem:[#allocation2] sm:$0xff] %vm1968_vm12, %v1966_v31 }
 0x8a1   : > { %v1972_v35 = vpop.permute.xlu1 %1971 }
 0x8a2   : > { %1975 = vst.msk [vmem:[#allocation2] sm:$0xff] %vm1974_vm13, %v1972_v35 }
 0x8a5   : > { %v1978_v0 = vpop.permute.xlu1 %1977 }
 0x8a6   : > { %1981 = vst.msk [vmem:[#allocation2] sm:$0xff] %vm1980_vm14, %v1978_v0 }
 0x8a9   : > { %v1984_v57 = vpop.permute.xlu1 %1983 }
 0x8aa   : > { %1987 = vst.msk [vmem:[#allocation2] sm:$0xff] %vm1986_vm15, %v1984_v57 }
 0x8ad   : > { %v1990_v24 = vpop.permute.xlu1 %1989 }
 0x8ae   : > { %1993 = vst.msk [vmem:[#allocation2] sm:$0xff] %vm1992_vm0, %v1990_v24 }
 0x8b1   : > { %v3706_v20 = vpop.f32.mrb[40].mxu1 }
 0x8b2   : > { %v2518_v16 = vpop.f32.mrb[41].mxu1 }
 0x8b3   : > { %2722 = vst.msk [vmem:[#allocation2 + $0x8] sm:$0xff] %vm1254_vm1, %v2518_v16  ;;  %v3707_v54 = vpop.f32.mrb[42].mxu1  ;;  %vm4462_vm1 = vmmov 0  }
 0x8b4   : > { %v2521_v5 = vpop.f32.mrb[43].mxu1  ;;  %3748 = vmatprep.mubr.msk.bf16.mxu1 %vm4462_vm1, %v4461_v33  ;;  %3756 = vmatprep.mubr.msk.bf16.mxu0 %vm4462_vm1, %v4461_v33 }
 0x8b5   : > { %2724 = vrot.lane.b32.xlu0 %v2521_v5, %s4447_s3  ;;  %v2798_v39 = vld [vmem:[#allocation2] sm:$0xff] }
 0x8b6   : > { %v3972_v5 = vld [vmem:[#allocation12 + $0x8] sm:$0xff]  }
 0x8b9   : > { %2729 = vrot.lane.b32.xlu0 %v3706_v20, %s4448_s20  ;;  %s5627_s20 = smov 56  }
 0x8bb   : > { %v3722_v34 = vpop.f32.mrb[44].mxu1 }
 0x8bc   : > { %v2644_v56 = vpop.f32.mrb[45].mxu1 }
 0x8bd   : > { %2734 = vrot.lane.b32.xlu0 %v3707_v54, %s4449_s24  ;;  %v3723_v27 = vpop.f32.mrb[46].mxu1  ;;  %s5628_s24 = smov 40   ;;  %v3971_v54 = vld [vmem:[#allocation12] sm:$0xff]  }
 0x8be   : > { %v2647_v50 = vpop.f32.mrb[47].mxu1  ;;  %3753 = vmatpush3.bf16.msra.mxu0 %v3971_v54 }
 0x8bf   : > { %3754 = vmatprep.subr.bf16.mxu0 %v4461_v33 }
 0x8c1   : > { %2759 = vrot.lane.b32.xlu0 %v2644_v56, %s4454_s19 }
 0x8c2   : > { %3755 = vmatpush3.bf16.msra.mxu0 %v3972_v5 }
 0x8c3   : > { %3760 = vmatprep.subr.bf16.mxu0 %v4461_v33 }
 0x8c5   : > { %2764 = vrot.lane.b32.xlu0 %v2647_v50, %s4455_s15  ;;  %s4463_s15 = smov [#allocation17]  }
 0x8c9   : > { %2769 = vrot.lane.b32.xlu0 %v3722_v34, %s4456_s10  ;;  %s4353_s10 = sshll.u32 %s4463_s15, 4  ;;  %s4354_s10 = int_to_ptr.vmem [resolvable:$false] %s4353_s10 }
 0x8cd   : > { %2774 = vrot.lane.b32.xlu0 %v3723_v27, %s4457_s16  ;;  %s4355_s16 = scalar_lea.vmem %s4354_s10, 512 }
 0x927   : > { %v2725_v17 = vpop.permute.xlu0 %2724 }
 0x928   : > { %2727 = vst.msk [vmem:[#allocation2 + $0x8] sm:$0xff] %vm1908_vm2, %v2725_v17  ;;  %vm5629_vm2 = vcmask 261120  }
 0x92b   : > { %v2730_v9 = vpop.permute.xlu0 %2729 }
 0x92c   : > { %2732 = vst.msk [vmem:[#allocation2 + $0x8] sm:$0xff] %vm1914_vm3, %v2730_v9 }
 0x92f   : > { %v2735_v15 = vpop.permute.xlu0 %2734 }
 0x930   : > { %2737 = vst.msk [vmem:[#allocation2 + $0x8] sm:$0xff] %vm1920_vm4, %v2735_v15 }
 0x933   : > { %v2760_v59 = vpop.permute.xlu0 %2759 }
 0x937   : > { %v2765_v12 = vpop.permute.xlu0 %2764 }
 0x93b   : > { %v2770_v61 = vpop.permute.xlu0 %2769 }
 0x93f   : > { %v2775_v4 = vpop.permute.xlu0 %2774 }
 0x941   : > { %v3714_v62 = vpop.f32.mrb[56].mxu0 }
 0x942   : > { %2749 = vrot.lane.b32.xlu0 %v3714_v62, %s4452_s18  ;;  %v2581_v28 = vpop.f32.mrb[57].mxu0 }
 0x943   : > { %v3715_v19 = vpop.f32.mrb[58].mxu0 }
 0x944   : > { %v2584_v38 = vpop.f32.mrb[59].mxu0 }
 0x946   : > { %2739 = vrot.lane.b32.xlu0 %v2581_v28, %s4450_s21 }
 0x94a   : > { %2754 = vrot.lane.b32.xlu0 %v3715_v19, %s5627_s20 }
 0x94e   : > { %2744 = vrot.lane.b32.xlu0 %v2584_v38, %s5628_s24 }
 0x951   : > { %v3730_v47 = vpop.f32.mrb[60].mxu0 }
 0x952   : > { %2789 = vrot.lane.b32.xlu0 %v3730_v47, %s4460_s22  ;;  %v2707_v51 = vpop.f32.mrb[61].mxu0  ;;  %v3973_v47 = vld [vmem:[#allocation15] sm:$0xff]  }
 0x953   : > { %v3731_v3 = vpop.f32.mrb[62].mxu0 }
 0x954   : > { %v2710_v60 = vpop.f32.mrb[63].mxu0 }
 0x956   : > { %2779 = vrot.lane.b32.xlu0 %v2707_v51, %s4458_s13  ;;  %v3975_v51 = vld [vmem:[#allocation15 + $0x10] sm:$0xff]   ;;  %s3443_s13 = sshll.u32 %s4531_s11, 8  ;;  %s3155_s11 = scalar_lea.sflag [#allocation5], %s4784_s26 }
 0x957   : > { %s5537_s22 = scalar_lea.hbm %s5594_s8, %s3443_s13 }
 0x95a   : > { %2784 = vrot.lane.b32.xlu0 %v2710_v60, %s4459_s9  ;;  %v3977_v60 = vld [vmem:[#allocation15 + $0x20] sm:$0xff]  }
 0x95e   : > { %2794 = vrot.lane.b32.xlu0 %v3731_v3, %s4446_s12  ;;  %v3976_v3 = vld [vmem:[#allocation15 + $0x18] sm:$0xff]   ;;  %s421_s12 = scalar_lea.vmem [#allocation17], %s5634_s1 }
 0x95f   : > { %s3168_s21 = sshll.u32 %s421_s12, 4  ;;  %s5540_s21 = int_to_ptr.vmem [resolvable:$true] %s3168_s21 }
 0x960   : > { %s4349_s19 = scalar_lea.vmem %s5540_s21, 256  ;;  %p4356_p3 = scmp.lt.s32.totalorder %s5540_s21, %s4354_s10 }
 0x961   : > { %p4350_p5 = scmp.ne.s32.totalorder %s5540_s21, %s4349_s19  ;;  %p4357_p8 = scmp.lt.s32.totalorder %s4355_s16, %s4349_s19 }
 0x963   : > { %p4351_p4 = pnand %p4350_p5, %p5637_p7  ;;  %p4358_p6 = por %p4357_p8, %p4356_p3 }
 0x965   : > { %p4352_p1 = pneg %p4351_p4 }
 0x967   : > { %p4359_p0 = pnand %p4358_p6, %p4352_p1 }
 0x9b4   : > { %v2750_v49 = vpop.permute.xlu0 %2749 }
 0x9b8   : > { %v2740_v22 = vpop.permute.xlu0 %2739 }
 0x9b9   : > { %2742 = vst.msk [vmem:[#allocation2 + $0x8] sm:$0xff] %vm1926_vm5, %v2740_v22 }
 0x9bc   : > { %v2755_v53 = vpop.permute.xlu0 %2754 }
 0x9c0   : > { %v2745_v46 = vpop.permute.xlu0 %2744 }
 0x9c1   : > { %2747 = vst.msk [vmem:[#allocation2 + $0x8] sm:$0xff] %vm1932_vm6, %v2745_v46 }
 0x9c2   : > { %2752 = vst.msk [vmem:[#allocation2 + $0x8] sm:$0xff] %vm1938_vm7, %v2750_v49 }
 0x9c3   : > { %2757 = vst.msk [vmem:[#allocation2 + $0x8] sm:$0xff] %vm1944_vm8, %v2755_v53 }
 0x9c4   : > { %2762 = vst.msk [vmem:[#allocation2 + $0x8] sm:$0xff] %vm1950_vm9, %v2760_v59  ;;  %v2790_v40 = vpop.permute.xlu0 %2789  ;;  %v3979_v59 = vld [vmem:[#allocation15 + $0x30] sm:$0xff]  }
 0x9c5   : > { %2767 = vst.msk [vmem:[#allocation2 + $0x8] sm:$0xff] %vm1956_vm10, %v2765_v12  ;;  %v3980_v12 = vld [vmem:[#allocation15 + $0x38] sm:$0xff]  }
 0x9c6   : > { %2772 = vst.msk [vmem:[#allocation2 + $0x8] sm:$0xff] %vm1962_vm11, %v2770_v61  ;;  %v3424_v61 = vld [vmem:[#allocation14] ss:$0 sm:$0xff] }
 0x9c7   : > { %2777 = vst.msk [vmem:[#allocation2 + $0x8] sm:$0xff] %vm1968_vm12, %v2775_v4 }
 0x9c8   : > { %v2780_v11 = vpop.permute.xlu0 %2779 }
 0x9c9   : > { %2782 = vst.msk [vmem:[#allocation2 + $0x8] sm:$0xff] %vm1974_vm13, %v2780_v11 }
 0x9cc   : > { %v2785_v1 = vpop.permute.xlu0 %2784 }
 0x9cd   : > { %2787 = vst.msk [vmem:[#allocation2 + $0x8] sm:$0xff] %vm1980_vm14, %v2785_v1 }
 0x9ce   : > { %2792 = vst.msk [vmem:[#allocation2 + $0x8] sm:$0xff] %vm1986_vm15, %v2790_v40 }
 0x9d0   : > { %v2795_v32 = vpop.permute.xlu0 %2794 }
 0x9d1   : > { %2797 = vst.msk [vmem:[#allocation2 + $0x8] sm:$0xff] %vm1992_vm0, %v2795_v32  ;;  %vm5630_vm0 = vmmov %vm5629_vm2 }
 0x9d2   : > { %vm5631_vm3 = vmmov %vm5630_vm0 }
 0x9d3   : > { %vm5632_vm4 = vmmov %vm5630_vm0 }
 0x9d4   : > { %vm5633_vm5 = vmmov %vm5630_vm0 }
 0x9d5   : > { %vm5635_vm6 = vmmov %vm5630_vm0 }
 0x9d6   : > { %vm5636_vm7 = vmmov %vm5630_vm0 }
 0x9d8   : > { %v2799_v30 = vld [vmem:[#allocation2 + $0x8] sm:$0xff] }
 0x9d9   : > { %v2800_v55 = vpack.c.bf16 %v2799_v30, %v2798_v39 }
 0x9db   : > { %3749 = vmatmul.mubr.bf16.vlgmr.msra.gmra.mrb[48].mxu1 %v2800_v55 }
 0xaae   : > { %v2899_v14 = vpop.f32.mrb[48].mxu1 }
 0xaaf   : > { %v2906_v36 = vadd.f32 %v4121_v10, %v2899_v14  ;;  %v3750_v43 = vpop.f32.mrb[49].mxu1 }
 0xab0   : > { %v2902_v7 = vpop.f32.mrb[50].mxu1 }
 0xab1   : > { %v5504_v26 = vadd.f32 %v3421_v58, %v2906_v36  ;;  %v2907_v44 = vadd.f32 %v4122_v42, %v2902_v7  ;;  %v3751_v2 = vpop.f32.mrb[51].mxu1 }
 0xab3   : > { %v5507_v23 = vadd.f32 %v3421_v58, %v2907_v44  ;;  %v2914_v63 = vsel %vm5629_vm2, %v5504_v26, 0.0 }
 0xab4   : > { %2915 = vadd.xlane.f32.xlu1 %v2914_v63 }
 0xab5   : > { %v2917_v18 = vsel %vm5630_vm0, %v5507_v23, 0.0 }
 0xab6   : > { %2918 = vadd.xlane.f32.xlu0 %v2917_v18 }
 0xb41   : > { %v2916_v13 = vpop.xlane.xlu1 %2915 }
 0xb42   : > { %v2920_v6 = vmul.f32 0.03125, %v2916_v13 }
 0xb43   : > { %v2919_v8 = vpop.xlane.xlu0 %2918 }
 0xb44   : > { %v2922_v31 = vsub.f32 %v5504_v26, %v2920_v6  ;;  %v2921_v35 = vmul.f32 0.03125, %v2919_v8  ;;  %v3436_v6 = vld [vmem:[#allocation6 + $0x5] ss:$0 sm:$0xff] }
 0xb46   : > { %v2923_v0 = vsub.f32 %v5507_v23, %v2921_v35  ;;  %v2924_v57 = vmul.f32 %v2922_v31, %v2922_v31 }
 0xb48   : > { %v2926_v24 = vsel %vm5631_vm3, %v2924_v57, 0.0  ;;  %v2925_v20 = vmul.f32 %v2923_v0, %v2923_v0 }
 0xb49   : > { %2927 = vadd.xlane.f32.xlu0 %v2926_v24 }
 0xb4a   : > { %v2929_v16 = vsel %vm5632_vm4, %v2925_v20, 0.0 }
 0xb4b   : > { %2930 = vadd.xlane.f32.xlu1 %v2929_v16 }
 0xbd6   : > { %v2928_v34 = vpop.xlane.xlu0 %2927 }
 0xbd7   : > { %v2932_v56 = vmul.f32 0.03125, %v2928_v34 }
 0xbd8   : > { %v2931_v27 = vpop.xlane.xlu1 %2930 }
 0xbd9   : > { %v2934_v50 = vadd.f32 1e-05, %v2932_v56  ;;  %v2933_v17 = vmul.f32 0.03125, %v2931_v27 }
 0xbdb   : > { %4113 = vrsqrt.f32 %v2934_v50  ;;  %v2935_v9 = vadd.f32 1e-05, %v2933_v17 }
 0xbdd   : > { %4115 = vrsqrt.f32 %v2935_v9 }
 0xbe5   : > { %v4114_v15 = vpop.eup %4113 }
 0xbe6   : > { %v2938_v29 = vmul.f32 %v4114_v15, %v2922_v31 }
 0xbe7   : > { %v4116_v62 = vpop.eup %4115 }
 0xbe8   : > { %v2944_v28 = vmul.f32 %v3422_v25, %v2938_v29  ;;  %v2939_v19 = vmul.f32 %v4116_v62, %v2923_v0 }
 0xbea   : > { %v2945_v38 = vmul.f32 %v3422_v25, %v2939_v19  ;;  %v2950_v48 = vadd.f32 %v3423_v45, %v2944_v28 }
 0xbec   : > { %v2951_v41 = vadd.f32 %v3423_v45, %v2945_v38 }
 0xbee   : > { %v2952_v37 = vpack.c.bf16 %v2951_v41, %v2950_v48 }
 0xbf0   : > { %3757 = vmatmul.mubr.msk.bf16.vlgmr.msra.gmra.mrb[64].mxu0 %vm5633_vm5, %v2952_v37 }
 0xbf1   : > { %3776 = vmatprep.mubr.msk.bf16.mxu0 %vm4462_vm1, %v4461_v33  ;;  %3761 = vmatpush3.bf16.msra.mxu0 %v3973_v47 }
 0xbf2   : > { %3762 = vmatprep.subr.bf16.mxu0 %v4461_v33 }
 0xbf5   : > { %3763 = vmatpush3.bf16.msra.mxu0 %v3974_v21 }
 0xbf6   : > { %3764 = vmatprep.subr.bf16.mxu0 %v4461_v33 }
 0xbf9   : > { %3765 = vmatpush3.bf16.msra.mxu0 %v3975_v51 }
 0xbfa   : > { %3766 = vmatprep.subr.bf16.mxu0 %v4461_v33 }
 0xbfd   : > { %3767 = vmatpush3.bf16.msra.mxu0 %v3976_v3 }
 0xbfe   : > { %3768 = vmatprep.subr.bf16.mxu0 %v4461_v33 }
 0xc01   : > { %3769 = vmatpush3.bf16.msra.mxu0 %v3977_v60 }
 0xc02   : > { %3770 = vmatprep.subr.bf16.mxu0 %v4461_v33 }
 0xc05   : > { %3771 = vmatpush3.bf16.msra.mxu0 %v3978_v52 }
 0xc06   : > { %3772 = vmatprep.subr.bf16.mxu0 %v4461_v33 }
 0xc09   : > { %3773 = vmatpush3.bf16.msra.mxu0 %v3979_v59 }
 0xc0a   : > { %3774 = vmatprep.subr.bf16.mxu0 %v4461_v33 }
 0xc0d   : > { %3775 = vmatpush3.bf16.msra.mxu0 %v3980_v12 }
 0xcc3   : > { %v3013_v4 = vpop.f32.mrb[64].mxu0 }
 0xcc4   : > { %v3014_v49 = vadd.f32 %v3424_v61, %v3013_v4  ;;  %v3758_v22 = vpop.f32.mrb[65].mxu0 }
 0xcc5   : > { %v3016_v53 = vpop.f32.mrb[66].mxu0 }
 0xcc6   : > { %v3022_v46 = vmul.f32 %v3014_v49, %v3014_v49  ;;  %v3017_v40 = vadd.f32 %v3424_v61, %v3016_v53  ;;  %v3759_v11 = vpop.f32.mrb[67].mxu0  ;;  %v3020_v42 = vmul.f32 0.5, %v3014_v49 }
 0xcc8   : > { %v3024_v1 = vmul.f32 %v3022_v46, %v3014_v49  ;;  %v3023_v32 = vmul.f32 %v3017_v40, %v3017_v40  ;;  %v3021_v44 = vmul.f32 0.5, %v3017_v40 }
 0xcca   : > { %v3026_v39 = vmul.f32 0.044715, %v3024_v1  ;;  %v3025_v30 = vmul.f32 %v3023_v32, %v3017_v40 }
 0xccc   : > { %v3028_v55 = vadd.f32 %v3026_v39, %v3014_v49  ;;  %v3027_v58 = vmul.f32 0.044715, %v3025_v30 }
 0xcce   : > { %v3030_v14 = vmul.f32 0.7978846, %v3028_v55  ;;  %v3029_v10 = vadd.f32 %v3027_v58, %v3017_v40 }
 0xcd0   : > { %4117 = vtanh.f32 %v3030_v14  ;;  %v3031_v36 = vmul.f32 0.7978846, %v3029_v10 }
 0xcd2   : > { %4119 = vtanh.f32 %v3031_v36 }
 0xcda   : > { %v4118_v33 = vpop.eup %4117 }
 0xcdb   : > { %v3034_v43 = vadd.f32 1.0, %v4118_v33 }
 0xcdc   : > { %v4120_v7 = vpop.eup %4119 }
 0xcdd   : > { %v3035_v2 = vadd.f32 1.0, %v4120_v7  ;;  %v3036_v63 = vmul.f32 %v3034_v43, %v3020_v42 }
 0xcdf   : > { %v3037_v18 = vmul.f32 %v3035_v2, %v3021_v44 }
 0xce1   : > { %v3038_v13 = vpack.c.bf16 %v3037_v18, %v3036_v63 }
 0xce3   : > { %3777 = vmatmul.mubr.bf16.vlgmr.msra.gmra.mrb[68].mxu0 %v3038_v13 }
 0xdb6   : > { %v3137_v8 = vpop.f32.mrb[68].mxu0 }
 0xdb7   : > { %v3144_v31 = vadd.f32 %v3137_v8, %v5504_v26  ;;  %v3778_v35 = vpop.f32.mrb[69].mxu0 }
 0xdb8   : > { %v3140_v0 = vpop.f32.mrb[70].mxu0 }
 0xdb9   : > { %v3150_v57 = vadd.f32 %v3436_v6, %v3144_v31  ;;  %v3145_v24 = vadd.f32 %v3140_v0, %v5507_v23  ;;  %v3779_v20 = vpop.f32.mrb[71].mxu0 }
 0xdbb   : > { %3152 = vst.msk [vmem:[%s421_s12] sm:$0xff] %vm5635_vm6, %v3150_v57  ;;  %v3151_v16 = vadd.f32 %v3436_v6, %v3145_v24 }
 0xdbd   : > { %3153 = vst.msk [vmem:[%s421_s12 + $0x8] sm:$0xff] %vm5636_vm7, %v3151_v16 }
 0xdbe   : > { %4362 = shalt.err (!%p4359_p0)
}
 0xdbf   : > { %s4363_s20 = scalar_lea.hbm %s5537_s22, 256  ;;  %s4367_s1 = scalar_lea.hbm %s5594_s8, 512 }
 0xdc0   : > { %p4364_p2 = scmp.ne.s32.totalorder %s5537_s22, %s4363_s20  ;;  %p4368_p12 = scmp.lt.u32.totalorder %s5537_s22, %s5594_s8 }
 0xdc1   : > { %p4369_p11 = scmp.lt.u32.totalorder %s4367_s1, %s4363_s20  ;;  %p4371_p5 = scmp.lt.u32.totalorder %s4363_s20, %s5537_s22 }
 0xdc2   : > { %p4365_p9 = pnand %p4364_p2, %p5637_p7 }
 0xdc3   : > { %p4370_p13 = por %p4369_p11, %p4368_p12 }
 0xdc4   : > { %p4366_p10 = pneg %p4365_p9 }
 0xdc5   : > { %p4372_p4 = por %p4371_p5, %p4370_p13 }
 0xdc7   : > { %p4373_p1 = pnand %p4372_p4, %p4366_p10 }
 0xdc9   : > { %4376 = shalt.err (!%p4373_p1)
}
 0xdca   : > { %s4464_s18 = smov 128  }
 0xdcb   : > { %3827 = dma.vmem_to_hbm [thread:$0]  (%p5637_p7), %s5540_s21, 256, %s5537_s22, %s3155_s11, %s4464_s18, %s4464_s18, %s4447_s3  }
 0xdcc PF: > { %s3183_s19 = sand.u32 1, %s4419_s27   ;;  %p5638_p3 = scmp.ne.s32.totalorder %s5614_s25, 0 }
 0xdcd   : > { %p5639_p8 = scmp.ge.s32.totalorder %s4431_s30, 2  ;;  %s3184_s15 = scalar_lea.sflag [#allocation5], %s3183_s19 }
 0xdcf   : > { %p3856_p6 = pnand %p5639_p8, %p5638_p3 }
 0xdd1   : > { %4414 = dma.done.wait (!%p3856_p6), %s3184_s15, 256  }
 0xdd2   : > { %4416 = vsyncadd (!%p3856_p6), %s3184_s15, 4294967040  ;;  %p25_p0 = scmp.ge.s32.totalorder %s4708_s23, 4   ;;  %s5640_s27 = smov %s4423_s28 }
 0xdd3   : > { %s5641_s28 = smov %s4427_s29  ;;  %s5642_s29 = smov %s4720_s17 }
 0xdd4   : > { %s5643_s30 = smov %s4708_s23  ;;  %27 = sbr.rel (!%p25_p0) target bundleno = 12 (0xc), region = 125 }
 0xddb   :  { %3189 = vsyncpa [#allocation4], 1 }
 0xddc   :  { %3191 = vsyncpa [#allocation4 + $0x1], 1 }
 0xddd   :  { %3192 = vsyncpa [#allocation7], 1 }
 0xdde   :  { %3193 = vsyncpa [#allocation10], 1 }
 0xddf   :  { %3194 = vsyncpa [#allocation13], 1 }
 0xde0   :  { %3195 = vsyncpa [#allocation16], 1 }
 0xde1   :  { %3196 = vsyncpa [#allocation5], 1 }
 0xde2   :  { %3198 = vsyncpa [#allocation5 + $0x1], 1 }

</bundles_post_ra>
